<compile_context>
chip_gen: v6e
topology: v6e:2x2x1
jax: 0.10.0
libtpu: 0.0.40
codegen_flags: <defaults>
</compile_context>

<pallas_src>
import math

import jax
import jax.numpy as jnp
from jax.experimental import pallas as pl
from jax.experimental.pallas import tpu as pltpu

# ---- small, deterministic problem sizes consistent with the module ----------
B = 2                      # batch
H_IN = 8                   # input rows ("time" axis of the spatial map)
W_IN = 5                   # input cols (neighborhood axis)
K_SIZE = 4                 # neigh_size  -> conv kernel (filter_size, k_size)
FILTER_SIZE = 1
HID = 32                   # rnn_param['hidden_size']
NUM_LAYERS = 1             # rnn_param['num_layers']
H_OUT = H_IN - FILTER_SIZE + 1
W_OUT = W_IN - K_SIZE + 1
SEQ = H_OUT * W_OUT        # LSTM sequence length after t.view(B, -1, 1)


def st_model_kernel(x_ref, cw_ref, cb_ref, wih_ref, whh_ref, bg_ref,
                    fcw_ref, fcb_ref, out_ref):
    # Loop-invariant weights hoisted once; whh stays resident in vregs across
    # the fully-unrolled recurrence (no per-step reload of the MXU RHS source).
    wih = wih_ref[...]            # (1, 4H)  W_ih^T   (g-gate columns x2)
    bg = bg_ref[...]              # (1, 4H)  b_ih+b_hh (g-gate columns x2)
    whh = whh_ref[...]            # (H, 4H)  W_hh^T   (g-gate columns x2)
    cb = cb_ref[0, 0]

    # ---- Conv2d(1, 1, (FILTER_SIZE, K_SIZE)) + ReLU, kept in vregs ----------
    # Precompute the input-path gate pre-activation for EVERY timestep before
    # the recurrence: xg[t] = x_t * W_ih^T + (b_ih + b_hh), each (B, 4H).
    # All of this is off the serial h -> gates -> h critical path.
    xg = []
    for i in range(H_OUT):
        row = jnp.zeros((B, W_OUT), jnp.float32)
        for p in range(FILTER_SIZE):
            for q in range(K_SIZE):
                row = row + x_ref[:, i + p, q:q + W_OUT] * cw_ref[p, q]
        row = jnp.maximum(row + cb, 0.0)                   # (B, W_OUT)
        for j in range(W_OUT):
            xg.append(row[:, j:j + 1] * wih + bg)          # (B, 4H)

    # ---- single-layer LSTM, fully unrolled (SEQ static), zero init state ----
    # 2 EUP pushes per step: one full-width sigmoid (g columns are pre-scaled
    # by 2 so tanh(g) = 2*sigmoid(2g) - 1) and one tanh(c).
    h = jnp.zeros((B, HID), jnp.float32)
    c = jnp.zeros((B, HID), jnp.float32)
    for t in range(SEQ):
        gates = xg[t] + jnp.dot(h, whh, preferred_element_type=jnp.float32)
        sig = jax.nn.sigmoid(gates)                        # single EUP push
        i_g = sig[:, 0:HID]
        f_g = sig[:, HID:2 * HID]
        g_g = 2.0 * sig[:, 2 * HID:3 * HID] - 1.0          # tanh via sigmoid
        o_g = sig[:, 3 * HID:4 * HID]
        c = f_g * c + i_g * g_g
        h = o_g * jnp.tanh(c)                              # second EUP push

    # ---- folded linearFC1: Linear(HID,10) -> Linear(10,1) == h @ W + b ------
    # fcw is the folded weight as a (1, HID) row; multiply + lane-reduce
    # instead of a 1-column MXU matmul.
    out = jnp.sum(h * fcw_ref[...], axis=1, keepdims=True) + fcb_ref[0, 0]
    out_ref[...] = out                                     # (B, 1)


def prepare_params(params):
    """One-time parameter prep, hoisted out of the per-call path:
       - fold Linear(HID,10) @ Linear(10,1) into one (1,HID) row + scalar bias,
       - pre-scale the g-gate columns of W_ih^T / W_hh^T / bias by 2 so the
         kernel needs a single sigmoid per step (tanh(x) = 2*sigmoid(2x) - 1).
    """
    cw, cb, wihT, whhT, bg, w1T, b1, w2T, b2 = params
    gate_scale = jnp.ones((1, 4 * HID), jnp.float32)
    gate_scale = gate_scale.at[:, 2 * HID:3 * HID].set(2.0)
    wihT_s = wihT * gate_scale
    whhT_s = whhT * gate_scale
    bg_s = bg * gate_scale
    fcw = (w1T @ w2T).reshape(1, HID)                      # (1, HID)
    fcb = b1 @ w2T + b2                                    # (1, 1)
    return (cw, cb, wihT_s, whhT_s, bg_s, fcw, fcb)


@jax.jit
def st_model_forward(x_nchw, kparams):
    assert NUM_LAYERS == 1, "only num_layers == 1 is implemented"
    cw, cb, wihT_s, whhT_s, bg_s, fcw, fcb = kparams
    x = x_nchw[:, 0]              # (B, H, W) — squeeze the single input channel
    # TODO(synk): for real throughput, batch many samples per call (sublane-
    # mapped batch tile + a "parallel" grid axis so v7x uses both TensorCores,
    # lane-dense (1, B)-shaped output); at B=2 a grid only adds overhead.
    return pl.pallas_call(
        st_model_kernel,
        out_shape=jax.ShapeDtypeStruct((NUM_LAYERS * B, 1), jnp.float32),
        in_specs=[
            pl.BlockSpec(memory_space=pltpu.MemorySpace.VMEM),   # x
            pl.BlockSpec(memory_space=pltpu.MemorySpace.SMEM),   # conv weight
            pl.BlockSpec(memory_space=pltpu.MemorySpace.SMEM),   # conv bias
            pl.BlockSpec(memory_space=pltpu.MemorySpace.VMEM),   # W_ih^T (scaled)
            pl.BlockSpec(memory_space=pltpu.MemorySpace.VMEM),   # W_hh^T (scaled)
            pl.BlockSpec(memory_space=pltpu.MemorySpace.VMEM),   # gate bias (scaled)
            pl.BlockSpec(memory_space=pltpu.MemorySpace.VMEM),   # folded FC weight
            pl.BlockSpec(memory_space=pltpu.MemorySpace.SMEM),   # folded FC bias
        ],
        out_specs=pl.BlockSpec(memory_space=pltpu.MemorySpace.VMEM),
    )(x, cw, cb, wihT_s, whhT_s, bg_s, fcw, fcb)


def reference_forward(x_nchw, params):
    """Pure-JAX replica of ST_MODEL.forward for validation (unfused)."""
    cw, cb, wihT, whhT, bg, w1T, b1, w2T, b2 = params
    x = x_nchw[:, 0]
    conv = jnp.zeros((B, H_OUT, W_OUT), jnp.float32)
    for p in range(FILTER_SIZE):
        for q in range(K_SIZE):
            conv = conv + x[:, p:p + H_OUT, q:q + W_OUT] * cw[p, q]
    conv = jnp.maximum(conv + cb[0, 0], 0.0)
    seq = conv.reshape(B, SEQ)
    h = jnp.zeros((B, HID), jnp.float32)
    c = jnp.zeros((B, HID), jnp.float32)
    for t in range(SEQ):
        x_t = seq[:, t:t + 1]
        gates = x_t * wihT + h @ whhT + bg
        i_g = jax.nn.sigmoid(gates[:, 0:HID])
        f_g = jax.nn.sigmoid(gates[:, HID:2 * HID])
        g_g = jnp.tanh(gates[:, 2 * HID:3 * HID])
        o_g = jax.nn.sigmoid(gates[:, 3 * HID:4 * HID])
        c = f_g * c + i_g * g_g
        h = o_g * jnp.tanh(c)
    z = h @ w1T + b1
    return z @ w2T + b2


def make_params(key):
    ks = jax.random.split(key, 9)
    u = lambda k, shape, s: jax.random.uniform(k, shape, jnp.float32, -s, s)
    s_hid = 1.0 / math.sqrt(HID)
    cw   = u(ks[0], (FILTER_SIZE, K_SIZE), 0.5)       # Conv2d weight (1,1,fs,ks)
    cb   = u(ks[1], (1, 1), 0.5)                      # Conv2d bias
    wihT = u(ks[2], (1, 4 * HID), s_hid)              # LSTM W_ih^T (input_size=1)
    whhT = u(ks[3], (HID, 4 * HID), s_hid)            # LSTM W_hh^T
    bg   = u(ks[4], (1, 4 * HID), s_hid)              # b_ih + b_hh combined
    w1T  = u(ks[5], (HID, 10), s_hid)                 # Linear(HID,10) weight^T
    b1   = u(ks[6], (1, 10), s_hid)
    w2T  = u(ks[7], (10, 1), 1.0 / math.sqrt(10))     # Linear(10,1) weight^T
    b2   = u(ks[8], (1, 1), 1.0 / math.sqrt(10))
    return (cw, cb, wihT, whhT, bg, w1T, b1, w2T, b2)


if __name__ == "__main__":
    key = jax.random.PRNGKey(0)
    k_p, k_x = jax.random.split(key)
    params = make_params(k_p)
    kparams = prepare_params(params)                   # one-time prep (folds/scaling)
    x = jax.random.uniform(k_x, (B, 1, H_IN, W_IN), jnp.float32)   # NCHW input

    out = jax.block_until_ready(st_model_forward(x, kparams))
    ref = jax.block_until_ready(reference_forward(x, params))

    assert out.shape == (NUM_LAYERS * B, 1), out.shape
    assert bool(jnp.allclose(out, ref, atol=5e-3, rtol=5e-3)), (out, ref)
    print("KERNEL_OK")
</pallas_src>

<mosaic_0001>
module attributes {stable_mosaic.version = 11 : i64} {
  func.func @st_model_kernel(%arg0: memref<2x8x5xf32, #tpu.memory_space<vmem>>, %arg1: memref<1x4xf32, #tpu.memory_space<smem>>, %arg2: memref<1x1xf32, #tpu.memory_space<smem>>, %arg3: memref<1x128xf32, #tpu.memory_space<vmem>>, %arg4: memref<32x128xf32, #tpu.memory_space<vmem>>, %arg5: memref<1x128xf32, #tpu.memory_space<vmem>>, %arg6: memref<1x32xf32, #tpu.memory_space<vmem>>, %arg7: memref<1x1xf32, #tpu.memory_space<smem>>, %arg8: memref<2x1xf32, #tpu.memory_space<vmem>>) attributes {dimension_semantics = [], scalar_prefetch = 0 : i64, scratch_operands = 0 : i64, tpu.core_type = #tpu.core_type<tc>} {
    %c0 = arith.constant 0 : index
    %c0_0 = arith.constant 0 : index
    %0 = vector.load %arg3[%c0, %c0_0] : memref<1x128xf32, #tpu.memory_space<vmem>>, vector<1x128xf32>
    %c0_1 = arith.constant 0 : index
    %c0_2 = arith.constant 0 : index
    %1 = vector.load %arg5[%c0_1, %c0_2] : memref<1x128xf32, #tpu.memory_space<vmem>>, vector<1x128xf32>
    %c0_3 = arith.constant 0 : index
    %c0_4 = arith.constant 0 : index
    %2 = vector.load %arg4[%c0_3, %c0_4] : memref<32x128xf32, #tpu.memory_space<vmem>>, vector<32x128xf32>
    %c0_5 = arith.constant 0 : index
    %c0_6 = arith.constant 0 : index
    %3 = memref.load %arg2[%c0_5, %c0_6] : memref<1x1xf32, #tpu.memory_space<smem>>
    %cst = arith.constant 0.000000e+00 : f32
    %4 = vector.broadcast %cst : f32 to vector<2x2xf32>
    %c0_7 = arith.constant 0 : index
    %c0_8 = arith.constant 0 : index
    %c0_9 = arith.constant 0 : index
    %5 = vector.load %arg0[%c0_7, %c0_8, %c0_9] : memref<2x8x5xf32, #tpu.memory_space<vmem>>, vector<2x1x2xf32>
    %6 = vector.shape_cast %5 : vector<2x1x2xf32> to vector<2x2xf32>
    %c0_10 = arith.constant 0 : index
    %c0_11 = arith.constant 0 : index
    %7 = memref.load %arg1[%c0_10, %c0_11] : memref<1x4xf32, #tpu.memory_space<smem>>
    %8 = vector.broadcast %7 : f32 to vector<2x2xf32>
    %9 = arith.mulf %6, %8 : vector<2x2xf32>
    %10 = arith.addf %4, %9 : vector<2x2xf32>
    %c0_12 = arith.constant 0 : index
    %c0_13 = arith.constant 0 : index
    %c1 = arith.constant 1 : index
    %11 = vector.load %arg0[%c0_12, %c0_13, %c1] : memref<2x8x5xf32, #tpu.memory_space<vmem>>, vector<2x1x2xf32>
    %12 = vector.shape_cast %11 : vector<2x1x2xf32> to vector<2x2xf32>
    %c0_14 = arith.constant 0 : index
    %c1_15 = arith.constant 1 : index
    %13 = memref.load %arg1[%c0_14, %c1_15] : memref<1x4xf32, #tpu.memory_space<smem>>
    %14 = vector.broadcast %13 : f32 to vector<2x2xf32>
    %15 = arith.mulf %12, %14 : vector<2x2xf32>
    %16 = arith.addf %10, %15 : vector<2x2xf32>
    %c0_16 = arith.constant 0 : index
    %c0_17 = arith.constant 0 : index
    %c2 = arith.constant 2 : index
    %17 = vector.load %arg0[%c0_16, %c0_17, %c2] : memref<2x8x5xf32, #tpu.memory_space<vmem>>, vector<2x1x2xf32>
    %18 = vector.shape_cast %17 : vector<2x1x2xf32> to vector<2x2xf32>
    %c0_18 = arith.constant 0 : index
    %c2_19 = arith.constant 2 : index
    %19 = memref.load %arg1[%c0_18, %c2_19] : memref<1x4xf32, #tpu.memory_space<smem>>
    %20 = vector.broadcast %19 : f32 to vector<2x2xf32>
    %21 = arith.mulf %18, %20 : vector<2x2xf32>
    %22 = arith.addf %16, %21 : vector<2x2xf32>
    %c0_20 = arith.constant 0 : index
    %c0_21 = arith.constant 0 : index
    %c3 = arith.constant 3 : index
    %23 = vector.load %arg0[%c0_20, %c0_21, %c3] : memref<2x8x5xf32, #tpu.memory_space<vmem>>, vector<2x1x2xf32>
    %24 = vector.shape_cast %23 : vector<2x1x2xf32> to vector<2x2xf32>
    %c0_22 = arith.constant 0 : index
    %c3_23 = arith.constant 3 : index
    %25 = memref.load %arg1[%c0_22, %c3_23] : memref<1x4xf32, #tpu.memory_space<smem>>
    %26 = vector.broadcast %25 : f32 to vector<2x2xf32>
    %27 = arith.mulf %24, %26 : vector<2x2xf32>
    %28 = arith.addf %22, %27 : vector<2x2xf32>
    %29 = vector.broadcast %3 : f32 to vector<2x2xf32>
    %30 = arith.addf %28, %29 : vector<2x2xf32>
    %cst_24 = arith.constant 0.000000e+00 : f32
    %31 = vector.broadcast %cst_24 : f32 to vector<2x2xf32>
    %32 = arith.maximumf %30, %31 : vector<2x2xf32>
    %33 = vector.extract_strided_slice %32 {offsets = [0, 0], sizes = [2, 1], strides = [1, 1]} : vector<2x2xf32> to vector<2x1xf32>
    %34 = vector.broadcast %33 : vector<2x1xf32> to vector<2x128xf32>
    %35 = vector.broadcast %0 : vector<1x128xf32> to vector<2x128xf32>
    %36 = arith.mulf %34, %35 : vector<2x128xf32>
    %37 = vector.broadcast %1 : vector<1x128xf32> to vector<2x128xf32>
    %38 = arith.addf %36, %37 : vector<2x128xf32>
    %39 = vector.extract_strided_slice %32 {offsets = [0, 1], sizes = [2, 1], strides = [1, 1]} : vector<2x2xf32> to vector<2x1xf32>
    %40 = vector.broadcast %39 : vector<2x1xf32> to vector<2x128xf32>
    %41 = vector.broadcast %0 : vector<1x128xf32> to vector<2x128xf32>
    %42 = arith.mulf %40, %41 : vector<2x128xf32>
    %43 = vector.broadcast %1 : vector<1x128xf32> to vector<2x128xf32>
    %44 = arith.addf %42, %43 : vector<2x128xf32>
    %cst_25 = arith.constant 0.000000e+00 : f32
    %45 = vector.broadcast %cst_25 : f32 to vector<2x2xf32>
    %c0_26 = arith.constant 0 : index
    %c1_27 = arith.constant 1 : index
    %c0_28 = arith.constant 0 : index
    %46 = vector.load %arg0[%c0_26, %c1_27, %c0_28] : memref<2x8x5xf32, #tpu.memory_space<vmem>>, vector<2x1x2xf32>
    %47 = vector.shape_cast %46 : vector<2x1x2xf32> to vector<2x2xf32>
    %c0_29 = arith.constant 0 : index
    %c0_30 = arith.constant 0 : index
    %48 = memref.load %arg1[%c0_29, %c0_30] : memref<1x4xf32, #tpu.memory_space<smem>>
    %49 = vector.broadcast %48 : f32 to vector<2x2xf32>
    %50 = arith.mulf %47, %49 : vector<2x2xf32>
    %51 = arith.addf %45, %50 : vector<2x2xf32>
    %c0_31 = arith.constant 0 : index
    %c1_32 = arith.constant 1 : index
    %c1_33 = arith.constant 1 : index
    %52 = vector.load %arg0[%c0_31, %c1_32, %c1_33] : memref<2x8x5xf32, #tpu.memory_space<vmem>>, vector<2x1x2xf32>
    %53 = vector.shape_cast %52 : vector<2x1x2xf32> to vector<2x2xf32>
    %c0_34 = arith.constant 0 : index
    %c1_35 = arith.constant 1 : index
    %54 = memref.load %arg1[%c0_34, %c1_35] : memref<1x4xf32, #tpu.memory_space<smem>>
    %55 = vector.broadcast %54 : f32 to vector<2x2xf32>
    %56 = arith.mulf %53, %55 : vector<2x2xf32>
    %57 = arith.addf %51, %56 : vector<2x2xf32>
    %c0_36 = arith.constant 0 : index
    %c1_37 = arith.constant 1 : index
    %c2_38 = arith.constant 2 : index
    %58 = vector.load %arg0[%c0_36, %c1_37, %c2_38] : memref<2x8x5xf32, #tpu.memory_space<vmem>>, vector<2x1x2xf32>
    %59 = vector.shape_cast %58 : vector<2x1x2xf32> to vector<2x2xf32>
    %c0_39 = arith.constant 0 : index
    %c2_40 = arith.constant 2 : index
    %60 = memref.load %arg1[%c0_39, %c2_40] : memref<1x4xf32, #tpu.memory_space<smem>>
    %61 = vector.broadcast %60 : f32 to vector<2x2xf32>
    %62 = arith.mulf %59, %61 : vector<2x2xf32>
    %63 = arith.addf %57, %62 : vector<2x2xf32>
    %c0_41 = arith.constant 0 : index
    %c1_42 = arith.constant 1 : index
    %c3_43 = arith.constant 3 : index
    %64 = vector.load %arg0[%c0_41, %c1_42, %c3_43] : memref<2x8x5xf32, #tpu.memory_space<vmem>>, vector<2x1x2xf32>
    %65 = vector.shape_cast %64 : vector<2x1x2xf32> to vector<2x2xf32>
    %c0_44 = arith.constant 0 : index
    %c3_45 = arith.constant 3 : index
    %66 = memref.load %arg1[%c0_44, %c3_45] : memref<1x4xf32, #tpu.memory_space<smem>>
    %67 = vector.broadcast %66 : f32 to vector<2x2xf32>
    %68 = arith.mulf %65, %67 : vector<2x2xf32>
    %69 = arith.addf %63, %68 : vector<2x2xf32>
    %70 = vector.broadcast %3 : f32 to vector<2x2xf32>
    %71 = arith.addf %69, %70 : vector<2x2xf32>
    %cst_46 = arith.constant 0.000000e+00 : f32
    %72 = vector.broadcast %cst_46 : f32 to vector<2x2xf32>
    %73 = arith.maximumf %71, %72 : vector<2x2xf32>
    %74 = vector.extract_strided_slice %73 {offsets = [0, 0], sizes = [2, 1], strides = [1, 1]} : vector<2x2xf32> to vector<2x1xf32>
    %75 = vector.broadcast %74 : vector<2x1xf32> to vector<2x128xf32>
    %76 = vector.broadcast %0 : vector<1x128xf32> to vector<2x128xf32>
    %77 = arith.mulf %75, %76 : vector<2x128xf32>
    %78 = vector.broadcast %1 : vector<1x128xf32> to vector<2x128xf32>
    %79 = arith.addf %77, %78 : vector<2x128xf32>
    %80 = vector.extract_strided_slice %73 {offsets = [0, 1], sizes = [2, 1], strides = [1, 1]} : vector<2x2xf32> to vector<2x1xf32>
    %81 = vector.broadcast %80 : vector<2x1xf32> to vector<2x128xf32>
    %82 = vector.broadcast %0 : vector<1x128xf32> to vector<2x128xf32>
    %83 = arith.mulf %81, %82 : vector<2x128xf32>
    %84 = vector.broadcast %1 : vector<1x128xf32> to vector<2x128xf32>
    %85 = arith.addf %83, %84 : vector<2x128xf32>
    %cst_47 = arith.constant 0.000000e+00 : f32
    %86 = vector.broadcast %cst_47 : f32 to vector<2x2xf32>
    %c0_48 = arith.constant 0 : index
    %c2_49 = arith.constant 2 : index
    %c0_50 = arith.constant 0 : index
    %87 = vector.load %arg0[%c0_48, %c2_49, %c0_50] : memref<2x8x5xf32, #tpu.memory_space<vmem>>, vector<2x1x2xf32>
    %88 = vector.shape_cast %87 : vector<2x1x2xf32> to vector<2x2xf32>
    %c0_51 = arith.constant 0 : index
    %c0_52 = arith.constant 0 : index
    %89 = memref.load %arg1[%c0_51, %c0_52] : memref<1x4xf32, #tpu.memory_space<smem>>
    %90 = vector.broadcast %89 : f32 to vector<2x2xf32>
    %91 = arith.mulf %88, %90 : vector<2x2xf32>
    %92 = arith.addf %86, %91 : vector<2x2xf32>
    %c0_53 = arith.constant 0 : index
    %c2_54 = arith.constant 2 : index
    %c1_55 = arith.constant 1 : index
    %93 = vector.load %arg0[%c0_53, %c2_54, %c1_55] : memref<2x8x5xf32, #tpu.memory_space<vmem>>, vector<2x1x2xf32>
    %94 = vector.shape_cast %93 : vector<2x1x2xf32> to vector<2x2xf32>
    %c0_56 = arith.constant 0 : index
    %c1_57 = arith.constant 1 : index
    %95 = memref.load %arg1[%c0_56, %c1_57] : memref<1x4xf32, #tpu.memory_space<smem>>
    %96 = vector.broadcast %95 : f32 to vector<2x2xf32>
    %97 = arith.mulf %94, %96 : vector<2x2xf32>
    %98 = arith.addf %92, %97 : vector<2x2xf32>
    %c0_58 = arith.constant 0 : index
    %c2_59 = arith.constant 2 : index
    %c2_60 = arith.constant 2 : index
    %99 = vector.load %arg0[%c0_58, %c2_59, %c2_60] : memref<2x8x5xf32, #tpu.memory_space<vmem>>, vector<2x1x2xf32>
    %100 = vector.shape_cast %99 : vector<2x1x2xf32> to vector<2x2xf32>
    %c0_61 = arith.constant 0 : index
    %c2_62 = arith.constant 2 : index
    %101 = memref.load %arg1[%c0_61, %c2_62] : memref<1x4xf32, #tpu.memory_space<smem>>
    %102 = vector.broadcast %101 : f32 to vector<2x2xf32>
    %103 = arith.mulf %100, %102 : vector<2x2xf32>
    %104 = arith.addf %98, %103 : vector<2x2xf32>
    %c0_63 = arith.constant 0 : index
    %c2_64 = arith.constant 2 : index
    %c3_65 = arith.constant 3 : index
    %105 = vector.load %arg0[%c0_63, %c2_64, %c3_65] : memref<2x8x5xf32, #tpu.memory_space<vmem>>, vector<2x1x2xf32>
    %106 = vector.shape_cast %105 : vector<2x1x2xf32> to vector<2x2xf32>
    %c0_66 = arith.constant 0 : index
    %c3_67 = arith.constant 3 : index
    %107 = memref.load %arg1[%c0_66, %c3_67] : memref<1x4xf32, #tpu.memory_space<smem>>
    %108 = vector.broadcast %107 : f32 to vector<2x2xf32>
    %109 = arith.mulf %106, %108 : vector<2x2xf32>
    %110 = arith.addf %104, %109 : vector<2x2xf32>
    %111 = vector.broadcast %3 : f32 to vector<2x2xf32>
    %112 = arith.addf %110, %111 : vector<2x2xf32>
    %cst_68 = arith.constant 0.000000e+00 : f32
    %113 = vector.broadcast %cst_68 : f32 to vector<2x2xf32>
    %114 = arith.maximumf %112, %113 : vector<2x2xf32>
    %115 = vector.extract_strided_slice %114 {offsets = [0, 0], sizes = [2, 1], strides = [1, 1]} : vector<2x2xf32> to vector<2x1xf32>
    %116 = vector.broadcast %115 : vector<2x1xf32> to vector<2x128xf32>
    %117 = vector.broadcast %0 : vector<1x128xf32> to vector<2x128xf32>
    %118 = arith.mulf %116, %117 : vector<2x128xf32>
    %119 = vector.broadcast %1 : vector<1x128xf32> to vector<2x128xf32>
    %120 = arith.addf %118, %119 : vector<2x128xf32>
    %121 = vector.extract_strided_slice %114 {offsets = [0, 1], sizes = [2, 1], strides = [1, 1]} : vector<2x2xf32> to vector<2x1xf32>
    %122 = vector.broadcast %121 : vector<2x1xf32> to vector<2x128xf32>
    %123 = vector.broadcast %0 : vector<1x128xf32> to vector<2x128xf32>
    %124 = arith.mulf %122, %123 : vector<2x128xf32>
    %125 = vector.broadcast %1 : vector<1x128xf32> to vector<2x128xf32>
    %126 = arith.addf %124, %125 : vector<2x128xf32>
    %cst_69 = arith.constant 0.000000e+00 : f32
    %127 = vector.broadcast %cst_69 : f32 to vector<2x2xf32>
    %c0_70 = arith.constant 0 : index
    %c3_71 = arith.constant 3 : index
    %c0_72 = arith.constant 0 : index
    %128 = vector.load %arg0[%c0_70, %c3_71, %c0_72] : memref<2x8x5xf32, #tpu.memory_space<vmem>>, vector<2x1x2xf32>
    %129 = vector.shape_cast %128 : vector<2x1x2xf32> to vector<2x2xf32>
    %c0_73 = arith.constant 0 : index
    %c0_74 = arith.constant 0 : index
    %130 = memref.load %arg1[%c0_73, %c0_74] : memref<1x4xf32, #tpu.memory_space<smem>>
    %131 = vector.broadcast %130 : f32 to vector<2x2xf32>
    %132 = arith.mulf %129, %131 : vector<2x2xf32>
    %133 = arith.addf %127, %132 : vector<2x2xf32>
    %c0_75 = arith.constant 0 : index
    %c3_76 = arith.constant 3 : index
    %c1_77 = arith.constant 1 : index
    %134 = vector.load %arg0[%c0_75, %c3_76, %c1_77] : memref<2x8x5xf32, #tpu.memory_space<vmem>>, vector<2x1x2xf32>
    %135 = vector.shape_cast %134 : vector<2x1x2xf32> to vector<2x2xf32>
    %c0_78 = arith.constant 0 : index
    %c1_79 = arith.constant 1 : index
    %136 = memref.load %arg1[%c0_78, %c1_79] : memref<1x4xf32, #tpu.memory_space<smem>>
    %137 = vector.broadcast %136 : f32 to vector<2x2xf32>
    %138 = arith.mulf %135, %137 : vector<2x2xf32>
    %139 = arith.addf %133, %138 : vector<2x2xf32>
    %c0_80 = arith.constant 0 : index
    %c3_81 = arith.constant 3 : index
    %c2_82 = arith.constant 2 : index
    %140 = vector.load %arg0[%c0_80, %c3_81, %c2_82] : memref<2x8x5xf32, #tpu.memory_space<vmem>>, vector<2x1x2xf32>
    %141 = vector.shape_cast %140 : vector<2x1x2xf32> to vector<2x2xf32>
    %c0_83 = arith.constant 0 : index
    %c2_84 = arith.constant 2 : index
    %142 = memref.load %arg1[%c0_83, %c2_84] : memref<1x4xf32, #tpu.memory_space<smem>>
    %143 = vector.broadcast %142 : f32 to vector<2x2xf32>
    %144 = arith.mulf %141, %143 : vector<2x2xf32>
    %145 = arith.addf %139, %144 : vector<2x2xf32>
    %c0_85 = arith.constant 0 : index
    %c3_86 = arith.constant 3 : index
    %c3_87 = arith.constant 3 : index
    %146 = vector.load %arg0[%c0_85, %c3_86, %c3_87] : memref<2x8x5xf32, #tpu.memory_space<vmem>>, vector<2x1x2xf32>
    %147 = vector.shape_cast %146 : vector<2x1x2xf32> to vector<2x2xf32>
    %c0_88 = arith.constant 0 : index
    %c3_89 = arith.constant 3 : index
    %148 = memref.load %arg1[%c0_88, %c3_89] : memref<1x4xf32, #tpu.memory_space<smem>>
    %149 = vector.broadcast %148 : f32 to vector<2x2xf32>
    %150 = arith.mulf %147, %149 : vector<2x2xf32>
    %151 = arith.addf %145, %150 : vector<2x2xf32>
    %152 = vector.broadcast %3 : f32 to vector<2x2xf32>
    %153 = arith.addf %151, %152 : vector<2x2xf32>
    %cst_90 = arith.constant 0.000000e+00 : f32
    %154 = vector.broadcast %cst_90 : f32 to vector<2x2xf32>
    %155 = arith.maximumf %153, %154 : vector<2x2xf32>
    %156 = vector.extract_strided_slice %155 {offsets = [0, 0], sizes = [2, 1], strides = [1, 1]} : vector<2x2xf32> to vector<2x1xf32>
    %157 = vector.broadcast %156 : vector<2x1xf32> to vector<2x128xf32>
    %158 = vector.broadcast %0 : vector<1x128xf32> to vector<2x128xf32>
    %159 = arith.mulf %157, %158 : vector<2x128xf32>
    %160 = vector.broadcast %1 : vector<1x128xf32> to vector<2x128xf32>
    %161 = arith.addf %159, %160 : vector<2x128xf32>
    %162 = vector.extract_strided_slice %155 {offsets = [0, 1], sizes = [2, 1], strides = [1, 1]} : vector<2x2xf32> to vector<2x1xf32>
    %163 = vector.broadcast %162 : vector<2x1xf32> to vector<2x128xf32>
    %164 = vector.broadcast %0 : vector<1x128xf32> to vector<2x128xf32>
    %165 = arith.mulf %163, %164 : vector<2x128xf32>
    %166 = vector.broadcast %1 : vector<1x128xf32> to vector<2x128xf32>
    %167 = arith.addf %165, %166 : vector<2x128xf32>
    %cst_91 = arith.constant 0.000000e+00 : f32
    %168 = vector.broadcast %cst_91 : f32 to vector<2x2xf32>
    %c0_92 = arith.constant 0 : index
    %c4 = arith.constant 4 : index
    %c0_93 = arith.constant 0 : index
    %169 = vector.load %arg0[%c0_92, %c4, %c0_93] : memref<2x8x5xf32, #tpu.memory_space<vmem>>, vector<2x1x2xf32>
    %170 = vector.shape_cast %169 : vector<2x1x2xf32> to vector<2x2xf32>
    %c0_94 = arith.constant 0 : index
    %c0_95 = arith.constant 0 : index
    %171 = memref.load %arg1[%c0_94, %c0_95] : memref<1x4xf32, #tpu.memory_space<smem>>
    %172 = vector.broadcast %171 : f32 to vector<2x2xf32>
    %173 = arith.mulf %170, %172 : vector<2x2xf32>
    %174 = arith.addf %168, %173 : vector<2x2xf32>
    %c0_96 = arith.constant 0 : index
    %c4_97 = arith.constant 4 : index
    %c1_98 = arith.constant 1 : index
    %175 = vector.load %arg0[%c0_96, %c4_97, %c1_98] : memref<2x8x5xf32, #tpu.memory_space<vmem>>, vector<2x1x2xf32>
    %176 = vector.shape_cast %175 : vector<2x1x2xf32> to vector<2x2xf32>
    %c0_99 = arith.constant 0 : index
    %c1_100 = arith.constant 1 : index
    %177 = memref.load %arg1[%c0_99, %c1_100] : memref<1x4xf32, #tpu.memory_space<smem>>
    %178 = vector.broadcast %177 : f32 to vector<2x2xf32>
    %179 = arith.mulf %176, %178 : vector<2x2xf32>
    %180 = arith.addf %174, %179 : vector<2x2xf32>
    %c0_101 = arith.constant 0 : index
    %c4_102 = arith.constant 4 : index
    %c2_103 = arith.constant 2 : index
    %181 = vector.load %arg0[%c0_101, %c4_102, %c2_103] : memref<2x8x5xf32, #tpu.memory_space<vmem>>, vector<2x1x2xf32>
    %182 = vector.shape_cast %181 : vector<2x1x2xf32> to vector<2x2xf32>
    %c0_104 = arith.constant 0 : index
    %c2_105 = arith.constant 2 : index
    %183 = memref.load %arg1[%c0_104, %c2_105] : memref<1x4xf32, #tpu.memory_space<smem>>
    %184 = vector.broadcast %183 : f32 to vector<2x2xf32>
    %185 = arith.mulf %182, %184 : vector<2x2xf32>
    %186 = arith.addf %180, %185 : vector<2x2xf32>
    %c0_106 = arith.constant 0 : index
    %c4_107 = arith.constant 4 : index
    %c3_108 = arith.constant 3 : index
    %187 = vector.load %arg0[%c0_106, %c4_107, %c3_108] : memref<2x8x5xf32, #tpu.memory_space<vmem>>, vector<2x1x2xf32>
    %188 = vector.shape_cast %187 : vector<2x1x2xf32> to vector<2x2xf32>
    %c0_109 = arith.constant 0 : index
    %c3_110 = arith.constant 3 : index
    %189 = memref.load %arg1[%c0_109, %c3_110] : memref<1x4xf32, #tpu.memory_space<smem>>
    %190 = vector.broadcast %189 : f32 to vector<2x2xf32>
    %191 = arith.mulf %188, %190 : vector<2x2xf32>
    %192 = arith.addf %186, %191 : vector<2x2xf32>
    %193 = vector.broadcast %3 : f32 to vector<2x2xf32>
    %194 = arith.addf %192, %193 : vector<2x2xf32>
    %cst_111 = arith.constant 0.000000e+00 : f32
    %195 = vector.broadcast %cst_111 : f32 to vector<2x2xf32>
    %196 = arith.maximumf %194, %195 : vector<2x2xf32>
    %197 = vector.extract_strided_slice %196 {offsets = [0, 0], sizes = [2, 1], strides = [1, 1]} : vector<2x2xf32> to vector<2x1xf32>
    %198 = vector.broadcast %197 : vector<2x1xf32> to vector<2x128xf32>
    %199 = vector.broadcast %0 : vector<1x128xf32> to vector<2x128xf32>
    %200 = arith.mulf %198, %199 : vector<2x128xf32>
    %201 = vector.broadcast %1 : vector<1x128xf32> to vector<2x128xf32>
    %202 = arith.addf %200, %201 : vector<2x128xf32>
    %203 = vector.extract_strided_slice %196 {offsets = [0, 1], sizes = [2, 1], strides = [1, 1]} : vector<2x2xf32> to vector<2x1xf32>
    %204 = vector.broadcast %203 : vector<2x1xf32> to vector<2x128xf32>
    %205 = vector.broadcast %0 : vector<1x128xf32> to vector<2x128xf32>
    %206 = arith.mulf %204, %205 : vector<2x128xf32>
    %207 = vector.broadcast %1 : vector<1x128xf32> to vector<2x128xf32>
    %208 = arith.addf %206, %207 : vector<2x128xf32>
    %cst_112 = arith.constant 0.000000e+00 : f32
    %209 = vector.broadcast %cst_112 : f32 to vector<2x2xf32>
    %c0_113 = arith.constant 0 : index
    %c5 = arith.constant 5 : index
    %c0_114 = arith.constant 0 : index
    %210 = vector.load %arg0[%c0_113, %c5, %c0_114] : memref<2x8x5xf32, #tpu.memory_space<vmem>>, vector<2x1x2xf32>
    %211 = vector.shape_cast %210 : vector<2x1x2xf32> to vector<2x2xf32>
    %c0_115 = arith.constant 0 : index
    %c0_116 = arith.constant 0 : index
    %212 = memref.load %arg1[%c0_115, %c0_116] : memref<1x4xf32, #tpu.memory_space<smem>>
    %213 = vector.broadcast %212 : f32 to vector<2x2xf32>
    %214 = arith.mulf %211, %213 : vector<2x2xf32>
    %215 = arith.addf %209, %214 : vector<2x2xf32>
    %c0_117 = arith.constant 0 : index
    %c5_118 = arith.constant 5 : index
    %c1_119 = arith.constant 1 : index
    %216 = vector.load %arg0[%c0_117, %c5_118, %c1_119] : memref<2x8x5xf32, #tpu.memory_space<vmem>>, vector<2x1x2xf32>
    %217 = vector.shape_cast %216 : vector<2x1x2xf32> to vector<2x2xf32>
    %c0_120 = arith.constant 0 : index
    %c1_121 = arith.constant 1 : index
    %218 = memref.load %arg1[%c0_120, %c1_121] : memref<1x4xf32, #tpu.memory_space<smem>>
    %219 = vector.broadcast %218 : f32 to vector<2x2xf32>
    %220 = arith.mulf %217, %219 : vector<2x2xf32>
    %221 = arith.addf %215, %220 : vector<2x2xf32>
    %c0_122 = arith.constant 0 : index
    %c5_123 = arith.constant 5 : index
    %c2_124 = arith.constant 2 : index
    %222 = vector.load %arg0[%c0_122, %c5_123, %c2_124] : memref<2x8x5xf32, #tpu.memory_space<vmem>>, vector<2x1x2xf32>
    %223 = vector.shape_cast %222 : vector<2x1x2xf32> to vector<2x2xf32>
    %c0_125 = arith.constant 0 : index
    %c2_126 = arith.constant 2 : index
    %224 = memref.load %arg1[%c0_125, %c2_126] : memref<1x4xf32, #tpu.memory_space<smem>>
    %225 = vector.broadcast %224 : f32 to vector<2x2xf32>
    %226 = arith.mulf %223, %225 : vector<2x2xf32>
    %227 = arith.addf %221, %226 : vector<2x2xf32>
    %c0_127 = arith.constant 0 : index
    %c5_128 = arith.constant 5 : index
    %c3_129 = arith.constant 3 : index
    %228 = vector.load %arg0[%c0_127, %c5_128, %c3_129] : memref<2x8x5xf32, #tpu.memory_space<vmem>>, vector<2x1x2xf32>
    %229 = vector.shape_cast %228 : vector<2x1x2xf32> to vector<2x2xf32>
    %c0_130 = arith.constant 0 : index
    %c3_131 = arith.constant 3 : index
    %230 = memref.load %arg1[%c0_130, %c3_131] : memref<1x4xf32, #tpu.memory_space<smem>>
    %231 = vector.broadcast %230 : f32 to vector<2x2xf32>
    %232 = arith.mulf %229, %231 : vector<2x2xf32>
    %233 = arith.addf %227, %232 : vector<2x2xf32>
    %234 = vector.broadcast %3 : f32 to vector<2x2xf32>
    %235 = arith.addf %233, %234 : vector<2x2xf32>
    %cst_132 = arith.constant 0.000000e+00 : f32
    %236 = vector.broadcast %cst_132 : f32 to vector<2x2xf32>
    %237 = arith.maximumf %235, %236 : vector<2x2xf32>
    %238 = vector.extract_strided_slice %237 {offsets = [0, 0], sizes = [2, 1], strides = [1, 1]} : vector<2x2xf32> to vector<2x1xf32>
    %239 = vector.broadcast %238 : vector<2x1xf32> to vector<2x128xf32>
    %240 = vector.broadcast %0 : vector<1x128xf32> to vector<2x128xf32>
    %241 = arith.mulf %239, %240 : vector<2x128xf32>
    %242 = vector.broadcast %1 : vector<1x128xf32> to vector<2x128xf32>
    %243 = arith.addf %241, %242 : vector<2x128xf32>
    %244 = vector.extract_strided_slice %237 {offsets = [0, 1], sizes = [2, 1], strides = [1, 1]} : vector<2x2xf32> to vector<2x1xf32>
    %245 = vector.broadcast %244 : vector<2x1xf32> to vector<2x128xf32>
    %246 = vector.broadcast %0 : vector<1x128xf32> to vector<2x128xf32>
    %247 = arith.mulf %245, %246 : vector<2x128xf32>
    %248 = vector.broadcast %1 : vector<1x128xf32> to vector<2x128xf32>
    %249 = arith.addf %247, %248 : vector<2x128xf32>
    %cst_133 = arith.constant 0.000000e+00 : f32
    %250 = vector.broadcast %cst_133 : f32 to vector<2x2xf32>
    %c0_134 = arith.constant 0 : index
    %c6 = arith.constant 6 : index
    %c0_135 = arith.constant 0 : index
    %251 = vector.load %arg0[%c0_134, %c6, %c0_135] : memref<2x8x5xf32, #tpu.memory_space<vmem>>, vector<2x1x2xf32>
    %252 = vector.shape_cast %251 : vector<2x1x2xf32> to vector<2x2xf32>
    %c0_136 = arith.constant 0 : index
    %c0_137 = arith.constant 0 : index
    %253 = memref.load %arg1[%c0_136, %c0_137] : memref<1x4xf32, #tpu.memory_space<smem>>
    %254 = vector.broadcast %253 : f32 to vector<2x2xf32>
    %255 = arith.mulf %252, %254 : vector<2x2xf32>
    %256 = arith.addf %250, %255 : vector<2x2xf32>
    %c0_138 = arith.constant 0 : index
    %c6_139 = arith.constant 6 : index
    %c1_140 = arith.constant 1 : index
    %257 = vector.load %arg0[%c0_138, %c6_139, %c1_140] : memref<2x8x5xf32, #tpu.memory_space<vmem>>, vector<2x1x2xf32>
    %258 = vector.shape_cast %257 : vector<2x1x2xf32> to vector<2x2xf32>
    %c0_141 = arith.constant 0 : index
    %c1_142 = arith.constant 1 : index
    %259 = memref.load %arg1[%c0_141, %c1_142] : memref<1x4xf32, #tpu.memory_space<smem>>
    %260 = vector.broadcast %259 : f32 to vector<2x2xf32>
    %261 = arith.mulf %258, %260 : vector<2x2xf32>
    %262 = arith.addf %256, %261 : vector<2x2xf32>
    %c0_143 = arith.constant 0 : index
    %c6_144 = arith.constant 6 : index
    %c2_145 = arith.constant 2 : index
    %263 = vector.load %arg0[%c0_143, %c6_144, %c2_145] : memref<2x8x5xf32, #tpu.memory_space<vmem>>, vector<2x1x2xf32>
    %264 = vector.shape_cast %263 : vector<2x1x2xf32> to vector<2x2xf32>
    %c0_146 = arith.constant 0 : index
    %c2_147 = arith.constant 2 : index
    %265 = memref.load %arg1[%c0_146, %c2_147] : memref<1x4xf32, #tpu.memory_space<smem>>
    %266 = vector.broadcast %265 : f32 to vector<2x2xf32>
    %267 = arith.mulf %264, %266 : vector<2x2xf32>
    %268 = arith.addf %262, %267 : vector<2x2xf32>
    %c0_148 = arith.constant 0 : index
    %c6_149 = arith.constant 6 : index
    %c3_150 = arith.constant 3 : index
    %269 = vector.load %arg0[%c0_148, %c6_149, %c3_150] : memref<2x8x5xf32, #tpu.memory_space<vmem>>, vector<2x1x2xf32>
    %270 = vector.shape_cast %269 : vector<2x1x2xf32> to vector<2x2xf32>
    %c0_151 = arith.constant 0 : index
    %c3_152 = arith.constant 3 : index
    %271 = memref.load %arg1[%c0_151, %c3_152] : memref<1x4xf32, #tpu.memory_space<smem>>
    %272 = vector.broadcast %271 : f32 to vector<2x2xf32>
    %273 = arith.mulf %270, %272 : vector<2x2xf32>
    %274 = arith.addf %268, %273 : vector<2x2xf32>
    %275 = vector.broadcast %3 : f32 to vector<2x2xf32>
    %276 = arith.addf %274, %275 : vector<2x2xf32>
    %cst_153 = arith.constant 0.000000e+00 : f32
    %277 = vector.broadcast %cst_153 : f32 to vector<2x2xf32>
    %278 = arith.maximumf %276, %277 : vector<2x2xf32>
    %279 = vector.extract_strided_slice %278 {offsets = [0, 0], sizes = [2, 1], strides = [1, 1]} : vector<2x2xf32> to vector<2x1xf32>
    %280 = vector.broadcast %279 : vector<2x1xf32> to vector<2x128xf32>
    %281 = vector.broadcast %0 : vector<1x128xf32> to vector<2x128xf32>
    %282 = arith.mulf %280, %281 : vector<2x128xf32>
    %283 = vector.broadcast %1 : vector<1x128xf32> to vector<2x128xf32>
    %284 = arith.addf %282, %283 : vector<2x128xf32>
    %285 = vector.extract_strided_slice %278 {offsets = [0, 1], sizes = [2, 1], strides = [1, 1]} : vector<2x2xf32> to vector<2x1xf32>
    %286 = vector.broadcast %285 : vector<2x1xf32> to vector<2x128xf32>
    %287 = vector.broadcast %0 : vector<1x128xf32> to vector<2x128xf32>
    %288 = arith.mulf %286, %287 : vector<2x128xf32>
    %289 = vector.broadcast %1 : vector<1x128xf32> to vector<2x128xf32>
    %290 = arith.addf %288, %289 : vector<2x128xf32>
    %cst_154 = arith.constant 0.000000e+00 : f32
    %291 = vector.broadcast %cst_154 : f32 to vector<2x2xf32>
    %c0_155 = arith.constant 0 : index
    %c7 = arith.constant 7 : index
    %c0_156 = arith.constant 0 : index
    %292 = vector.load %arg0[%c0_155, %c7, %c0_156] : memref<2x8x5xf32, #tpu.memory_space<vmem>>, vector<2x1x2xf32>
    %293 = vector.shape_cast %292 : vector<2x1x2xf32> to vector<2x2xf32>
    %c0_157 = arith.constant 0 : index
    %c0_158 = arith.constant 0 : index
    %294 = memref.load %arg1[%c0_157, %c0_158] : memref<1x4xf32, #tpu.memory_space<smem>>
    %295 = vector.broadcast %294 : f32 to vector<2x2xf32>
    %296 = arith.mulf %293, %295 : vector<2x2xf32>
    %297 = arith.addf %291, %296 : vector<2x2xf32>
    %c0_159 = arith.constant 0 : index
    %c7_160 = arith.constant 7 : index
    %c1_161 = arith.constant 1 : index
    %298 = vector.load %arg0[%c0_159, %c7_160, %c1_161] : memref<2x8x5xf32, #tpu.memory_space<vmem>>, vector<2x1x2xf32>
    %299 = vector.shape_cast %298 : vector<2x1x2xf32> to vector<2x2xf32>
    %c0_162 = arith.constant 0 : index
    %c1_163 = arith.constant 1 : index
    %300 = memref.load %arg1[%c0_162, %c1_163] : memref<1x4xf32, #tpu.memory_space<smem>>
    %301 = vector.broadcast %300 : f32 to vector<2x2xf32>
    %302 = arith.mulf %299, %301 : vector<2x2xf32>
    %303 = arith.addf %297, %302 : vector<2x2xf32>
    %c0_164 = arith.constant 0 : index
    %c7_165 = arith.constant 7 : index
    %c2_166 = arith.constant 2 : index
    %304 = vector.load %arg0[%c0_164, %c7_165, %c2_166] : memref<2x8x5xf32, #tpu.memory_space<vmem>>, vector<2x1x2xf32>
    %305 = vector.shape_cast %304 : vector<2x1x2xf32> to vector<2x2xf32>
    %c0_167 = arith.constant 0 : index
    %c2_168 = arith.constant 2 : index
    %306 = memref.load %arg1[%c0_167, %c2_168] : memref<1x4xf32, #tpu.memory_space<smem>>
    %307 = vector.broadcast %306 : f32 to vector<2x2xf32>
    %308 = arith.mulf %305, %307 : vector<2x2xf32>
    %309 = arith.addf %303, %308 : vector<2x2xf32>
    %c0_169 = arith.constant 0 : index
    %c7_170 = arith.constant 7 : index
    %c3_171 = arith.constant 3 : index
    %310 = vector.load %arg0[%c0_169, %c7_170, %c3_171] : memref<2x8x5xf32, #tpu.memory_space<vmem>>, vector<2x1x2xf32>
    %311 = vector.shape_cast %310 : vector<2x1x2xf32> to vector<2x2xf32>
    %c0_172 = arith.constant 0 : index
    %c3_173 = arith.constant 3 : index
    %312 = memref.load %arg1[%c0_172, %c3_173] : memref<1x4xf32, #tpu.memory_space<smem>>
    %313 = vector.broadcast %312 : f32 to vector<2x2xf32>
    %314 = arith.mulf %311, %313 : vector<2x2xf32>
    %315 = arith.addf %309, %314 : vector<2x2xf32>
    %316 = vector.broadcast %3 : f32 to vector<2x2xf32>
    %317 = arith.addf %315, %316 : vector<2x2xf32>
    %cst_174 = arith.constant 0.000000e+00 : f32
    %318 = vector.broadcast %cst_174 : f32 to vector<2x2xf32>
    %319 = arith.maximumf %317, %318 : vector<2x2xf32>
    %320 = vector.extract_strided_slice %319 {offsets = [0, 0], sizes = [2, 1], strides = [1, 1]} : vector<2x2xf32> to vector<2x1xf32>
    %321 = vector.broadcast %320 : vector<2x1xf32> to vector<2x128xf32>
    %322 = vector.broadcast %0 : vector<1x128xf32> to vector<2x128xf32>
    %323 = arith.mulf %321, %322 : vector<2x128xf32>
    %324 = vector.broadcast %1 : vector<1x128xf32> to vector<2x128xf32>
    %325 = arith.addf %323, %324 : vector<2x128xf32>
    %326 = vector.extract_strided_slice %319 {offsets = [0, 1], sizes = [2, 1], strides = [1, 1]} : vector<2x2xf32> to vector<2x1xf32>
    %327 = vector.broadcast %326 : vector<2x1xf32> to vector<2x128xf32>
    %328 = vector.broadcast %0 : vector<1x128xf32> to vector<2x128xf32>
    %329 = arith.mulf %327, %328 : vector<2x128xf32>
    %330 = vector.broadcast %1 : vector<1x128xf32> to vector<2x128xf32>
    %331 = arith.addf %329, %330 : vector<2x128xf32>
    %cst_175 = arith.constant 0.000000e+00 : f32
    %332 = vector.broadcast %cst_175 : f32 to vector<2x32xf32>
    %cst_176 = arith.constant 0.000000e+00 : f32
    %333 = vector.broadcast %cst_176 : f32 to vector<2x32xf32>
    %cst_177 = arith.constant dense<0.000000e+00> : vector<2x128xf32>
    %334 = tpu.matmul %332, %2, %cst_177 {dimension_numbers = #tpu.dot_dimension_numbers<[1], [0], [0], [1], [0, 0, 1, 1], [], []>} : vector<2x32xf32>, vector<32x128xf32>, vector<2x128xf32> -> vector<2x128xf32>
    %335 = arith.addf %38, %334 : vector<2x128xf32>
    %336 = arith.negf %335 : vector<2x128xf32>
    %337 = math.exp %336 : vector<2x128xf32>
    %cst_178 = arith.constant 1.000000e+00 : f32
    %338 = vector.broadcast %cst_178 : f32 to vector<2x128xf32>
    %339 = arith.addf %338, %337 : vector<2x128xf32>
    %340 = arith.divf %338, %339 : vector<2x128xf32>
    %341 = vector.extract_strided_slice %340 {offsets = [0, 0], sizes = [2, 32], strides = [1, 1]} : vector<2x128xf32> to vector<2x32xf32>
    %342 = vector.extract_strided_slice %340 {offsets = [0, 32], sizes = [2, 32], strides = [1, 1]} : vector<2x128xf32> to vector<2x32xf32>
    %343 = vector.extract_strided_slice %340 {offsets = [0, 64], sizes = [2, 32], strides = [1, 1]} : vector<2x128xf32> to vector<2x32xf32>
    %cst_179 = arith.constant 2.000000e+00 : f32
    %344 = vector.broadcast %cst_179 : f32 to vector<2x32xf32>
    %345 = arith.mulf %344, %343 : vector<2x32xf32>
    %cst_180 = arith.constant 1.000000e+00 : f32
    %346 = vector.broadcast %cst_180 : f32 to vector<2x32xf32>
    %347 = arith.subf %345, %346 : vector<2x32xf32>
    %348 = vector.extract_strided_slice %340 {offsets = [0, 96], sizes = [2, 32], strides = [1, 1]} : vector<2x128xf32> to vector<2x32xf32>
    %349 = arith.mulf %342, %333 : vector<2x32xf32>
    %350 = arith.mulf %341, %347 : vector<2x32xf32>
    %351 = arith.addf %349, %350 : vector<2x32xf32>
    %352 = math.tanh %351 : vector<2x32xf32>
    %353 = arith.mulf %348, %352 : vector<2x32xf32>
    %cst_181 = arith.constant dense<0.000000e+00> : vector<2x128xf32>
    %354 = tpu.matmul %353, %2, %cst_181 {dimension_numbers = #tpu.dot_dimension_numbers<[1], [0], [0], [1], [0, 0, 1, 1], [], []>} : vector<2x32xf32>, vector<32x128xf32>, vector<2x128xf32> -> vector<2x128xf32>
    %355 = arith.addf %44, %354 : vector<2x128xf32>
    %356 = arith.negf %355 : vector<2x128xf32>
    %357 = math.exp %356 : vector<2x128xf32>
    %cst_182 = arith.constant 1.000000e+00 : f32
    %358 = vector.broadcast %cst_182 : f32 to vector<2x128xf32>
    %359 = arith.addf %358, %357 : vector<2x128xf32>
    %360 = arith.divf %358, %359 : vector<2x128xf32>
    %361 = vector.extract_strided_slice %360 {offsets = [0, 0], sizes = [2, 32], strides = [1, 1]} : vector<2x128xf32> to vector<2x32xf32>
    %362 = vector.extract_strided_slice %360 {offsets = [0, 32], sizes = [2, 32], strides = [1, 1]} : vector<2x128xf32> to vector<2x32xf32>
    %363 = vector.extract_strided_slice %360 {offsets = [0, 64], sizes = [2, 32], strides = [1, 1]} : vector<2x128xf32> to vector<2x32xf32>
    %cst_183 = arith.constant 2.000000e+00 : f32
    %364 = vector.broadcast %cst_183 : f32 to vector<2x32xf32>
    %365 = arith.mulf %364, %363 : vector<2x32xf32>
    %cst_184 = arith.constant 1.000000e+00 : f32
    %366 = vector.broadcast %cst_184 : f32 to vector<2x32xf32>
    %367 = arith.subf %365, %366 : vector<2x32xf32>
    %368 = vector.extract_strided_slice %360 {offsets = [0, 96], sizes = [2, 32], strides = [1, 1]} : vector<2x128xf32> to vector<2x32xf32>
    %369 = arith.mulf %362, %351 : vector<2x32xf32>
    %370 = arith.mulf %361, %367 : vector<2x32xf32>
    %371 = arith.addf %369, %370 : vector<2x32xf32>
    %372 = math.tanh %371 : vector<2x32xf32>
    %373 = arith.mulf %368, %372 : vector<2x32xf32>
    %cst_185 = arith.constant dense<0.000000e+00> : vector<2x128xf32>
    %374 = tpu.matmul %373, %2, %cst_185 {dimension_numbers = #tpu.dot_dimension_numbers<[1], [0], [0], [1], [0, 0, 1, 1], [], []>} : vector<2x32xf32>, vector<32x128xf32>, vector<2x128xf32> -> vector<2x128xf32>
    %375 = arith.addf %79, %374 : vector<2x128xf32>
    %376 = arith.negf %375 : vector<2x128xf32>
    %377 = math.exp %376 : vector<2x128xf32>
    %cst_186 = arith.constant 1.000000e+00 : f32
    %378 = vector.broadcast %cst_186 : f32 to vector<2x128xf32>
    %379 = arith.addf %378, %377 : vector<2x128xf32>
    %380 = arith.divf %378, %379 : vector<2x128xf32>
    %381 = vector.extract_strided_slice %380 {offsets = [0, 0], sizes = [2, 32], strides = [1, 1]} : vector<2x128xf32> to vector<2x32xf32>
    %382 = vector.extract_strided_slice %380 {offsets = [0, 32], sizes = [2, 32], strides = [1, 1]} : vector<2x128xf32> to vector<2x32xf32>
    %383 = vector.extract_strided_slice %380 {offsets = [0, 64], sizes = [2, 32], strides = [1, 1]} : vector<2x128xf32> to vector<2x32xf32>
    %cst_187 = arith.constant 2.000000e+00 : f32
    %384 = vector.broadcast %cst_187 : f32 to vector<2x32xf32>
    %385 = arith.mulf %384, %383 : vector<2x32xf32>
    %cst_188 = arith.constant 1.000000e+00 : f32
    %386 = vector.broadcast %cst_188 : f32 to vector<2x32xf32>
    %387 = arith.subf %385, %386 : vector<2x32xf32>
    %388 = vector.extract_strided_slice %380 {offsets = [0, 96], sizes = [2, 32], strides = [1, 1]} : vector<2x128xf32> to vector<2x32xf32>
    %389 = arith.mulf %382, %371 : vector<2x32xf32>
    %390 = arith.mulf %381, %387 : vector<2x32xf32>
    %391 = arith.addf %389, %390 : vector<2x32xf32>
    %392 = math.tanh %391 : vector<2x32xf32>
    %393 = arith.mulf %388, %392 : vector<2x32xf32>
    %cst_189 = arith.constant dense<0.000000e+00> : vector<2x128xf32>
    %394 = tpu.matmul %393, %2, %cst_189 {dimension_numbers = #tpu.dot_dimension_numbers<[1], [0], [0], [1], [0, 0, 1, 1], [], []>} : vector<2x32xf32>, vector<32x128xf32>, vector<2x128xf32> -> vector<2x128xf32>
    %395 = arith.addf %85, %394 : vector<2x128xf32>
    %396 = arith.negf %395 : vector<2x128xf32>
    %397 = math.exp %396 : vector<2x128xf32>
    %cst_190 = arith.constant 1.000000e+00 : f32
    %398 = vector.broadcast %cst_190 : f32 to vector<2x128xf32>
    %399 = arith.addf %398, %397 : vector<2x128xf32>
    %400 = arith.divf %398, %399 : vector<2x128xf32>
    %401 = vector.extract_strided_slice %400 {offsets = [0, 0], sizes = [2, 32], strides = [1, 1]} : vector<2x128xf32> to vector<2x32xf32>
    %402 = vector.extract_strided_slice %400 {offsets = [0, 32], sizes = [2, 32], strides = [1, 1]} : vector<2x128xf32> to vector<2x32xf32>
    %403 = vector.extract_strided_slice %400 {offsets = [0, 64], sizes = [2, 32], strides = [1, 1]} : vector<2x128xf32> to vector<2x32xf32>
    %cst_191 = arith.constant 2.000000e+00 : f32
    %404 = vector.broadcast %cst_191 : f32 to vector<2x32xf32>
    %405 = arith.mulf %404, %403 : vector<2x32xf32>
    %cst_192 = arith.constant 1.000000e+00 : f32
    %406 = vector.broadcast %cst_192 : f32 to vector<2x32xf32>
    %407 = arith.subf %405, %406 : vector<2x32xf32>
    %408 = vector.extract_strided_slice %400 {offsets = [0, 96], sizes = [2, 32], strides = [1, 1]} : vector<2x128xf32> to vector<2x32xf32>
    %409 = arith.mulf %402, %391 : vector<2x32xf32>
    %410 = arith.mulf %401, %407 : vector<2x32xf32>
    %411 = arith.addf %409, %410 : vector<2x32xf32>
    %412 = math.tanh %411 : vector<2x32xf32>
    %413 = arith.mulf %408, %412 : vector<2x32xf32>
    %cst_193 = arith.constant dense<0.000000e+00> : vector<2x128xf32>
    %414 = tpu.matmul %413, %2, %cst_193 {dimension_numbers = #tpu.dot_dimension_numbers<[1], [0], [0], [1], [0, 0, 1, 1], [], []>} : vector<2x32xf32>, vector<32x128xf32>, vector<2x128xf32> -> vector<2x128xf32>
    %415 = arith.addf %120, %414 : vector<2x128xf32>
    %416 = arith.negf %415 : vector<2x128xf32>
    %417 = math.exp %416 : vector<2x128xf32>
    %cst_194 = arith.constant 1.000000e+00 : f32
    %418 = vector.broadcast %cst_194 : f32 to vector<2x128xf32>
    %419 = arith.addf %418, %417 : vector<2x128xf32>
    %420 = arith.divf %418, %419 : vector<2x128xf32>
    %421 = vector.extract_strided_slice %420 {offsets = [0, 0], sizes = [2, 32], strides = [1, 1]} : vector<2x128xf32> to vector<2x32xf32>
    %422 = vector.extract_strided_slice %420 {offsets = [0, 32], sizes = [2, 32], strides = [1, 1]} : vector<2x128xf32> to vector<2x32xf32>
    %423 = vector.extract_strided_slice %420 {offsets = [0, 64], sizes = [2, 32], strides = [1, 1]} : vector<2x128xf32> to vector<2x32xf32>
    %cst_195 = arith.constant 2.000000e+00 : f32
    %424 = vector.broadcast %cst_195 : f32 to vector<2x32xf32>
    %425 = arith.mulf %424, %423 : vector<2x32xf32>
    %cst_196 = arith.constant 1.000000e+00 : f32
    %426 = vector.broadcast %cst_196 : f32 to vector<2x32xf32>
    %427 = arith.subf %425, %426 : vector<2x32xf32>
    %428 = vector.extract_strided_slice %420 {offsets = [0, 96], sizes = [2, 32], strides = [1, 1]} : vector<2x128xf32> to vector<2x32xf32>
    %429 = arith.mulf %422, %411 : vector<2x32xf32>
    %430 = arith.mulf %421, %427 : vector<2x32xf32>
    %431 = arith.addf %429, %430 : vector<2x32xf32>
    %432 = math.tanh %431 : vector<2x32xf32>
    %433 = arith.mulf %428, %432 : vector<2x32xf32>
    %cst_197 = arith.constant dense<0.000000e+00> : vector<2x128xf32>
    %434 = tpu.matmul %433, %2, %cst_197 {dimension_numbers = #tpu.dot_dimension_numbers<[1], [0], [0], [1], [0, 0, 1, 1], [], []>} : vector<2x32xf32>, vector<32x128xf32>, vector<2x128xf32> -> vector<2x128xf32>
    %435 = arith.addf %126, %434 : vector<2x128xf32>
    %436 = arith.negf %435 : vector<2x128xf32>
    %437 = math.exp %436 : vector<2x128xf32>
    %cst_198 = arith.constant 1.000000e+00 : f32
    %438 = vector.broadcast %cst_198 : f32 to vector<2x128xf32>
    %439 = arith.addf %438, %437 : vector<2x128xf32>
    %440 = arith.divf %438, %439 : vector<2x128xf32>
    %441 = vector.extract_strided_slice %440 {offsets = [0, 0], sizes = [2, 32], strides = [1, 1]} : vector<2x128xf32> to vector<2x32xf32>
    %442 = vector.extract_strided_slice %440 {offsets = [0, 32], sizes = [2, 32], strides = [1, 1]} : vector<2x128xf32> to vector<2x32xf32>
    %443 = vector.extract_strided_slice %440 {offsets = [0, 64], sizes = [2, 32], strides = [1, 1]} : vector<2x128xf32> to vector<2x32xf32>
    %cst_199 = arith.constant 2.000000e+00 : f32
    %444 = vector.broadcast %cst_199 : f32 to vector<2x32xf32>
    %445 = arith.mulf %444, %443 : vector<2x32xf32>
    %cst_200 = arith.constant 1.000000e+00 : f32
    %446 = vector.broadcast %cst_200 : f32 to vector<2x32xf32>
    %447 = arith.subf %445, %446 : vector<2x32xf32>
    %448 = vector.extract_strided_slice %440 {offsets = [0, 96], sizes = [2, 32], strides = [1, 1]} : vector<2x128xf32> to vector<2x32xf32>
    %449 = arith.mulf %442, %431 : vector<2x32xf32>
    %450 = arith.mulf %441, %447 : vector<2x32xf32>
    %451 = arith.addf %449, %450 : vector<2x32xf32>
    %452 = math.tanh %451 : vector<2x32xf32>
    %453 = arith.mulf %448, %452 : vector<2x32xf32>
    %cst_201 = arith.constant dense<0.000000e+00> : vector<2x128xf32>
    %454 = tpu.matmul %453, %2, %cst_201 {dimension_numbers = #tpu.dot_dimension_numbers<[1], [0], [0], [1], [0, 0, 1, 1], [], []>} : vector<2x32xf32>, vector<32x128xf32>, vector<2x128xf32> -> vector<2x128xf32>
    %455 = arith.addf %161, %454 : vector<2x128xf32>
    %456 = arith.negf %455 : vector<2x128xf32>
    %457 = math.exp %456 : vector<2x128xf32>
    %cst_202 = arith.constant 1.000000e+00 : f32
    %458 = vector.broadcast %cst_202 : f32 to vector<2x128xf32>
    %459 = arith.addf %458, %457 : vector<2x128xf32>
    %460 = arith.divf %458, %459 : vector<2x128xf32>
    %461 = vector.extract_strided_slice %460 {offsets = [0, 0], sizes = [2, 32], strides = [1, 1]} : vector<2x128xf32> to vector<2x32xf32>
    %462 = vector.extract_strided_slice %460 {offsets = [0, 32], sizes = [2, 32], strides = [1, 1]} : vector<2x128xf32> to vector<2x32xf32>
    %463 = vector.extract_strided_slice %460 {offsets = [0, 64], sizes = [2, 32], strides = [1, 1]} : vector<2x128xf32> to vector<2x32xf32>
    %cst_203 = arith.constant 2.000000e+00 : f32
    %464 = vector.broadcast %cst_203 : f32 to vector<2x32xf32>
    %465 = arith.mulf %464, %463 : vector<2x32xf32>
    %cst_204 = arith.constant 1.000000e+00 : f32
    %466 = vector.broadcast %cst_204 : f32 to vector<2x32xf32>
    %467 = arith.subf %465, %466 : vector<2x32xf32>
    %468 = vector.extract_strided_slice %460 {offsets = [0, 96], sizes = [2, 32], strides = [1, 1]} : vector<2x128xf32> to vector<2x32xf32>
    %469 = arith.mulf %462, %451 : vector<2x32xf32>
    %470 = arith.mulf %461, %467 : vector<2x32xf32>
    %471 = arith.addf %469, %470 : vector<2x32xf32>
    %472 = math.tanh %471 : vector<2x32xf32>
    %473 = arith.mulf %468, %472 : vector<2x32xf32>
    %cst_205 = arith.constant dense<0.000000e+00> : vector<2x128xf32>
    %474 = tpu.matmul %473, %2, %cst_205 {dimension_numbers = #tpu.dot_dimension_numbers<[1], [0], [0], [1], [0, 0, 1, 1], [], []>} : vector<2x32xf32>, vector<32x128xf32>, vector<2x128xf32> -> vector<2x128xf32>
    %475 = arith.addf %167, %474 : vector<2x128xf32>
    %476 = arith.negf %475 : vector<2x128xf32>
    %477 = math.exp %476 : vector<2x128xf32>
    %cst_206 = arith.constant 1.000000e+00 : f32
    %478 = vector.broadcast %cst_206 : f32 to vector<2x128xf32>
    %479 = arith.addf %478, %477 : vector<2x128xf32>
    %480 = arith.divf %478, %479 : vector<2x128xf32>
    %481 = vector.extract_strided_slice %480 {offsets = [0, 0], sizes = [2, 32], strides = [1, 1]} : vector<2x128xf32> to vector<2x32xf32>
    %482 = vector.extract_strided_slice %480 {offsets = [0, 32], sizes = [2, 32], strides = [1, 1]} : vector<2x128xf32> to vector<2x32xf32>
    %483 = vector.extract_strided_slice %480 {offsets = [0, 64], sizes = [2, 32], strides = [1, 1]} : vector<2x128xf32> to vector<2x32xf32>
    %cst_207 = arith.constant 2.000000e+00 : f32
    %484 = vector.broadcast %cst_207 : f32 to vector<2x32xf32>
    %485 = arith.mulf %484, %483 : vector<2x32xf32>
    %cst_208 = arith.constant 1.000000e+00 : f32
    %486 = vector.broadcast %cst_208 : f32 to vector<2x32xf32>
    %487 = arith.subf %485, %486 : vector<2x32xf32>
    %488 = vector.extract_strided_slice %480 {offsets = [0, 96], sizes = [2, 32], strides = [1, 1]} : vector<2x128xf32> to vector<2x32xf32>
    %489 = arith.mulf %482, %471 : vector<2x32xf32>
    %490 = arith.mulf %481, %487 : vector<2x32xf32>
    %491 = arith.addf %489, %490 : vector<2x32xf32>
    %492 = math.tanh %491 : vector<2x32xf32>
    %493 = arith.mulf %488, %492 : vector<2x32xf32>
    %cst_209 = arith.constant dense<0.000000e+00> : vector<2x128xf32>
    %494 = tpu.matmul %493, %2, %cst_209 {dimension_numbers = #tpu.dot_dimension_numbers<[1], [0], [0], [1], [0, 0, 1, 1], [], []>} : vector<2x32xf32>, vector<32x128xf32>, vector<2x128xf32> -> vector<2x128xf32>
    %495 = arith.addf %202, %494 : vector<2x128xf32>
    %496 = arith.negf %495 : vector<2x128xf32>
    %497 = math.exp %496 : vector<2x128xf32>
    %cst_210 = arith.constant 1.000000e+00 : f32
    %498 = vector.broadcast %cst_210 : f32 to vector<2x128xf32>
    %499 = arith.addf %498, %497 : vector<2x128xf32>
    %500 = arith.divf %498, %499 : vector<2x128xf32>
    %501 = vector.extract_strided_slice %500 {offsets = [0, 0], sizes = [2, 32], strides = [1, 1]} : vector<2x128xf32> to vector<2x32xf32>
    %502 = vector.extract_strided_slice %500 {offsets = [0, 32], sizes = [2, 32], strides = [1, 1]} : vector<2x128xf32> to vector<2x32xf32>
    %503 = vector.extract_strided_slice %500 {offsets = [0, 64], sizes = [2, 32], strides = [1, 1]} : vector<2x128xf32> to vector<2x32xf32>
    %cst_211 = arith.constant 2.000000e+00 : f32
    %504 = vector.broadcast %cst_211 : f32 to vector<2x32xf32>
    %505 = arith.mulf %504, %503 : vector<2x32xf32>
    %cst_212 = arith.constant 1.000000e+00 : f32
    %506 = vector.broadcast %cst_212 : f32 to vector<2x32xf32>
    %507 = arith.subf %505, %506 : vector<2x32xf32>
    %508 = vector.extract_strided_slice %500 {offsets = [0, 96], sizes = [2, 32], strides = [1, 1]} : vector<2x128xf32> to vector<2x32xf32>
    %509 = arith.mulf %502, %491 : vector<2x32xf32>
    %510 = arith.mulf %501, %507 : vector<2x32xf32>
    %511 = arith.addf %509, %510 : vector<2x32xf32>
    %512 = math.tanh %511 : vector<2x32xf32>
    %513 = arith.mulf %508, %512 : vector<2x32xf32>
    %cst_213 = arith.constant dense<0.000000e+00> : vector<2x128xf32>
    %514 = tpu.matmul %513, %2, %cst_213 {dimension_numbers = #tpu.dot_dimension_numbers<[1], [0], [0], [1], [0, 0, 1, 1], [], []>} : vector<2x32xf32>, vector<32x128xf32>, vector<2x128xf32> -> vector<2x128xf32>
    %515 = arith.addf %208, %514 : vector<2x128xf32>
    %516 = arith.negf %515 : vector<2x128xf32>
    %517 = math.exp %516 : vector<2x128xf32>
    %cst_214 = arith.constant 1.000000e+00 : f32
    %518 = vector.broadcast %cst_214 : f32 to vector<2x128xf32>
    %519 = arith.addf %518, %517 : vector<2x128xf32>
    %520 = arith.divf %518, %519 : vector<2x128xf32>
    %521 = vector.extract_strided_slice %520 {offsets = [0, 0], sizes = [2, 32], strides = [1, 1]} : vector<2x128xf32> to vector<2x32xf32>
    %522 = vector.extract_strided_slice %520 {offsets = [0, 32], sizes = [2, 32], strides = [1, 1]} : vector<2x128xf32> to vector<2x32xf32>
    %523 = vector.extract_strided_slice %520 {offsets = [0, 64], sizes = [2, 32], strides = [1, 1]} : vector<2x128xf32> to vector<2x32xf32>
    %cst_215 = arith.constant 2.000000e+00 : f32
    %524 = vector.broadcast %cst_215 : f32 to vector<2x32xf32>
    %525 = arith.mulf %524, %523 : vector<2x32xf32>
    %cst_216 = arith.constant 1.000000e+00 : f32
    %526 = vector.broadcast %cst_216 : f32 to vector<2x32xf32>
    %527 = arith.subf %525, %526 : vector<2x32xf32>
    %528 = vector.extract_strided_slice %520 {offsets = [0, 96], sizes = [2, 32], strides = [1, 1]} : vector<2x128xf32> to vector<2x32xf32>
    %529 = arith.mulf %522, %511 : vector<2x32xf32>
    %530 = arith.mulf %521, %527 : vector<2x32xf32>
    %531 = arith.addf %529, %530 : vector<2x32xf32>
    %532 = math.tanh %531 : vector<2x32xf32>
    %533 = arith.mulf %528, %532 : vector<2x32xf32>
    %cst_217 = arith.constant dense<0.000000e+00> : vector<2x128xf32>
    %534 = tpu.matmul %533, %2, %cst_217 {dimension_numbers = #tpu.dot_dimension_numbers<[1], [0], [0], [1], [0, 0, 1, 1], [], []>} : vector<2x32xf32>, vector<32x128xf32>, vector<2x128xf32> -> vector<2x128xf32>
    %535 = arith.addf %243, %534 : vector<2x128xf32>
    %536 = arith.negf %535 : vector<2x128xf32>
    %537 = math.exp %536 : vector<2x128xf32>
    %cst_218 = arith.constant 1.000000e+00 : f32
    %538 = vector.broadcast %cst_218 : f32 to vector<2x128xf32>
    %539 = arith.addf %538, %537 : vector<2x128xf32>
    %540 = arith.divf %538, %539 : vector<2x128xf32>
    %541 = vector.extract_strided_slice %540 {offsets = [0, 0], sizes = [2, 32], strides = [1, 1]} : vector<2x128xf32> to vector<2x32xf32>
    %542 = vector.extract_strided_slice %540 {offsets = [0, 32], sizes = [2, 32], strides = [1, 1]} : vector<2x128xf32> to vector<2x32xf32>
    %543 = vector.extract_strided_slice %540 {offsets = [0, 64], sizes = [2, 32], strides = [1, 1]} : vector<2x128xf32> to vector<2x32xf32>
    %cst_219 = arith.constant 2.000000e+00 : f32
    %544 = vector.broadcast %cst_219 : f32 to vector<2x32xf32>
    %545 = arith.mulf %544, %543 : vector<2x32xf32>
    %cst_220 = arith.constant 1.000000e+00 : f32
    %546 = vector.broadcast %cst_220 : f32 to vector<2x32xf32>
    %547 = arith.subf %545, %546 : vector<2x32xf32>
    %548 = vector.extract_strided_slice %540 {offsets = [0, 96], sizes = [2, 32], strides = [1, 1]} : vector<2x128xf32> to vector<2x32xf32>
    %549 = arith.mulf %542, %531 : vector<2x32xf32>
    %550 = arith.mulf %541, %547 : vector<2x32xf32>
    %551 = arith.addf %549, %550 : vector<2x32xf32>
    %552 = math.tanh %551 : vector<2x32xf32>
    %553 = arith.mulf %548, %552 : vector<2x32xf32>
    %cst_221 = arith.constant dense<0.000000e+00> : vector<2x128xf32>
    %554 = tpu.matmul %553, %2, %cst_221 {dimension_numbers = #tpu.dot_dimension_numbers<[1], [0], [0], [1], [0, 0, 1, 1], [], []>} : vector<2x32xf32>, vector<32x128xf32>, vector<2x128xf32> -> vector<2x128xf32>
    %555 = arith.addf %249, %554 : vector<2x128xf32>
    %556 = arith.negf %555 : vector<2x128xf32>
    %557 = math.exp %556 : vector<2x128xf32>
    %cst_222 = arith.constant 1.000000e+00 : f32
    %558 = vector.broadcast %cst_222 : f32 to vector<2x128xf32>
    %559 = arith.addf %558, %557 : vector<2x128xf32>
    %560 = arith.divf %558, %559 : vector<2x128xf32>
    %561 = vector.extract_strided_slice %560 {offsets = [0, 0], sizes = [2, 32], strides = [1, 1]} : vector<2x128xf32> to vector<2x32xf32>
    %562 = vector.extract_strided_slice %560 {offsets = [0, 32], sizes = [2, 32], strides = [1, 1]} : vector<2x128xf32> to vector<2x32xf32>
    %563 = vector.extract_strided_slice %560 {offsets = [0, 64], sizes = [2, 32], strides = [1, 1]} : vector<2x128xf32> to vector<2x32xf32>
    %cst_223 = arith.constant 2.000000e+00 : f32
    %564 = vector.broadcast %cst_223 : f32 to vector<2x32xf32>
    %565 = arith.mulf %564, %563 : vector<2x32xf32>
    %cst_224 = arith.constant 1.000000e+00 : f32
    %566 = vector.broadcast %cst_224 : f32 to vector<2x32xf32>
    %567 = arith.subf %565, %566 : vector<2x32xf32>
    %568 = vector.extract_strided_slice %560 {offsets = [0, 96], sizes = [2, 32], strides = [1, 1]} : vector<2x128xf32> to vector<2x32xf32>
    %569 = arith.mulf %562, %551 : vector<2x32xf32>
    %570 = arith.mulf %561, %567 : vector<2x32xf32>
    %571 = arith.addf %569, %570 : vector<2x32xf32>
    %572 = math.tanh %571 : vector<2x32xf32>
    %573 = arith.mulf %568, %572 : vector<2x32xf32>
    %cst_225 = arith.constant dense<0.000000e+00> : vector<2x128xf32>
    %574 = tpu.matmul %573, %2, %cst_225 {dimension_numbers = #tpu.dot_dimension_numbers<[1], [0], [0], [1], [0, 0, 1, 1], [], []>} : vector<2x32xf32>, vector<32x128xf32>, vector<2x128xf32> -> vector<2x128xf32>
    %575 = arith.addf %284, %574 : vector<2x128xf32>
    %576 = arith.negf %575 : vector<2x128xf32>
    %577 = math.exp %576 : vector<2x128xf32>
    %cst_226 = arith.constant 1.000000e+00 : f32
    %578 = vector.broadcast %cst_226 : f32 to vector<2x128xf32>
    %579 = arith.addf %578, %577 : vector<2x128xf32>
    %580 = arith.divf %578, %579 : vector<2x128xf32>
    %581 = vector.extract_strided_slice %580 {offsets = [0, 0], sizes = [2, 32], strides = [1, 1]} : vector<2x128xf32> to vector<2x32xf32>
    %582 = vector.extract_strided_slice %580 {offsets = [0, 32], sizes = [2, 32], strides = [1, 1]} : vector<2x128xf32> to vector<2x32xf32>
    %583 = vector.extract_strided_slice %580 {offsets = [0, 64], sizes = [2, 32], strides = [1, 1]} : vector<2x128xf32> to vector<2x32xf32>
    %cst_227 = arith.constant 2.000000e+00 : f32
    %584 = vector.broadcast %cst_227 : f32 to vector<2x32xf32>
    %585 = arith.mulf %584, %583 : vector<2x32xf32>
    %cst_228 = arith.constant 1.000000e+00 : f32
    %586 = vector.broadcast %cst_228 : f32 to vector<2x32xf32>
    %587 = arith.subf %585, %586 : vector<2x32xf32>
    %588 = vector.extract_strided_slice %580 {offsets = [0, 96], sizes = [2, 32], strides = [1, 1]} : vector<2x128xf32> to vector<2x32xf32>
    %589 = arith.mulf %582, %571 : vector<2x32xf32>
    %590 = arith.mulf %581, %587 : vector<2x32xf32>
    %591 = arith.addf %589, %590 : vector<2x32xf32>
    %592 = math.tanh %591 : vector<2x32xf32>
    %593 = arith.mulf %588, %592 : vector<2x32xf32>
    %cst_229 = arith.constant dense<0.000000e+00> : vector<2x128xf32>
    %594 = tpu.matmul %593, %2, %cst_229 {dimension_numbers = #tpu.dot_dimension_numbers<[1], [0], [0], [1], [0, 0, 1, 1], [], []>} : vector<2x32xf32>, vector<32x128xf32>, vector<2x128xf32> -> vector<2x128xf32>
    %595 = arith.addf %290, %594 : vector<2x128xf32>
    %596 = arith.negf %595 : vector<2x128xf32>
    %597 = math.exp %596 : vector<2x128xf32>
    %cst_230 = arith.constant 1.000000e+00 : f32
    %598 = vector.broadcast %cst_230 : f32 to vector<2x128xf32>
    %599 = arith.addf %598, %597 : vector<2x128xf32>
    %600 = arith.divf %598, %599 : vector<2x128xf32>
    %601 = vector.extract_strided_slice %600 {offsets = [0, 0], sizes = [2, 32], strides = [1, 1]} : vector<2x128xf32> to vector<2x32xf32>
    %602 = vector.extract_strided_slice %600 {offsets = [0, 32], sizes = [2, 32], strides = [1, 1]} : vector<2x128xf32> to vector<2x32xf32>
    %603 = vector.extract_strided_slice %600 {offsets = [0, 64], sizes = [2, 32], strides = [1, 1]} : vector<2x128xf32> to vector<2x32xf32>
    %cst_231 = arith.constant 2.000000e+00 : f32
    %604 = vector.broadcast %cst_231 : f32 to vector<2x32xf32>
    %605 = arith.mulf %604, %603 : vector<2x32xf32>
    %cst_232 = arith.constant 1.000000e+00 : f32
    %606 = vector.broadcast %cst_232 : f32 to vector<2x32xf32>
    %607 = arith.subf %605, %606 : vector<2x32xf32>
    %608 = vector.extract_strided_slice %600 {offsets = [0, 96], sizes = [2, 32], strides = [1, 1]} : vector<2x128xf32> to vector<2x32xf32>
    %609 = arith.mulf %602, %591 : vector<2x32xf32>
    %610 = arith.mulf %601, %607 : vector<2x32xf32>
    %611 = arith.addf %609, %610 : vector<2x32xf32>
    %612 = math.tanh %611 : vector<2x32xf32>
    %613 = arith.mulf %608, %612 : vector<2x32xf32>
    %cst_233 = arith.constant dense<0.000000e+00> : vector<2x128xf32>
    %614 = tpu.matmul %613, %2, %cst_233 {dimension_numbers = #tpu.dot_dimension_numbers<[1], [0], [0], [1], [0, 0, 1, 1], [], []>} : vector<2x32xf32>, vector<32x128xf32>, vector<2x128xf32> -> vector<2x128xf32>
    %615 = arith.addf %325, %614 : vector<2x128xf32>
    %616 = arith.negf %615 : vector<2x128xf32>
    %617 = math.exp %616 : vector<2x128xf32>
    %cst_234 = arith.constant 1.000000e+00 : f32
    %618 = vector.broadcast %cst_234 : f32 to vector<2x128xf32>
    %619 = arith.addf %618, %617 : vector<2x128xf32>
    %620 = arith.divf %618, %619 : vector<2x128xf32>
    %621 = vector.extract_strided_slice %620 {offsets = [0, 0], sizes = [2, 32], strides = [1, 1]} : vector<2x128xf32> to vector<2x32xf32>
    %622 = vector.extract_strided_slice %620 {offsets = [0, 32], sizes = [2, 32], strides = [1, 1]} : vector<2x128xf32> to vector<2x32xf32>
    %623 = vector.extract_strided_slice %620 {offsets = [0, 64], sizes = [2, 32], strides = [1, 1]} : vector<2x128xf32> to vector<2x32xf32>
    %cst_235 = arith.constant 2.000000e+00 : f32
    %624 = vector.broadcast %cst_235 : f32 to vector<2x32xf32>
    %625 = arith.mulf %624, %623 : vector<2x32xf32>
    %cst_236 = arith.constant 1.000000e+00 : f32
    %626 = vector.broadcast %cst_236 : f32 to vector<2x32xf32>
    %627 = arith.subf %625, %626 : vector<2x32xf32>
    %628 = vector.extract_strided_slice %620 {offsets = [0, 96], sizes = [2, 32], strides = [1, 1]} : vector<2x128xf32> to vector<2x32xf32>
    %629 = arith.mulf %622, %611 : vector<2x32xf32>
    %630 = arith.mulf %621, %627 : vector<2x32xf32>
    %631 = arith.addf %629, %630 : vector<2x32xf32>
    %632 = math.tanh %631 : vector<2x32xf32>
    %633 = arith.mulf %628, %632 : vector<2x32xf32>
    %cst_237 = arith.constant dense<0.000000e+00> : vector<2x128xf32>
    %634 = tpu.matmul %633, %2, %cst_237 {dimension_numbers = #tpu.dot_dimension_numbers<[1], [0], [0], [1], [0, 0, 1, 1], [], []>} : vector<2x32xf32>, vector<32x128xf32>, vector<2x128xf32> -> vector<2x128xf32>
    %635 = arith.addf %331, %634 : vector<2x128xf32>
    %636 = arith.negf %635 : vector<2x128xf32>
    %637 = math.exp %636 : vector<2x128xf32>
    %cst_238 = arith.constant 1.000000e+00 : f32
    %638 = vector.broadcast %cst_238 : f32 to vector<2x128xf32>
    %639 = arith.addf %638, %637 : vector<2x128xf32>
    %640 = arith.divf %638, %639 : vector<2x128xf32>
    %641 = vector.extract_strided_slice %640 {offsets = [0, 0], sizes = [2, 32], strides = [1, 1]} : vector<2x128xf32> to vector<2x32xf32>
    %642 = vector.extract_strided_slice %640 {offsets = [0, 32], sizes = [2, 32], strides = [1, 1]} : vector<2x128xf32> to vector<2x32xf32>
    %643 = vector.extract_strided_slice %640 {offsets = [0, 64], sizes = [2, 32], strides = [1, 1]} : vector<2x128xf32> to vector<2x32xf32>
    %cst_239 = arith.constant 2.000000e+00 : f32
    %644 = vector.broadcast %cst_239 : f32 to vector<2x32xf32>
    %645 = arith.mulf %644, %643 : vector<2x32xf32>
    %cst_240 = arith.constant 1.000000e+00 : f32
    %646 = vector.broadcast %cst_240 : f32 to vector<2x32xf32>
    %647 = arith.subf %645, %646 : vector<2x32xf32>
    %648 = vector.extract_strided_slice %640 {offsets = [0, 96], sizes = [2, 32], strides = [1, 1]} : vector<2x128xf32> to vector<2x32xf32>
    %649 = arith.mulf %642, %631 : vector<2x32xf32>
    %650 = arith.mulf %641, %647 : vector<2x32xf32>
    %651 = arith.addf %649, %650 : vector<2x32xf32>
    %652 = math.tanh %651 : vector<2x32xf32>
    %653 = arith.mulf %648, %652 : vector<2x32xf32>
    %c0_241 = arith.constant 0 : index
    %c0_242 = arith.constant 0 : index
    %654 = vector.load %arg6[%c0_241, %c0_242] : memref<1x32xf32, #tpu.memory_space<vmem>>, vector<1x32xf32>
    %655 = vector.broadcast %654 : vector<1x32xf32> to vector<2x32xf32>
    %656 = arith.mulf %653, %655 : vector<2x32xf32>
    %cst_243 = arith.constant dense<0.000000e+00> : vector<2xf32>
    %657 = vector.multi_reduction <add>, %656, %cst_243 [1] : vector<2x32xf32> to vector<2xf32>
    %658 = vector.shape_cast %657 : vector<2xf32> to vector<2x1xf32>
    %c0_244 = arith.constant 0 : index
    %c0_245 = arith.constant 0 : index
    %659 = memref.load %arg7[%c0_244, %c0_245] : memref<1x1xf32, #tpu.memory_space<smem>>
    %660 = vector.broadcast %659 : f32 to vector<2x1xf32>
    %661 = arith.addf %658, %660 : vector<2x1xf32>
    %c0_246 = arith.constant 0 : index
    %c0_247 = arith.constant 0 : index
    %662 = vector.load %arg8[%c0_246, %c0_247] : memref<2x1xf32, #tpu.memory_space<vmem>>, vector<2x1xf32>
    tpu.vector_store %arg8[%c0_246, %c0_247], %661 {strides = array<i32>} : memref<2x1xf32, #tpu.memory_space<vmem>>, vector<2x1xf32>,
    return
  }
}

</mosaic_0001>

<bundles_post_ra>
// kernel: st_model_forward.1
= control target key start
LH: loop header
LB: loop body
LE: loop exit
PB: predicated region body
PF: predicated region fallthrough
CT: control target
= control target key end

     0   :  { %15 = vsyncpa [#allocation5], 0  ;;  %s4329_s0 = inlined_call_operand.vmem [shape: f32[2,8,5], index: 0, kind: input, shape index: {}]   ;;  %s4330_s1 = inlined_call_operand.vmem [shape: f32[1,4], index: 1, kind: input, shape index: {}]   ;;  %s4331_s2 = inlined_call_operand.<no memory space> [shape: f32[1,1], index: 2, kind: input, shape index: {}]   ;;  %s4332_s3 = inlined_call_operand.vmem [shape: f32[1,128], index: 3, kind: input, shape index: {}]   ;;  %s4333_s4 = inlined_call_operand.vmem [shape: f32[32,128], index: 4, kind: input, shape index: {}]   ;;  %s4334_s5 = inlined_call_operand.vmem [shape: f32[1,128], index: 5, kind: input, shape index: {}]   ;;  %s4335_s6 = inlined_call_operand.vmem [shape: f32[1,32], index: 6, kind: input, shape index: {}]   ;;  %s4336_s7 = inlined_call_operand.<no memory space> [shape: f32[1,1], index: 7, kind: input, shape index: {}]   ;;  %s4337_s8 = inlined_call_operand.vmem [shape: f32[2,1], index: 8, kind: output, shape index: {}]  }
   0x1   :  { %s24_s29 = sshll.u32 %s4330_s1, 4  ;;  %s25_s29 = int_to_ptr.vmem [resolvable:$true] %s24_s29 }
   0x2   :  { %s3409_s30 = scalar_lea.vmem %s25_s29, 16  ;;  %p3414_p1 = scmp.lt.s32.totalorder %s25_s29, %s25_s29 }
   0x3   :  { %p3410_p0 = scmp.ne.s32.totalorder %s25_s29, %s3409_s30  ;;  %p3415_p2 = scmp.lt.s32.totalorder %s3409_s30, %s3409_s30 }
   0x5   :  { %p3416_p3 = por %p3415_p2, %p3414_p1 }
   0x7   :  { %p3417_p4 = pnand %p3416_p3, %p3410_p0 }
   0x9   :  { %3420 = shalt.err (!%p3417_p4)
}
   0xa   :  { %s3423_s9 = smov [#allocation4]  }
   0xb   :  { %27 = dma.vmem_to_smem %s25_s29, 16, %s3423_s9, [#allocation5]  }
   0xc   :  { %3421 = dma.done.wait [#allocation5], 16  }
   0xd   :  { %3422 = vsyncadd [#allocation5], 4294967280 }
   0xe   :  { %43 = sfence }
   0xf   :  { %s2822_s10 = sld [smem:[#allocation4 + $0x2]]  ;;  %v3424_v0 = vmov 0.0   ;;  %v3486_v1 = vld [vmem:[%s4333_s4 + $0x18] sm:$0xff]  ;;  %v3495_v2 = vld [vmem:[%s4333_s4 + $0x10] sm:$0xff]  ;;  %v3502_v3 = vld [vmem:[%s4333_s4 + $0x8] sm:$0xff]  ;;  %vm3425_vm0 = vmmov 0   ;;  %v3571_v29 = vstv %s4331_s2 }
  0x10   :  { %s2821_s11 = sld [smem:[#allocation4 + $0x1]]  ;;  %2986 = vmatprep.subr.mxu0 %v3424_v0  ;;  %2997 = vmatprep.subr.mxu1 %v3424_v0  ;;  %v52_v4 = vld [vmem:[%s4329_s0 + $0x8] sm:$0x1]  ;;  %v3515_v5 = vld [vmem:[%s4333_s4] sm:$0xff]  ;;  %v3426_v11 = vmov 0   ;;  %s3427_s24 = smov 126  }
  0x11   :  { %s3489_s13 = sld [smem:[#allocation4 + $0x3]]  ;;  %2987 = vmatpush3.msra.mxu0 %v3486_v1  ;;  %2998 = vmatpush3.msra.mxu1 %v3486_v1  ;;  %v51_v7 = vld [vmem:[%s4329_s0] sm:$0x1]  ;;  %s3428_s25 = smov 127   ;;  %vm781_vm1 = vcmask 1041409   ;;  %vm648_vm2 = vcmask 261120  }
  0x12   :  { %2988 = vmatprep.subr.mxu0 %v3424_v0  ;;  %2999 = vmatprep.subr.mxu1 %v3424_v0  ;;  %s3429_s26 = smov 125   ;;  %s53_s27 = sld [smem:[#allocation4]]  ;;  %v3583_v39 = vld [vmem:[%s4332_s3] ss:$0 sm:$0xff]  ;;  %vm2807_vm3 = vcmask 254976   ;;  %vm2814_vm4 = vcmask 1024  }
  0x13   :  { %2989 = vmatpush3.msra.mxu0 %v3495_v2  ;;  %2994 = vmatprep.mubr.msk.f32.mxu0 %vm3425_vm0, %v3424_v0  ;;  %v3588_v41 = vld [vmem:[%s4334_s5] ss:$0 sm:$0xff]  ;;  %s3431_s12 = smov 32  }
  0x14   :  { %2990 = vmatprep.subr.mxu0 %v3424_v0  ;;  %3000 = vmatpush3.msra.mxu1 %v3495_v2 }
  0x15   :  { %v3518_v6 = vstv %s2822_s10  ;;  %2991 = vmatpush3.msra.mxu0 %v3502_v3  ;;  %3001 = vmatprep.subr.mxu1 %v3424_v0 }
  0x16   :  { %v76_v8 = vmul.f32 %v3518_v6, %v52_v4  ;;  %v3526_v9 = vstv %s2821_s11  ;;  %2992 = vmatprep.subr.mxu0 %v3424_v0  ;;  %3002 = vmatpush3.msra.mxu1 %v3502_v3  ;;  %v75_v12 = vmul.f32 %v3518_v6, %v51_v7  ;;  %s3430_s11 = smov 64  }
  0x17   :  { %v62_v10 = vmul.f32 %v3526_v9, %v52_v4  ;;  %2993 = vmatpush3.msra.mxu0 %v3515_v5  ;;  %3174 = vset.pattern.permute.xlu1 %v3426_v11  ;;  %v61_v13 = vmul.f32 %v3526_v9, %v51_v7  ;;  %v3539_v14 = vstv %s3489_s13 }
  0x18   :  { %81 = vrot.lane.b32.xlu1 %v76_v8, %s3427_s24  ;;  %2995 = vmatmul.mubr.f32.vlgmr.msra.gmra.mxu0 %v3424_v0  ;;  %v89_v15 = vmul.f32 %v3539_v14, %v51_v7  ;;  %v90_v16 = vmul.f32 %v3539_v14, %v52_v4  ;;  %v3564_v17 = vstv %s53_s27  ;;  %v3432_v8 = vmov 1  }
  0x19   :  { %67 = vrot.lane.b32.xlu0 %v62_v10, %s3428_s25  ;;  %3003 = vmatprep.subr.mxu1 %v3424_v0  ;;  %v56_v19 = vmul.f32 %v3564_v17, %v52_v4  ;;  %v55_v21 = vmul.f32 %v3564_v17, %v51_v7 }
  0x1a   :  { %3173 = vset.pattern.permute.xlu0 %v3426_v11  ;;  %3004 = vmatpush3.msra.mxu1 %v3515_v5 }
  0x1b   :  { %3005 = vmatprep.mubr.msk.f32.mxu1 %vm3425_vm0, %v3424_v0  ;;  %3008 = vmatprep.subr.mxu0 %v3424_v0 }
  0x1c   :  { %79 = vrot.lane.b32.xlu1 %v75_v12, %s3427_s24  ;;  %3009 = vmatpush3.msra.mxu0 %v3486_v1 }
  0x1d   :  { %65 = vrot.lane.b32.xlu0 %v61_v13, %s3428_s25  ;;  %3010 = vmatprep.subr.mxu0 %v3424_v0 }
  0x1e   :  { %3011 = vmatpush3.msra.mxu0 %v3495_v2  ;;  %3016 = vmatprep.mubr.msk.f32.mxu0 %vm3425_vm0, %v3424_v0 }
  0x1f   :  { %3012 = vmatprep.subr.mxu0 %v3424_v0  ;;  %3019 = vmatprep.subr.mxu1 %v3424_v0 }
  0x20   :  { %93 = vrot.lane.b32.xlu1 %v89_v15, %s3429_s26  ;;  %3013 = vmatpush3.msra.mxu0 %v3502_v3 }
  0x21   :  { %95 = vrot.lane.b32.xlu0 %v90_v16, %s3429_s26  ;;  %3014 = vmatprep.subr.mxu0 %v3424_v0 }
  0x22   :  { %3015 = vmatpush3.msra.mxu0 %v3515_v5 }
  0x23   :  { %3030 = vmatprep.subr.mxu0 %v3424_v0 }
  0x8a   :  { %v82_v18 = vpop.permute.xlu1 %81 }
  0x8b   :  { %v68_v20 = vpop.permute.xlu0 %67 }
  0x8c   :  { %v72_v22 = vadd.f32 %v68_v20, %v56_v19 }
  0x8e   :  { %v80_v23 = vpop.permute.xlu1 %79  ;;  %v86_v28 = vadd.f32 %v82_v18, %v72_v22 }
  0x8f   :  { %v66_v24 = vpop.permute.xlu0 %65 }
  0x90   :  { %v71_v25 = vadd.f32 %v66_v24, %v55_v21 }
  0x92   :  { %v94_v26 = vpop.permute.xlu1 %93  ;;  %v85_v27 = vadd.f32 %v80_v23, %v71_v25 }
  0x93   :  { %v96_v30 = vpop.permute.xlu0 %95 }
  0x94   :  { %v99_v31 = vadd.f32 %v94_v26, %v85_v27  ;;  %v100_v32 = vadd.f32 %v96_v30, %v86_v28 }
  0x96   :  { %v3574_v33 = vadd.f32 %v3571_v29, %v99_v31  ;;  %v103_v34 = vadd.f32 %v3571_v29, %v100_v32 }
  0x98   :  { %v105_v35 = vmax.f32 %v103_v34, 0.0  ;;  %v104_v36 = vmax.f32 %v3574_v33, 0.0 }
  0x9a   :  { %113 = vperm.xlu0 %3173, %v105_v35   ;;  %108 = vperm.xlu1 %3174, %v104_v36  }
  0x9e   :  { %3175 = vset.pattern.permute.xlu0 %v3432_v8  ;;  %3176 = vset.pattern.permute.xlu1 %v3432_v8 }
  0xd8   :  { %v718_v37 = vpop.f32.mrf.mxu0 }
  0xd9   :  { %v723_v45 = vrot.slane %v718_v37, 1 }
  0xda   :  { %v2996_v38 = vpop.f32.mrf.mxu0 }
 0x115   :  { %v114_v40 = vpop.permute.xlu0 %113  ;;  %v109_v42 = vpop.permute.xlu1 %108 }
 0x116   :  { %v123_v43 = vmul.f32 %v3583_v39, %v114_v40  ;;  %v122_v44 = vmul.f32 %v3583_v39, %v109_v42 }
 0x118   :  { %v131_v46 = vadd.f32 %v3588_v41, %v123_v43  ;;  %v130_v47 = vadd.f32 %v3588_v41, %v122_v44 }
 0x11a   :  { %v726_v48 = vadd.f32 %v718_v37, %v130_v47  ;;  %v727_v49 = vadd.f32 %v723_v45, %v131_v46 }
 0x11c   :  { %v2826_v50 = vmul.f32 -1.442695, %v726_v48  ;;  %v2827_v51 = vmul.f32 -1.442695, %v727_v49 }
 0x11e   :  { %3205 = vpow2.f32 %v2826_v50 }
 0x11f   :  { %3207 = vpow2.f32 %v2827_v51 }
 0x12b   :  { %v3206_v52 = vpop.eup %3205 }
 0x12c   :  { %v3208_v53 = vpop.eup %3207  ;;  %v734_v54 = vadd.f32 1.0, %v3206_v52 }
 0x12d   :  { %v735_v55 = vadd.f32 1.0, %v3208_v53 }
 0x12e   :  { %3209 = vrcp.f32 %v734_v54 }
 0x12f   :  { %3211 = vrcp.f32 %v735_v55 }
 0x13b   :  { %v3210_v56 = vpop.eup %3209 }
 0x13c   :  { %v3212_v57 = vpop.eup %3211  ;;  %v740_v58 = vmul.f32 2.0, %v3210_v56  ;;  %v744_v10 = vmul.f32 0.0, %v3210_v56 }
 0x13d   :  { %v741_v59 = vmul.f32 2.0, %v3212_v57  ;;  %v745_v12 = vmul.f32 0.0, %v3212_v57 }
 0x13e   :  { %v2828_v60 = vadd.f32 -1.0, %v740_v58 }
 0x13f   :  { %v2829_v61 = vadd.f32 -1.0, %v741_v59 }
 0x140   :  { %748 = vrot.lane.b32.xlu0 %v2828_v60, %s3430_s11 }
 0x141   :  { %750 = vrot.lane.b32.xlu1 %v2829_v61, %s3430_s11 }
 0x1b2   :  { %v749_v62 = vpop.permute.xlu0 %748 }
 0x1b3   :  { %v751_v63 = vpop.permute.xlu1 %750  ;;  %v754_v4 = vmul.f32 %v3210_v56, %v749_v62 }
 0x1b4   :  { %v755_v7 = vmul.f32 %v3212_v57, %v751_v63 }
 0x1b5   :  { %758 = vrot.lane.b32.xlu0 %v754_v4, %s3431_s12  ;;  %v145_v4 = vld [vmem:[%s4329_s0 + $0x9] sm:$0x1] }
 0x1b6   :  { %760 = vrot.lane.b32.xlu1 %v755_v7, %s3431_s12 }
 0x227   :  { %v759_v13 = vpop.permute.xlu0 %758 }
 0x228   :  { %v761_v15 = vpop.permute.xlu1 %760  ;;  %v3600_v16 = vadd.f32 %v759_v13, %v744_v10  ;;  %v151_v10 = vmul.f32 %v145_v4, %v3526_v9  ;;  %v163_v13 = vmul.f32 %v145_v4, %v3518_v6 }
 0x229   :  { %v3602_v18 = vadd.f32 %v761_v15, %v745_v12  ;;  %v175_v15 = vmul.f32 %v145_v4, %v3539_v14 }
 0x22a   :  { %3213 = vtanh.f32 %v3600_v16 }
 0x22b   :  { %3215 = vtanh.f32 %v3602_v18 }
 0x237   :  { %v3214_v19 = vpop.eup %3213 }
 0x238   :  { %v3216_v20 = vpop.eup %3215  ;;  %770 = vrot.lane.b32.xlu0 %v3214_v19, %s3430_s11 }
 0x239   :  { %772 = vrot.lane.b32.xlu1 %v3216_v20, %s3430_s11 }
 0x23c   :  { %137 = vperm.xlu0 %3175, %v105_v35  }
 0x240   :  { %3177 = vset.pattern.permute.xlu0 %v3426_v11 }
 0x2aa   :  { %v771_v22 = vpop.permute.xlu0 %770 }
 0x2ab   :  { %v773_v21 = vpop.permute.xlu1 %772  ;;  %v776_v25 = vmul.f32 %v3210_v56, %v771_v22 }
 0x2ac   :  { %v777_v23 = vmul.f32 %v3212_v57, %v773_v21 }
 0x2ae   :  { %v780_v24 = vrot.slane %v777_v23, 7 }
 0x2b0   :  { %v782_v26 = vsel %vm781_vm1, %v780_v24, %v776_v25  ;;  %v144_v24 = vld [vmem:[%s4329_s0 + $0x1] sm:$0x1] }
 0x2b1   :  { %783 = vrot.lane.b32.xlu1 %v782_v26, %s3431_s12 }
 0x2b5   :  { %133 = vperm.xlu1 %3176, %v104_v36  }
 0x2b7   :  { %v138_v30 = vpop.permute.xlu0 %137 }
 0x2b8   :  { %v141_v32 = vmul.f32 %v3583_v39, %v138_v30 }
 0x2b9   :  { %3178 = vset.pattern.permute.xlu1 %v3426_v11 }
 0x2ba   :  { %v143_v35 = vadd.f32 %v3588_v41, %v141_v32 }
 0x323   :  { %v784_v27 = vpop.permute.xlu1 %783 }
 0x324   :  { %3006 = vmatmul.mubr.msk.f32.vlgmr.msra.gmra.mxu1 %vm648_vm2, %v784_v27  ;;  %v150_v27 = vmul.f32 %v144_v24, %v3526_v9 }
 0x325   :  { %3020 = vmatpush3.msra.mxu1 %v3486_v1  ;;  %3027 = vmatprep.mubr.msk.f32.mxu1 %vm3425_vm0, %v3424_v0 }
 0x326   :  { %3021 = vmatprep.subr.mxu1 %v3424_v0 }
 0x327   :  { %3022 = vmatpush3.msra.mxu1 %v3495_v2 }
 0x328   :  { %3023 = vmatprep.subr.mxu1 %v3424_v0 }
 0x329   :  { %3024 = vmatpush3.msra.mxu1 %v3502_v3 }
 0x32a   :  { %3025 = vmatprep.subr.mxu1 %v3424_v0 }
 0x32b   :  { %3026 = vmatpush3.msra.mxu1 %v3515_v5 }
 0x32c   :  { %3041 = vmatprep.subr.mxu1 %v3424_v0 }
 0x330   :  { %v134_v28 = vpop.permute.xlu1 %133 }
 0x331   :  { %v140_v31 = vmul.f32 %v3583_v39, %v134_v28 }
 0x333   :  { %v142_v33 = vadd.f32 %v3588_v41, %v140_v31  ;;  %v162_v31 = vmul.f32 %v144_v24, %v3518_v6 }
 0x3e4   :  { %v853_v34 = vpop.f32.mrf.mxu1 }
 0x3e5   :  { %v858_v36 = vrot.slane %v853_v34, 1  ;;  %v861_v37 = vadd.f32 %v853_v34, %v142_v33 }
 0x3e6   :  { %v3007_v38 = vpop.f32.mrf.mxu1 }
 0x3e7   :  { %v862_v40 = vadd.f32 %v858_v36, %v143_v35  ;;  %v2831_v42 = vmul.f32 -1.442695, %v861_v37  ;;  %v174_v35 = vmul.f32 %v144_v24, %v3539_v14  ;;  %v146_v38 = vmul.f32 %v144_v24, %v3564_v17 }
 0x3e9   :  { %3217 = vpow2.f32 %v2831_v42  ;;  %v2832_v43 = vmul.f32 -1.442695, %v862_v40 }
 0x3eb   :  { %3219 = vpow2.f32 %v2832_v43 }
 0x3f6   :  { %v3218_v44 = vpop.eup %3217 }
 0x3f7   :  { %v869_v45 = vadd.f32 1.0, %v3218_v44 }
 0x3f8   :  { %v3220_v46 = vpop.eup %3219 }
 0x3f9   :  { %v870_v47 = vadd.f32 1.0, %v3220_v46  ;;  %3221 = vrcp.f32 %v869_v45 }
 0x3fb   :  { %3223 = vrcp.f32 %v870_v47 }
 0x406   :  { %v3222_v48 = vpop.eup %3221 }
 0x407   :  { %v875_v49 = vmul.f32 2.0, %v3222_v48  ;;  %v879_v58 = vmul.f32 %v3222_v48, %v3600_v16 }
 0x408   :  { %v3224_v50 = vpop.eup %3223 }
 0x409   :  { %v2833_v51 = vadd.f32 -1.0, %v875_v49  ;;  %v876_v52 = vmul.f32 2.0, %v3224_v50  ;;  %v880_v61 = vmul.f32 %v3224_v50, %v3602_v18  ;;  %v147_v18 = vmul.f32 %v145_v4, %v3564_v17 }
 0x40b   :  { %883 = vrot.lane.b32.xlu0 %v2833_v51, %s3430_s11  ;;  %v2834_v53 = vadd.f32 -1.0, %v876_v52 }
 0x40d   :  { %885 = vrot.lane.b32.xlu1 %v2834_v53, %s3430_s11 }
 0x47d   :  { %v884_v54 = vpop.permute.xlu0 %883 }
 0x47e   :  { %v889_v55 = vmul.f32 %v3222_v48, %v884_v54 }
 0x47f   :  { %v886_v56 = vpop.permute.xlu1 %885 }
 0x480   :  { %v890_v57 = vmul.f32 %v3224_v50, %v886_v56  ;;  %893 = vrot.lane.b32.xlu0 %v889_v55, %s3431_s12 }
 0x482   :  { %895 = vrot.lane.b32.xlu1 %v890_v57, %s3431_s12 }
 0x4f2   :  { %v894_v59 = vpop.permute.xlu0 %893 }
 0x4f3   :  { %v3634_v60 = vadd.f32 %v894_v59, %v879_v58 }
 0x4f4   :  { %v896_v62 = vpop.permute.xlu1 %895 }
 0x4f5   :  { %3225 = vtanh.f32 %v3634_v60  ;;  %v3638_v63 = vadd.f32 %v896_v62, %v880_v61 }
 0x4f7   :  { %3227 = vtanh.f32 %v3638_v63 }
 0x502   :  { %v3226_v7 = vpop.eup %3225 }
 0x503   :  { %905 = vrot.lane.b32.xlu0 %v3226_v7, %s3430_s11 }
 0x504   :  { %v3228_v12 = vpop.eup %3227 }
 0x505   :  { %907 = vrot.lane.b32.xlu1 %v3228_v12, %s3430_s11 }
 0x507   :  { %156 = vrot.lane.b32.xlu0 %v151_v10, %s3428_s25 }
 0x50b   :  { %168 = vrot.lane.b32.xlu0 %v163_v13, %s3427_s24 }
 0x50f   :  { %180 = vrot.lane.b32.xlu0 %v175_v15, %s3429_s26 }
 0x575   :  { %v906_v16 = vpop.permute.xlu0 %905 }
 0x576   :  { %v911_v22 = vmul.f32 %v3222_v48, %v906_v16 }
 0x577   :  { %v908_v19 = vpop.permute.xlu1 %907 }
 0x578   :  { %v912_v20 = vmul.f32 %v3224_v50, %v908_v19 }
 0x579   :  { %v157_v21 = vpop.permute.xlu0 %156 }
 0x57a   :  { %v915_v23 = vrot.slane %v912_v20, 7  ;;  %v161_v25 = vadd.f32 %v157_v21, %v147_v18 }
 0x57c   :  { %v916_v26 = vsel %vm781_vm1, %v915_v23, %v911_v22 }
 0x57d   :  { %917 = vrot.lane.b32.xlu1 %v916_v26, %s3431_s12  ;;  %v169_v28 = vpop.permute.xlu0 %168 }
 0x57e   :  { %v173_v30 = vadd.f32 %v169_v28, %v161_v25 }
 0x581   :  { %154 = vrot.lane.b32.xlu1 %v150_v27, %s3428_s25  ;;  %v181_v32 = vpop.permute.xlu0 %180 }
 0x582   :  { %v185_v33 = vadd.f32 %v181_v32, %v173_v30 }
 0x584   :  { %v3662_v34 = vadd.f32 %v185_v33, %v3571_v29 }
 0x585   :  { %166 = vrot.lane.b32.xlu1 %v162_v31, %s3427_s24 }
 0x586   :  { %v189_v36 = vmax.f32 %v3662_v34, 0.0 }
 0x588   :  { %197 = vperm.xlu0 %3177, %v189_v36  }
 0x589   :  { %178 = vrot.lane.b32.xlu1 %v174_v35, %s3429_s26 }
 0x58c   :  { %3179 = vset.pattern.permute.xlu0 %v3432_v8 }
 0x5ef   :  { %v918_v37 = vpop.permute.xlu1 %917 }
 0x5f0   :  { %3017 = vmatmul.mubr.msk.f32.vlgmr.msra.gmra.mxu0 %vm648_vm2, %v918_v37 }
 0x5f1   :  { %3031 = vmatpush3.msra.mxu0 %v3486_v1  ;;  %3038 = vmatprep.mubr.msk.f32.mxu0 %vm3425_vm0, %v3424_v0 }
 0x5f2   :  { %3032 = vmatprep.subr.mxu0 %v3424_v0 }
 0x5f3   :  { %v155_v40 = vpop.permute.xlu1 %154  ;;  %3033 = vmatpush3.msra.mxu0 %v3495_v2 }
 0x5f4   :  { %v160_v42 = vadd.f32 %v155_v40, %v146_v38  ;;  %3034 = vmatprep.subr.mxu0 %v3424_v0 }
 0x5f5   :  { %3035 = vmatpush3.msra.mxu0 %v3502_v3 }
 0x5f6   :  { %3036 = vmatprep.subr.mxu0 %v3424_v0 }
 0x5f7   :  { %v167_v43 = vpop.permute.xlu1 %166  ;;  %3037 = vmatpush3.msra.mxu0 %v3515_v5 }
 0x5f8   :  { %v172_v44 = vadd.f32 %v167_v43, %v160_v42  ;;  %3052 = vmatprep.subr.mxu0 %v3424_v0 }
 0x5fb   :  { %v179_v45 = vpop.permute.xlu1 %178 }
 0x5fc   :  { %v184_v46 = vadd.f32 %v179_v45, %v172_v44 }
 0x5fe   :  { %v186_v47 = vadd.f32 %v184_v46, %v3571_v29 }
 0x600   :  { %v188_v48 = vmax.f32 %v186_v47, 0.0 }
 0x602   :  { %192 = vperm.xlu1 %3178, %v188_v48  }
 0x603   :  { %v198_v51 = vpop.permute.xlu0 %197 }
 0x604   :  { %v201_v52 = vmul.f32 %v3583_v39, %v198_v51 }
 0x606   :  { %3180 = vset.pattern.permute.xlu1 %v3432_v8  ;;  %v203_v55 = vadd.f32 %v3588_v41, %v201_v52 }
 0x67d   :  { %v193_v49 = vpop.permute.xlu1 %192 }
 0x67e   :  { %v200_v50 = vmul.f32 %v3583_v39, %v193_v49 }
 0x680   :  { %v202_v53 = vadd.f32 %v3588_v41, %v200_v50 }
 0x6b0   :  { %v987_v54 = vpop.f32.mrf.mxu0 }
 0x6b1   :  { %v992_v56 = vrot.slane %v987_v54, 1  ;;  %v995_v57 = vadd.f32 %v987_v54, %v202_v53 }
 0x6b2   :  { %v3018_v58 = vpop.f32.mrf.mxu0 }
 0x6b3   :  { %v996_v59 = vadd.f32 %v992_v56, %v203_v55  ;;  %v2836_v61 = vmul.f32 -1.442695, %v995_v57 }
 0x6b5   :  { %3229 = vpow2.f32 %v2836_v61  ;;  %v2837_v62 = vmul.f32 -1.442695, %v996_v59 }
 0x6b7   :  { %3231 = vpow2.f32 %v2837_v62 }
 0x6c2   :  { %v3230_v4 = vpop.eup %3229 }
 0x6c3   :  { %v1003_v7 = vadd.f32 1.0, %v3230_v4 }
 0x6c4   :  { %v3232_v10 = vpop.eup %3231 }
 0x6c5   :  { %v1004_v12 = vadd.f32 1.0, %v3232_v10  ;;  %3233 = vrcp.f32 %v1003_v7 }
 0x6c7   :  { %3235 = vrcp.f32 %v1004_v12 }
 0x6d2   :  { %v3234_v13 = vpop.eup %3233 }
 0x6d3   :  { %v1009_v15 = vmul.f32 2.0, %v3234_v13  ;;  %v1013_v25 = vmul.f32 %v3234_v13, %v3634_v60 }
 0x6d4   :  { %v3236_v16 = vpop.eup %3235 }
 0x6d5   :  { %v2838_v18 = vadd.f32 -1.0, %v1009_v15  ;;  %v1010_v19 = vmul.f32 2.0, %v3236_v16  ;;  %v1014_v28 = vmul.f32 %v3236_v16, %v3638_v63 }
 0x6d7   :  { %1017 = vrot.lane.b32.xlu0 %v2838_v18, %s3430_s11  ;;  %v2839_v20 = vadd.f32 -1.0, %v1010_v19 }
 0x6d9   :  { %1019 = vrot.lane.b32.xlu1 %v2839_v20, %s3430_s11 }
 0x749   :  { %v1018_v21 = vpop.permute.xlu0 %1017 }
 0x74a   :  { %v1023_v22 = vmul.f32 %v3234_v13, %v1018_v21 }
 0x74b   :  { %v1020_v23 = vpop.permute.xlu1 %1019 }
 0x74c   :  { %v1024_v24 = vmul.f32 %v3236_v16, %v1020_v23  ;;  %1027 = vrot.lane.b32.xlu0 %v1023_v22, %s3431_s12  ;;  %v217_v23 = vld [vmem:[%s4329_s0 + $0xa] sm:$0x1] }
 0x74e   :  { %1029 = vrot.lane.b32.xlu1 %v1024_v24, %s3431_s12 }
 0x7be   :  { %v1028_v26 = vpop.permute.xlu0 %1027 }
 0x7bf   :  { %v3694_v27 = vadd.f32 %v1028_v26, %v1013_v25  ;;  %v223_v25 = vmul.f32 %v217_v23, %v3526_v9 }
 0x7c0   :  { %v1030_v30 = vpop.permute.xlu1 %1029 }
 0x7c1   :  { %3237 = vtanh.f32 %v3694_v27  ;;  %v3698_v31 = vadd.f32 %v1030_v30, %v1014_v28  ;;  %v247_v28 = vmul.f32 %v217_v23, %v3539_v14 }
 0x7c3   :  { %3239 = vtanh.f32 %v3698_v31 }
 0x7ce   :  { %v3238_v32 = vpop.eup %3237 }
 0x7cf   :  { %1039 = vrot.lane.b32.xlu0 %v3238_v32, %s3430_s11 }
 0x7d0   :  { %v3240_v33 = vpop.eup %3239 }
 0x7d1   :  { %1041 = vrot.lane.b32.xlu1 %v3240_v33, %s3430_s11 }
 0x7d3   :  { %209 = vperm.xlu0 %3179, %v189_v36  }
 0x7d7   :  { %3181 = vset.pattern.permute.xlu0 %v3426_v11 }
 0x841   :  { %v1040_v60 = vpop.permute.xlu0 %1039 }
 0x842   :  { %v1045_v37 = vmul.f32 %v3234_v13, %v1040_v60 }
 0x843   :  { %v1042_v63 = vpop.permute.xlu1 %1041 }
 0x844   :  { %v1046_v35 = vmul.f32 %v3236_v16, %v1042_v63 }
 0x846   :  { %v1049_v38 = vrot.slane %v1046_v35, 7 }
 0x848   :  { %v1050_v40 = vsel %vm781_vm1, %v1049_v38, %v1045_v37  ;;  %v216_v37 = vld [vmem:[%s4329_s0 + $0x2] sm:$0x1] }
 0x849   :  { %1051 = vrot.lane.b32.xlu1 %v1050_v40, %s3431_s12 }
 0x84d   :  { %205 = vperm.xlu1 %3180, %v188_v48  }
 0x84e   :  { %v210_v36 = vpop.permute.xlu0 %209 }
 0x84f   :  { %v213_v44 = vmul.f32 %v3583_v39, %v210_v36 }
 0x851   :  { %3182 = vset.pattern.permute.xlu1 %v3426_v11  ;;  %v215_v47 = vadd.f32 %v3588_v41, %v213_v44 }
 0x8bb   :  { %v1052_v42 = vpop.permute.xlu1 %1051 }
 0x8bc   :  { %3028 = vmatmul.mubr.msk.f32.vlgmr.msra.gmra.mxu1 %vm648_vm2, %v1052_v42  ;;  %v222_v42 = vmul.f32 %v216_v37, %v3526_v9 }
 0x8bd   :  { %3042 = vmatpush3.msra.mxu1 %v3486_v1  ;;  %3049 = vmatprep.mubr.msk.f32.mxu1 %vm3425_vm0, %v3424_v0 }
 0x8be   :  { %3043 = vmatprep.subr.mxu1 %v3424_v0 }
 0x8bf   :  { %3044 = vmatpush3.msra.mxu1 %v3495_v2 }
 0x8c0   :  { %3045 = vmatprep.subr.mxu1 %v3424_v0 }
 0x8c1   :  { %3046 = vmatpush3.msra.mxu1 %v3502_v3 }
 0x8c2   :  { %3047 = vmatprep.subr.mxu1 %v3424_v0 }
 0x8c3   :  { %3048 = vmatpush3.msra.mxu1 %v3515_v5 }
 0x8c4   :  { %3063 = vmatprep.subr.mxu1 %v3424_v0 }
 0x8c8   :  { %v206_v34 = vpop.permute.xlu1 %205 }
 0x8c9   :  { %v212_v43 = vmul.f32 %v3583_v39, %v206_v34 }
 0x8cb   :  { %v214_v45 = vadd.f32 %v3588_v41, %v212_v43  ;;  %v234_v43 = vmul.f32 %v216_v37, %v3518_v6 }
 0x97c   :  { %v1121_v46 = vpop.f32.mrf.mxu1 }
 0x97d   :  { %v1126_v48 = vrot.slane %v1121_v46, 1  ;;  %v1129_v49 = vadd.f32 %v1121_v46, %v214_v45 }
 0x97e   :  { %v3029_v50 = vpop.f32.mrf.mxu1 }
 0x97f   :  { %v1130_v51 = vadd.f32 %v1126_v48, %v215_v47  ;;  %v2841_v52 = vmul.f32 -1.442695, %v1129_v49  ;;  %v246_v47 = vmul.f32 %v216_v37, %v3539_v14  ;;  %v218_v50 = vmul.f32 %v216_v37, %v3564_v17 }
 0x981   :  { %3241 = vpow2.f32 %v2841_v52  ;;  %v2842_v53 = vmul.f32 -1.442695, %v1130_v51 }
 0x983   :  { %3243 = vpow2.f32 %v2842_v53 }
 0x98e   :  { %v3242_v54 = vpop.eup %3241 }
 0x98f   :  { %v1137_v55 = vadd.f32 1.0, %v3242_v54 }
 0x990   :  { %v3244_v56 = vpop.eup %3243 }
 0x991   :  { %v1138_v57 = vadd.f32 1.0, %v3244_v56  ;;  %3245 = vrcp.f32 %v1137_v55 }
 0x993   :  { %3247 = vrcp.f32 %v1138_v57 }
 0x99e   :  { %v3246_v58 = vpop.eup %3245 }
 0x99f   :  { %v1143_v59 = vmul.f32 2.0, %v3246_v58  ;;  %v1147_v16 = vmul.f32 %v3246_v58, %v3694_v27  ;;  %v235_v27 = vmul.f32 %v217_v23, %v3518_v6 }
 0x9a0   :  { %v3248_v61 = vpop.eup %3247 }
 0x9a1   :  { %v2843_v62 = vadd.f32 -1.0, %v1143_v59  ;;  %v1144_v4 = vmul.f32 2.0, %v3248_v61  ;;  %v1148_v20 = vmul.f32 %v3248_v61, %v3698_v31  ;;  %v219_v31 = vmul.f32 %v217_v23, %v3564_v17 }
 0x9a3   :  { %1151 = vrot.lane.b32.xlu0 %v2843_v62, %s3430_s11  ;;  %v2844_v7 = vadd.f32 -1.0, %v1144_v4 }
 0x9a5   :  { %1153 = vrot.lane.b32.xlu1 %v2844_v7, %s3430_s11 }
 0xa15   :  { %v1152_v10 = vpop.permute.xlu0 %1151 }
 0xa16   :  { %v1157_v12 = vmul.f32 %v3246_v58, %v1152_v10 }
 0xa17   :  { %v1154_v13 = vpop.permute.xlu1 %1153 }
 0xa18   :  { %v1158_v15 = vmul.f32 %v3248_v61, %v1154_v13  ;;  %1161 = vrot.lane.b32.xlu0 %v1157_v12, %s3431_s12 }
 0xa1a   :  { %1163 = vrot.lane.b32.xlu1 %v1158_v15, %s3431_s12 }
 0xa8a   :  { %v1162_v18 = vpop.permute.xlu0 %1161 }
 0xa8b   :  { %v3729_v19 = vadd.f32 %v1162_v18, %v1147_v16 }
 0xa8c   :  { %v1164_v21 = vpop.permute.xlu1 %1163 }
 0xa8d   :  { %3249 = vtanh.f32 %v3729_v19  ;;  %v3733_v22 = vadd.f32 %v1164_v21, %v1148_v20 }
 0xa8f   :  { %3251 = vtanh.f32 %v3733_v22 }
 0xa9a   :  { %v3250_v24 = vpop.eup %3249 }
 0xa9b   :  { %1173 = vrot.lane.b32.xlu0 %v3250_v24, %s3430_s11 }
 0xa9c   :  { %v3252_v26 = vpop.eup %3251 }
 0xa9d   :  { %1175 = vrot.lane.b32.xlu1 %v3252_v26, %s3430_s11 }
 0xa9f   :  { %228 = vrot.lane.b32.xlu0 %v223_v25, %s3428_s25 }
 0xaa3   :  { %240 = vrot.lane.b32.xlu0 %v235_v27, %s3427_s24 }
 0xaa7   :  { %252 = vrot.lane.b32.xlu0 %v247_v28, %s3429_s26 }
 0xb0d   :  { %v1174_v30 = vpop.permute.xlu0 %1173 }
 0xb0e   :  { %v1179_v63 = vmul.f32 %v3246_v58, %v1174_v30 }
 0xb0f   :  { %v1176_v32 = vpop.permute.xlu1 %1175 }
 0xb10   :  { %v1180_v33 = vmul.f32 %v3248_v61, %v1176_v32 }
 0xb11   :  { %v229_v60 = vpop.permute.xlu0 %228 }
 0xb12   :  { %v1183_v35 = vrot.slane %v1180_v33, 7  ;;  %v233_v38 = vadd.f32 %v229_v60, %v219_v31 }
 0xb14   :  { %v1184_v40 = vsel %vm781_vm1, %v1183_v35, %v1179_v63 }
 0xb15   :  { %1185 = vrot.lane.b32.xlu1 %v1184_v40, %s3431_s12  ;;  %v241_v34 = vpop.permute.xlu0 %240 }
 0xb16   :  { %v245_v36 = vadd.f32 %v241_v34, %v233_v38 }
 0xb19   :  { %226 = vrot.lane.b32.xlu1 %v222_v42, %s3428_s25  ;;  %v253_v44 = vpop.permute.xlu0 %252 }
 0xb1a   :  { %v257_v45 = vadd.f32 %v253_v44, %v245_v36 }
 0xb1c   :  { %v3757_v46 = vadd.f32 %v257_v45, %v3571_v29 }
 0xb1d   :  { %238 = vrot.lane.b32.xlu1 %v234_v43, %s3427_s24 }
 0xb1e   :  { %v261_v48 = vmax.f32 %v3757_v46, 0.0 }
 0xb20   :  { %269 = vperm.xlu0 %3181, %v261_v48  }
 0xb21   :  { %250 = vrot.lane.b32.xlu1 %v246_v47, %s3429_s26 }
 0xb24   :  { %3183 = vset.pattern.permute.xlu0 %v3432_v8 }
 0xb87   :  { %v1186_v49 = vpop.permute.xlu1 %1185 }
 0xb88   :  { %3039 = vmatmul.mubr.msk.f32.vlgmr.msra.gmra.mxu0 %vm648_vm2, %v1186_v49 }
 0xb89   :  { %3053 = vmatpush3.msra.mxu0 %v3486_v1  ;;  %3060 = vmatprep.mubr.msk.f32.mxu0 %vm3425_vm0, %v3424_v0 }
 0xb8a   :  { %3054 = vmatprep.subr.mxu0 %v3424_v0 }
 0xb8b   :  { %v227_v51 = vpop.permute.xlu1 %226  ;;  %3055 = vmatpush3.msra.mxu0 %v3495_v2 }
 0xb8c   :  { %v232_v52 = vadd.f32 %v227_v51, %v218_v50  ;;  %3056 = vmatprep.subr.mxu0 %v3424_v0 }
 0xb8d   :  { %3057 = vmatpush3.msra.mxu0 %v3502_v3 }
 0xb8e   :  { %3058 = vmatprep.subr.mxu0 %v3424_v0 }
 0xb8f   :  { %v239_v53 = vpop.permute.xlu1 %238  ;;  %3059 = vmatpush3.msra.mxu0 %v3515_v5 }
 0xb90   :  { %v244_v54 = vadd.f32 %v239_v53, %v232_v52  ;;  %3074 = vmatprep.subr.mxu0 %v3424_v0 }
 0xb93   :  { %v251_v55 = vpop.permute.xlu1 %250 }
 0xb94   :  { %v256_v56 = vadd.f32 %v251_v55, %v244_v54 }
 0xb96   :  { %v258_v57 = vadd.f32 %v256_v56, %v3571_v29 }
 0xb98   :  { %v260_v58 = vmax.f32 %v258_v57, 0.0 }
 0xb9a   :  { %264 = vperm.xlu1 %3182, %v260_v58  }
 0xb9b   :  { %v270_v62 = vpop.permute.xlu0 %269 }
 0xb9c   :  { %v273_v4 = vmul.f32 %v3583_v39, %v270_v62 }
 0xb9e   :  { %3184 = vset.pattern.permute.xlu1 %v3432_v8  ;;  %v275_v12 = vadd.f32 %v3588_v41, %v273_v4 }
 0xc15   :  { %v265_v59 = vpop.permute.xlu1 %264 }
 0xc16   :  { %v272_v61 = vmul.f32 %v3583_v39, %v265_v59 }
 0xc18   :  { %v274_v7 = vadd.f32 %v3588_v41, %v272_v61 }
 0xc48   :  { %v1255_v10 = vpop.f32.mrf.mxu0 }
 0xc49   :  { %v1260_v13 = vrot.slane %v1255_v10, 1  ;;  %v1263_v15 = vadd.f32 %v1255_v10, %v274_v7 }
 0xc4a   :  { %v3040_v16 = vpop.f32.mrf.mxu0 }
 0xc4b   :  { %v1264_v18 = vadd.f32 %v1260_v13, %v275_v12  ;;  %v2846_v20 = vmul.f32 -1.442695, %v1263_v15 }
 0xc4d   :  { %3253 = vpow2.f32 %v2846_v20  ;;  %v2847_v21 = vmul.f32 -1.442695, %v1264_v18 }
 0xc4f   :  { %3255 = vpow2.f32 %v2847_v21 }
 0xc5a   :  { %v3254_v23 = vpop.eup %3253 }
 0xc5b   :  { %v1271_v24 = vadd.f32 1.0, %v3254_v23 }
 0xc5c   :  { %v3256_v25 = vpop.eup %3255 }
 0xc5d   :  { %v1272_v26 = vadd.f32 1.0, %v3256_v25  ;;  %3257 = vrcp.f32 %v1271_v24 }
 0xc5f   :  { %3259 = vrcp.f32 %v1272_v26 }
 0xc6a   :  { %v3258_v27 = vpop.eup %3257 }
 0xc6b   :  { %v1277_v28 = vmul.f32 2.0, %v3258_v27  ;;  %v1281_v38 = vmul.f32 %v3258_v27, %v3729_v19 }
 0xc6c   :  { %v3260_v30 = vpop.eup %3259 }
 0xc6d   :  { %v2848_v31 = vadd.f32 -1.0, %v1277_v28  ;;  %v1278_v32 = vmul.f32 2.0, %v3260_v30  ;;  %v1282_v34 = vmul.f32 %v3260_v30, %v3733_v22 }
 0xc6f   :  { %1285 = vrot.lane.b32.xlu0 %v2848_v31, %s3430_s11  ;;  %v2849_v33 = vadd.f32 -1.0, %v1278_v32 }
 0xc71   :  { %1287 = vrot.lane.b32.xlu1 %v2849_v33, %s3430_s11 }
 0xce1   :  { %v1286_v60 = vpop.permute.xlu0 %1285 }
 0xce2   :  { %v1291_v63 = vmul.f32 %v3258_v27, %v1286_v60 }
 0xce3   :  { %v1288_v35 = vpop.permute.xlu1 %1287 }
 0xce4   :  { %v1292_v37 = vmul.f32 %v3260_v30, %v1288_v35  ;;  %1295 = vrot.lane.b32.xlu0 %v1291_v63, %s3431_s12 }
 0xce6   :  { %1297 = vrot.lane.b32.xlu1 %v1292_v37, %s3431_s12 }
 0xd56   :  { %v1296_v40 = vpop.permute.xlu0 %1295 }
 0xd57   :  { %v3789_v42 = vadd.f32 %v1296_v40, %v1281_v38 }
 0xd58   :  { %v1298_v36 = vpop.permute.xlu1 %1297 }
 0xd59   :  { %3261 = vtanh.f32 %v3789_v42  ;;  %v3793_v43 = vadd.f32 %v1298_v36, %v1282_v34 }
 0xd5b   :  { %3263 = vtanh.f32 %v3793_v43 }
 0xd66   :  { %v3262_v44 = vpop.eup %3261 }
 0xd67   :  { %1307 = vrot.lane.b32.xlu0 %v3262_v44, %s3430_s11 }
 0xd68   :  { %v3264_v45 = vpop.eup %3263 }
 0xd69   :  { %1309 = vrot.lane.b32.xlu1 %v3264_v45, %s3430_s11 }
 0xd6b   :  { %281 = vperm.xlu0 %3183, %v261_v48  }
 0xd6f   :  { %3185 = vset.pattern.permute.xlu0 %v3426_v11 }
 0xdd9   :  { %v1308_v19 = vpop.permute.xlu0 %1307 }
 0xdda   :  { %v1313_v49 = vmul.f32 %v3258_v27, %v1308_v19 }
 0xddb   :  { %v1310_v22 = vpop.permute.xlu1 %1309 }
 0xddc   :  { %v1314_v47 = vmul.f32 %v3260_v30, %v1310_v22  ;;  %v289_v30 = vld [vmem:[%s4329_s0 + $0xb] sm:$0x1] }
 0xddd   :  { %v295_v32 = vmul.f32 %v289_v30, %v3526_v9  ;;  %v307_v60 = vmul.f32 %v289_v30, %v3518_v6  ;;  %v319_v63 = vmul.f32 %v289_v30, %v3539_v14  ;;  %v291_v37 = vmul.f32 %v289_v30, %v3564_v17 }
 0xdde   :  { %v1317_v50 = vrot.slane %v1314_v47, 7 }
 0xde0   :  { %v1318_v51 = vsel %vm781_vm1, %v1317_v50, %v1313_v49 }
 0xde1   :  { %1319 = vrot.lane.b32.xlu1 %v1318_v51, %s3431_s12 }
 0xde5   :  { %277 = vperm.xlu1 %3184, %v260_v58  }
 0xde6   :  { %v282_v48 = vpop.permute.xlu0 %281 }
 0xde7   :  { %v285_v53 = vmul.f32 %v3583_v39, %v282_v48 }
 0xde9   :  { %3186 = vset.pattern.permute.xlu1 %v3426_v11 }
 0xe53   :  { %v1320_v52 = vpop.permute.xlu1 %1319 }
 0xe54   :  { %3050 = vmatmul.mubr.msk.f32.vlgmr.msra.gmra.mxu1 %vm648_vm2, %v1320_v52 }
 0xe55   :  { %3064 = vmatpush3.msra.mxu1 %v3486_v1  ;;  %3071 = vmatprep.mubr.msk.f32.mxu1 %vm3425_vm0, %v3424_v0 }
 0xe56   :  { %3065 = vmatprep.subr.mxu1 %v3424_v0 }
 0xe57   :  { %3066 = vmatpush3.msra.mxu1 %v3495_v2  ;;  %v287_v2 = vadd.f32 %v3588_v41, %v285_v53 }
 0xe58   :  { %3067 = vmatprep.subr.mxu1 %v3424_v0 }
 0xe59   :  { %3068 = vmatpush3.msra.mxu1 %v3502_v3 }
 0xe5a   :  { %3069 = vmatprep.subr.mxu1 %v3424_v0 }
 0xe5b   :  { %3070 = vmatpush3.msra.mxu1 %v3515_v5 }
 0xe5c   :  { %3085 = vmatprep.subr.mxu1 %v3424_v0 }
 0xe60   :  { %v278_v46 = vpop.permute.xlu1 %277 }
 0xe61   :  { %v284_v1 = vmul.f32 %v3583_v39, %v278_v46 }
 0xe63   :  { %v286_v54 = vadd.f32 %v3588_v41, %v284_v1 }
 0xf14   :  { %v1389_v55 = vpop.f32.mrf.mxu1 }
 0xf15   :  { %v1394_v56 = vrot.slane %v1389_v55, 1  ;;  %v1397_v57 = vadd.f32 %v1389_v55, %v286_v54  ;;  %v3866_v54 = vld [vmem:[%s4333_s4 + $0x18] sm:$0xff] }
 0xf16   :  { %v3051_v3 = vpop.f32.mrf.mxu1 }
 0xf17   :  { %v1398_v58 = vadd.f32 %v1394_v56, %v287_v2  ;;  %v2851_v59 = vmul.f32 -1.442695, %v1397_v57  ;;  %v3875_v2 = vld [vmem:[%s4333_s4 + $0x10] sm:$0xff]  ;;  %v3882_v57 = vld [vmem:[%s4333_s4 + $0x8] sm:$0xff] }
 0xf19   :  { %3265 = vpow2.f32 %v2851_v59  ;;  %v2852_v5 = vmul.f32 -1.442695, %v1398_v58  ;;  %v3889_v58 = vld [vmem:[%s4333_s4] sm:$0xff] }
 0xf1b   :  { %3267 = vpow2.f32 %v2852_v5 }
 0xf26   :  { %v3266_v61 = vpop.eup %3265 }
 0xf27   :  { %v1405_v62 = vadd.f32 1.0, %v3266_v61 }
 0xf28   :  { %v3268_v4 = vpop.eup %3267 }
 0xf29   :  { %v1406_v7 = vadd.f32 1.0, %v3268_v4  ;;  %3269 = vrcp.f32 %v1405_v62 }
 0xf2b   :  { %3271 = vrcp.f32 %v1406_v7 }
 0xf36   :  { %v3270_v39 = vpop.eup %3269 }
 0xf37   :  { %v1411_v10 = vmul.f32 2.0, %v3270_v39  ;;  %v1415_v23 = vmul.f32 %v3270_v39, %v3789_v42 }
 0xf38   :  { %v3272_v12 = vpop.eup %3271 }
 0xf39   :  { %v2853_v13 = vadd.f32 -1.0, %v1411_v10  ;;  %v1412_v15 = vmul.f32 2.0, %v3272_v12  ;;  %v1416_v26 = vmul.f32 %v3272_v12, %v3793_v43  ;;  %v288_v43 = vld [vmem:[%s4329_s0 + $0x3] sm:$0x1] }
 0xf3a   :  { %v294_v19 = vmul.f32 %v288_v43, %v3526_v9  ;;  %v306_v49 = vmul.f32 %v288_v43, %v3518_v6  ;;  %v318_v46 = vmul.f32 %v288_v43, %v3539_v14  ;;  %v290_v53 = vmul.f32 %v288_v43, %v3564_v17 }
 0xf3b   :  { %1419 = vrot.lane.b32.xlu0 %v2853_v13, %s3430_s11  ;;  %v2854_v41 = vadd.f32 -1.0, %v1412_v15  ;;  %v3905_v15 = vld [vmem:[%s4334_s5] ss:$0 sm:$0xff] }
 0xf3d   :  { %1421 = vrot.lane.b32.xlu1 %v2854_v41, %s3430_s11 }
 0xfad   :  { %v1420_v16 = vpop.permute.xlu0 %1419 }
 0xfae   :  { %v1425_v18 = vmul.f32 %v3270_v39, %v1420_v16 }
 0xfaf   :  { %v1422_v20 = vpop.permute.xlu1 %1421 }
 0xfb0   :  { %v1426_v21 = vmul.f32 %v3272_v12, %v1422_v20  ;;  %1429 = vrot.lane.b32.xlu0 %v1425_v18, %s3431_s12 }
 0xfb2   :  { %1431 = vrot.lane.b32.xlu1 %v1426_v21, %s3431_s12 }
0x1022   :  { %v1430_v24 = vpop.permute.xlu0 %1429 }
0x1023   :  { %v3824_v25 = vadd.f32 %v1430_v24, %v1415_v23 }
0x1024   :  { %v1432_v27 = vpop.permute.xlu1 %1431 }
0x1025   :  { %3273 = vtanh.f32 %v3824_v25  ;;  %v3828_v28 = vadd.f32 %v1432_v27, %v1416_v26 }
0x1027   :  { %3275 = vtanh.f32 %v3828_v28 }
0x1032   :  { %v3274_v31 = vpop.eup %3273 }
0x1033   :  { %1441 = vrot.lane.b32.xlu0 %v3274_v31, %s3430_s11 }
0x1034   :  { %v3276_v33 = vpop.eup %3275 }
0x1035   :  { %1443 = vrot.lane.b32.xlu1 %v3276_v33, %s3430_s11 }
0x1037   :  { %300 = vrot.lane.b32.xlu0 %v295_v32, %s3428_s25 }
0x103b   :  { %312 = vrot.lane.b32.xlu0 %v307_v60, %s3427_s24 }
0x103f   :  { %324 = vrot.lane.b32.xlu0 %v319_v63, %s3429_s26 }
0x10a5   :  { %v1442_v35 = vpop.permute.xlu0 %1441 }
0x10a6   :  { %v1447_v34 = vmul.f32 %v3270_v39, %v1442_v35  ;;  %v3898_v39 = vld [vmem:[%s4332_s3] ss:$0 sm:$0xff] }
0x10a7   :  { %v1444_v38 = vpop.permute.xlu1 %1443 }
0x10a8   :  { %v1448_v40 = vmul.f32 %v3272_v12, %v1444_v38 }
0x10a9   :  { %v301_v42 = vpop.permute.xlu0 %300 }
0x10aa   :  { %v1451_v36 = vrot.slane %v1448_v40, 7  ;;  %v305_v44 = vadd.f32 %v301_v42, %v291_v37 }
0x10ac   :  { %v1452_v45 = vsel %vm781_vm1, %v1451_v36, %v1447_v34 }
0x10ad   :  { %1453 = vrot.lane.b32.xlu1 %v1452_v45, %s3431_s12  ;;  %v313_v22 = vpop.permute.xlu0 %312 }
0x10ae   :  { %v317_v47 = vadd.f32 %v313_v22, %v305_v44 }
0x10b1   :  { %298 = vrot.lane.b32.xlu1 %v294_v19, %s3428_s25  ;;  %v325_v50 = vpop.permute.xlu0 %324 }
0x10b2   :  { %v329_v51 = vadd.f32 %v325_v50, %v317_v47 }
0x10b4   :  { %v3852_v52 = vadd.f32 %v329_v51, %v3571_v29 }
0x10b5   :  { %310 = vrot.lane.b32.xlu1 %v306_v49, %s3427_s24 }
0x10b6   :  { %v333_v48 = vmax.f32 %v3852_v52, 0.0 }
0x10b8   :  { %341 = vperm.xlu0 %3185, %v333_v48  }
0x10b9   :  { %322 = vrot.lane.b32.xlu1 %v318_v46, %s3429_s26 }
0x10bc   :  { %3187 = vset.pattern.permute.xlu0 %v3432_v8 }
0x111f   :  { %v1454_v1 = vpop.permute.xlu1 %1453 }
0x1120   :  { %3061 = vmatmul.mubr.msk.f32.vlgmr.msra.gmra.mxu0 %vm648_vm2, %v1454_v1 }
0x1121   :  { %3075 = vmatpush3.msra.mxu0 %v3866_v54  ;;  %3082 = vmatprep.mubr.msk.f32.mxu0 %vm3425_vm0, %v3424_v0 }
0x1122   :  { %3076 = vmatprep.subr.mxu0 %v3424_v0 }
0x1123   :  { %v299_v55 = vpop.permute.xlu1 %298  ;;  %3077 = vmatpush3.msra.mxu0 %v3875_v2 }
0x1124   :  { %v304_v56 = vadd.f32 %v299_v55, %v290_v53  ;;  %3078 = vmatprep.subr.mxu0 %v3424_v0 }
0x1125   :  { %3079 = vmatpush3.msra.mxu0 %v3882_v57 }
0x1126   :  { %3080 = vmatprep.subr.mxu0 %v3424_v0 }
0x1127   :  { %v311_v3 = vpop.permute.xlu1 %310  ;;  %3081 = vmatpush3.msra.mxu0 %v3889_v58 }
0x1128   :  { %v316_v59 = vadd.f32 %v311_v3, %v304_v56  ;;  %3096 = vmatprep.subr.mxu0 %v3424_v0 }
0x112b   :  { %v323_v5 = vpop.permute.xlu1 %322 }
0x112c   :  { %v328_v61 = vadd.f32 %v323_v5, %v316_v59 }
0x112e   :  { %v330_v62 = vadd.f32 %v328_v61, %v3571_v29 }
0x1130   :  { %v332_v4 = vmax.f32 %v330_v62, 0.0 }
0x1132   :  { %336 = vperm.xlu1 %3186, %v332_v4  }
0x1133   :  { %v342_v12 = vpop.permute.xlu0 %341 }
0x1134   :  { %v345_v13 = vmul.f32 %v3898_v39, %v342_v12 }
0x1136   :  { %3188 = vset.pattern.permute.xlu1 %v3432_v8  ;;  %v347_v18 = vadd.f32 %v3905_v15, %v345_v13 }
0x11ad   :  { %v337_v7 = vpop.permute.xlu1 %336 }
0x11ae   :  { %v344_v10 = vmul.f32 %v3898_v39, %v337_v7 }
0x11b0   :  { %v346_v41 = vadd.f32 %v3905_v15, %v344_v10 }
0x11e0   :  { %v1523_v16 = vpop.f32.mrf.mxu0 }
0x11e1   :  { %v1528_v20 = vrot.slane %v1523_v16, 1  ;;  %v1531_v21 = vadd.f32 %v1523_v16, %v346_v41 }
0x11e2   :  { %v3062_v23 = vpop.f32.mrf.mxu0 }
0x11e3   :  { %v1532_v24 = vadd.f32 %v1528_v20, %v347_v18  ;;  %v2856_v26 = vmul.f32 -1.442695, %v1531_v21 }
0x11e5   :  { %3277 = vpow2.f32 %v2856_v26  ;;  %v2857_v27 = vmul.f32 -1.442695, %v1532_v24 }
0x11e7   :  { %3279 = vpow2.f32 %v2857_v27 }
0x11f2   :  { %v3278_v30 = vpop.eup %3277 }
0x11f3   :  { %v1539_v31 = vadd.f32 1.0, %v3278_v30 }
0x11f4   :  { %v3280_v32 = vpop.eup %3279 }
0x11f5   :  { %v1540_v33 = vadd.f32 1.0, %v3280_v32  ;;  %3281 = vrcp.f32 %v1539_v31 }
0x11f7   :  { %3283 = vrcp.f32 %v1540_v33 }
0x1202   :  { %v3282_v60 = vpop.eup %3281 }
0x1203   :  { %v1545_v63 = vmul.f32 2.0, %v3282_v60  ;;  %v1549_v44 = vmul.f32 %v3282_v60, %v3824_v25 }
0x1204   :  { %v3284_v35 = vpop.eup %3283 }
0x1205   :  { %v2858_v37 = vadd.f32 -1.0, %v1545_v63  ;;  %v1546_v38 = vmul.f32 2.0, %v3284_v35  ;;  %v1550_v22 = vmul.f32 %v3284_v35, %v3828_v28 }
0x1207   :  { %1553 = vrot.lane.b32.xlu0 %v2858_v37, %s3430_s11  ;;  %v2859_v40 = vadd.f32 -1.0, %v1546_v38 }
0x1209   :  { %1555 = vrot.lane.b32.xlu1 %v2859_v40, %s3430_s11 }
0x1279   :  { %v1554_v42 = vpop.permute.xlu0 %1553 }
0x127a   :  { %v1559_v34 = vmul.f32 %v3282_v60, %v1554_v42 }
0x127b   :  { %v1556_v36 = vpop.permute.xlu1 %1555 }
0x127c   :  { %v1560_v43 = vmul.f32 %v3284_v35, %v1556_v36  ;;  %1563 = vrot.lane.b32.xlu0 %v1559_v34, %s3431_s12  ;;  %v361_v36 = vld [vmem:[%s4329_s0 + $0xc] sm:$0x1] }
0x127e   :  { %1565 = vrot.lane.b32.xlu1 %v1560_v43, %s3431_s12 }
0x12ee   :  { %v1564_v45 = vpop.permute.xlu0 %1563 }
0x12ef   :  { %v3914_v19 = vadd.f32 %v1564_v45, %v1549_v44  ;;  %v367_v44 = vmul.f32 %v361_v36, %v3526_v9 }
0x12f0   :  { %v1566_v47 = vpop.permute.xlu1 %1565 }
0x12f1   :  { %3285 = vtanh.f32 %v3914_v19  ;;  %v3918_v49 = vadd.f32 %v1566_v47, %v1550_v22  ;;  %v391_v22 = vmul.f32 %v361_v36, %v3539_v14 }
0x12f3   :  { %3287 = vtanh.f32 %v3918_v49 }
0x12fe   :  { %v3286_v50 = vpop.eup %3285 }
0x12ff   :  { %1575 = vrot.lane.b32.xlu0 %v3286_v50, %s3430_s11 }
0x1300   :  { %v3288_v51 = vpop.eup %3287 }
0x1301   :  { %1577 = vrot.lane.b32.xlu1 %v3288_v51, %s3430_s11 }
0x1303   :  { %353 = vperm.xlu0 %3187, %v333_v48  }
0x1307   :  { %3189 = vset.pattern.permute.xlu0 %v3426_v11 }
0x1371   :  { %v1576_v25 = vpop.permute.xlu0 %1575 }
0x1372   :  { %v1581_v1 = vmul.f32 %v3282_v60, %v1576_v25 }
0x1373   :  { %v1578_v28 = vpop.permute.xlu1 %1577 }
0x1374   :  { %v1582_v46 = vmul.f32 %v3284_v35, %v1578_v28 }
0x1376   :  { %v1585_v53 = vrot.slane %v1582_v46, 7 }
0x1378   :  { %v1586_v55 = vsel %vm781_vm1, %v1585_v53, %v1581_v1  ;;  %v360_v1 = vld [vmem:[%s4329_s0 + $0x4] sm:$0x1] }
0x1379   :  { %1587 = vrot.lane.b32.xlu1 %v1586_v55, %s3431_s12 }
0x137d   :  { %349 = vperm.xlu1 %3188, %v332_v4  }
0x137e   :  { %v354_v48 = vpop.permute.xlu0 %353 }
0x137f   :  { %v357_v59 = vmul.f32 %v3898_v39, %v354_v48 }
0x1381   :  { %3190 = vset.pattern.permute.xlu1 %v3426_v11  ;;  %v359_v62 = vadd.f32 %v3905_v15, %v357_v59 }
0x13eb   :  { %v1588_v56 = vpop.permute.xlu1 %1587 }
0x13ec   :  { %3072 = vmatmul.mubr.msk.f32.vlgmr.msra.gmra.mxu1 %vm648_vm2, %v1588_v56  ;;  %v366_v56 = vmul.f32 %v360_v1, %v3526_v9 }
0x13ed   :  { %3086 = vmatpush3.msra.mxu1 %v3866_v54  ;;  %3093 = vmatprep.mubr.msk.f32.mxu1 %vm3425_vm0, %v3424_v0 }
0x13ee   :  { %3087 = vmatprep.subr.mxu1 %v3424_v0 }
0x13ef   :  { %3088 = vmatpush3.msra.mxu1 %v3875_v2 }
0x13f0   :  { %3089 = vmatprep.subr.mxu1 %v3424_v0 }
0x13f1   :  { %3090 = vmatpush3.msra.mxu1 %v3882_v57 }
0x13f2   :  { %3091 = vmatprep.subr.mxu1 %v3424_v0 }
0x13f3   :  { %3092 = vmatpush3.msra.mxu1 %v3889_v58 }
0x13f4   :  { %3107 = vmatprep.subr.mxu1 %v3424_v0 }
0x13f8   :  { %v350_v52 = vpop.permute.xlu1 %349 }
0x13f9   :  { %v356_v3 = vmul.f32 %v3898_v39, %v350_v52 }
0x13fb   :  { %v358_v5 = vadd.f32 %v3905_v15, %v356_v3  ;;  %v378_v3 = vmul.f32 %v360_v1, %v3518_v6 }
0x14ac   :  { %v1657_v61 = vpop.f32.mrf.mxu1 }
0x14ad   :  { %v1662_v4 = vrot.slane %v1657_v61, 1  ;;  %v1665_v7 = vadd.f32 %v1657_v61, %v358_v5 }
0x14ae   :  { %v3073_v10 = vpop.f32.mrf.mxu1 }
0x14af   :  { %v1666_v12 = vadd.f32 %v1662_v4, %v359_v62  ;;  %v2861_v13 = vmul.f32 -1.442695, %v1665_v7  ;;  %v390_v62 = vmul.f32 %v360_v1, %v3539_v14  ;;  %v362_v10 = vmul.f32 %v360_v1, %v3564_v17 }
0x14b1   :  { %3289 = vpow2.f32 %v2861_v13  ;;  %v2862_v41 = vmul.f32 -1.442695, %v1666_v12 }
0x14b3   :  { %3291 = vpow2.f32 %v2862_v41 }
0x14be   :  { %v3290_v16 = vpop.eup %3289 }
0x14bf   :  { %v1673_v18 = vadd.f32 1.0, %v3290_v16 }
0x14c0   :  { %v3292_v20 = vpop.eup %3291 }
0x14c1   :  { %v1674_v21 = vadd.f32 1.0, %v3292_v20  ;;  %3293 = vrcp.f32 %v1673_v18 }
0x14c3   :  { %3295 = vrcp.f32 %v1674_v21 }
0x14ce   :  { %v3294_v23 = vpop.eup %3293 }
0x14cf   :  { %v1679_v24 = vmul.f32 2.0, %v3294_v23  ;;  %v1683_v35 = vmul.f32 %v3294_v23, %v3914_v19  ;;  %v379_v19 = vmul.f32 %v361_v36, %v3518_v6 }
0x14d0   :  { %v3296_v26 = vpop.eup %3295 }
0x14d1   :  { %v2863_v27 = vadd.f32 -1.0, %v1679_v24  ;;  %v1680_v30 = vmul.f32 2.0, %v3296_v26  ;;  %v1684_v40 = vmul.f32 %v3296_v26, %v3918_v49  ;;  %v363_v49 = vmul.f32 %v361_v36, %v3564_v17 }
0x14d3   :  { %1687 = vrot.lane.b32.xlu0 %v2863_v27, %s3430_s11  ;;  %v2864_v31 = vadd.f32 -1.0, %v1680_v30 }
0x14d5   :  { %1689 = vrot.lane.b32.xlu1 %v2864_v31, %s3430_s11 }
0x1545   :  { %v1688_v32 = vpop.permute.xlu0 %1687 }
0x1546   :  { %v1693_v33 = vmul.f32 %v3294_v23, %v1688_v32 }
0x1547   :  { %v1690_v60 = vpop.permute.xlu1 %1689 }
0x1548   :  { %v1694_v63 = vmul.f32 %v3296_v26, %v1690_v60  ;;  %1697 = vrot.lane.b32.xlu0 %v1693_v33, %s3431_s12 }
0x154a   :  { %1699 = vrot.lane.b32.xlu1 %v1694_v63, %s3431_s12 }
0x15ba   :  { %v1698_v37 = vpop.permute.xlu0 %1697 }
0x15bb   :  { %v3949_v38 = vadd.f32 %v1698_v37, %v1683_v35 }
0x15bc   :  { %v1700_v42 = vpop.permute.xlu1 %1699 }
0x15bd   :  { %3297 = vtanh.f32 %v3949_v38  ;;  %v3953_v34 = vadd.f32 %v1700_v42, %v1684_v40 }
0x15bf   :  { %3299 = vtanh.f32 %v3953_v34 }
0x15ca   :  { %v3298_v43 = vpop.eup %3297 }
0x15cb   :  { %1709 = vrot.lane.b32.xlu0 %v3298_v43, %s3430_s11 }
0x15cc   :  { %v3300_v45 = vpop.eup %3299 }
0x15cd   :  { %1711 = vrot.lane.b32.xlu1 %v3300_v45, %s3430_s11 }
0x15cf   :  { %372 = vrot.lane.b32.xlu0 %v367_v44, %s3428_s25 }
0x15d3   :  { %384 = vrot.lane.b32.xlu0 %v379_v19, %s3427_s24 }
0x15d7   :  { %396 = vrot.lane.b32.xlu0 %v391_v22, %s3429_s26 }
0x163d   :  { %v1710_v47 = vpop.permute.xlu0 %1709 }
0x163e   :  { %v1715_v28 = vmul.f32 %v3294_v23, %v1710_v47 }
0x163f   :  { %v1712_v50 = vpop.permute.xlu1 %1711 }
0x1640   :  { %v1716_v51 = vmul.f32 %v3296_v26, %v1712_v50 }
0x1641   :  { %v373_v25 = vpop.permute.xlu0 %372 }
0x1642   :  { %v1719_v46 = vrot.slane %v1716_v51, 7  ;;  %v377_v53 = vadd.f32 %v373_v25, %v363_v49 }
0x1644   :  { %v1720_v55 = vsel %vm781_vm1, %v1719_v46, %v1715_v28 }
0x1645   :  { %1721 = vrot.lane.b32.xlu1 %v1720_v55, %s3431_s12  ;;  %v385_v52 = vpop.permute.xlu0 %384 }
0x1646   :  { %v389_v48 = vadd.f32 %v385_v52, %v377_v53 }
0x1649   :  { %370 = vrot.lane.b32.xlu1 %v366_v56, %s3428_s25  ;;  %v397_v59 = vpop.permute.xlu0 %396 }
0x164a   :  { %v401_v5 = vadd.f32 %v397_v59, %v389_v48 }
0x164c   :  { %v3977_v61 = vadd.f32 %v401_v5, %v3571_v29 }
0x164d   :  { %382 = vrot.lane.b32.xlu1 %v378_v3, %s3427_s24 }
0x164e   :  { %v405_v4 = vmax.f32 %v3977_v61, 0.0 }
0x1650   :  { %413 = vperm.xlu0 %3189, %v405_v4  }
0x1651   :  { %394 = vrot.lane.b32.xlu1 %v390_v62, %s3429_s26 }
0x1654   :  { %3191 = vset.pattern.permute.xlu0 %v3432_v8 }
0x16b7   :  { %v1722_v7 = vpop.permute.xlu1 %1721 }
0x16b8   :  { %3083 = vmatmul.mubr.msk.f32.vlgmr.msra.gmra.mxu0 %vm648_vm2, %v1722_v7 }
0x16b9   :  { %3097 = vmatpush3.msra.mxu0 %v3866_v54  ;;  %3104 = vmatprep.mubr.msk.f32.mxu0 %vm3425_vm0, %v3424_v0 }
0x16ba   :  { %3098 = vmatprep.subr.mxu0 %v3424_v0 }
0x16bb   :  { %v371_v12 = vpop.permute.xlu1 %370  ;;  %3099 = vmatpush3.msra.mxu0 %v3875_v2 }
0x16bc   :  { %v376_v13 = vadd.f32 %v371_v12, %v362_v10  ;;  %3100 = vmatprep.subr.mxu0 %v3424_v0 }
0x16bd   :  { %3101 = vmatpush3.msra.mxu0 %v3882_v57 }
0x16be   :  { %3102 = vmatprep.subr.mxu0 %v3424_v0 }
0x16bf   :  { %v383_v41 = vpop.permute.xlu1 %382  ;;  %3103 = vmatpush3.msra.mxu0 %v3889_v58 }
0x16c0   :  { %v388_v16 = vadd.f32 %v383_v41, %v376_v13  ;;  %3118 = vmatprep.subr.mxu0 %v3424_v0 }
0x16c3   :  { %v395_v18 = vpop.permute.xlu1 %394 }
0x16c4   :  { %v400_v20 = vadd.f32 %v395_v18, %v388_v16 }
0x16c6   :  { %v402_v21 = vadd.f32 %v400_v20, %v3571_v29 }
0x16c8   :  { %v404_v23 = vmax.f32 %v402_v21, 0.0 }
0x16ca   :  { %408 = vperm.xlu1 %3190, %v404_v23  }
0x16cb   :  { %v414_v27 = vpop.permute.xlu0 %413 }
0x16cc   :  { %v417_v30 = vmul.f32 %v3898_v39, %v414_v27 }
0x16ce   :  { %3192 = vset.pattern.permute.xlu1 %v3432_v8  ;;  %v419_v33 = vadd.f32 %v3905_v15, %v417_v30 }
0x1745   :  { %v409_v24 = vpop.permute.xlu1 %408 }
0x1746   :  { %v416_v26 = vmul.f32 %v3898_v39, %v409_v24 }
0x1748   :  { %v418_v31 = vadd.f32 %v3905_v15, %v416_v26 }
0x1778   :  { %v1791_v32 = vpop.f32.mrf.mxu0 }
0x1779   :  { %v1796_v60 = vrot.slane %v1791_v32, 1  ;;  %v1799_v63 = vadd.f32 %v1791_v32, %v418_v31 }
0x177a   :  { %v3084_v35 = vpop.f32.mrf.mxu0 }
0x177b   :  { %v1800_v37 = vadd.f32 %v1796_v60, %v419_v33  ;;  %v2866_v40 = vmul.f32 -1.442695, %v1799_v63 }
0x177d   :  { %3301 = vpow2.f32 %v2866_v40  ;;  %v2867_v42 = vmul.f32 -1.442695, %v1800_v37 }
0x177f   :  { %3303 = vpow2.f32 %v2867_v42 }
0x178a   :  { %v3302_v36 = vpop.eup %3301 }
0x178b   :  { %v1807_v43 = vadd.f32 1.0, %v3302_v36 }
0x178c   :  { %v3304_v44 = vpop.eup %3303 }
0x178d   :  { %v1808_v45 = vadd.f32 1.0, %v3304_v44  ;;  %3305 = vrcp.f32 %v1807_v43 }
0x178f   :  { %3307 = vrcp.f32 %v1808_v45 }
0x179a   :  { %v3306_v19 = vpop.eup %3305 }
0x179b   :  { %v1813_v22 = vmul.f32 2.0, %v3306_v19  ;;  %v1817_v53 = vmul.f32 %v3306_v19, %v3949_v38 }
0x179c   :  { %v3308_v47 = vpop.eup %3307 }
0x179d   :  { %v2868_v49 = vadd.f32 -1.0, %v1813_v22  ;;  %v1814_v50 = vmul.f32 2.0, %v3308_v47  ;;  %v1818_v52 = vmul.f32 %v3308_v47, %v3953_v34 }
0x179f   :  { %1821 = vrot.lane.b32.xlu0 %v2868_v49, %s3430_s11  ;;  %v2869_v51 = vadd.f32 -1.0, %v1814_v50 }
0x17a1   :  { %1823 = vrot.lane.b32.xlu1 %v2869_v51, %s3430_s11 }
0x1811   :  { %v1822_v25 = vpop.permute.xlu0 %1821 }
0x1812   :  { %v1827_v28 = vmul.f32 %v3306_v19, %v1822_v25 }
0x1813   :  { %v1824_v46 = vpop.permute.xlu1 %1823 }
0x1814   :  { %v1828_v1 = vmul.f32 %v3308_v47, %v1824_v46  ;;  %1831 = vrot.lane.b32.xlu0 %v1827_v28, %s3431_s12  ;;  %v433_v46 = vld [vmem:[%s4329_s0 + $0xd] sm:$0x1] }
0x1816   :  { %1833 = vrot.lane.b32.xlu1 %v1828_v1, %s3431_s12 }
0x1886   :  { %v1832_v55 = vpop.permute.xlu0 %1831 }
0x1887   :  { %v4009_v56 = vadd.f32 %v1832_v55, %v1817_v53  ;;  %v439_v53 = vmul.f32 %v433_v46, %v3526_v9 }
0x1888   :  { %v1834_v48 = vpop.permute.xlu1 %1833 }
0x1889   :  { %3309 = vtanh.f32 %v4009_v56  ;;  %v4013_v3 = vadd.f32 %v1834_v48, %v1818_v52  ;;  %v463_v52 = vmul.f32 %v433_v46, %v3539_v14 }
0x188b   :  { %3311 = vtanh.f32 %v4013_v3 }
0x1896   :  { %v3310_v59 = vpop.eup %3309 }
0x1897   :  { %1843 = vrot.lane.b32.xlu0 %v3310_v59, %s3430_s11 }
0x1898   :  { %v3312_v5 = vpop.eup %3311 }
0x1899   :  { %1845 = vrot.lane.b32.xlu1 %v3312_v5, %s3430_s11 }
0x189b   :  { %425 = vperm.xlu0 %3191, %v405_v4  }
0x189f   :  { %3193 = vset.pattern.permute.xlu0 %v3426_v11 }
0x1909   :  { %v1844_v38 = vpop.permute.xlu0 %1843 }
0x190a   :  { %v1849_v7 = vmul.f32 %v3306_v19, %v1844_v38 }
0x190b   :  { %v1846_v34 = vpop.permute.xlu1 %1845 }
0x190c   :  { %v1850_v62 = vmul.f32 %v3308_v47, %v1846_v34 }
0x190e   :  { %v1853_v10 = vrot.slane %v1850_v62, 7 }
0x1910   :  { %v1854_v12 = vsel %vm781_vm1, %v1853_v10, %v1849_v7  ;;  %v432_v7 = vld [vmem:[%s4329_s0 + $0x5] sm:$0x1] }
0x1911   :  { %1855 = vrot.lane.b32.xlu1 %v1854_v12, %s3431_s12 }
0x1915   :  { %421 = vperm.xlu1 %3192, %v404_v23  }
0x1916   :  { %v426_v4 = vpop.permute.xlu0 %425 }
0x1917   :  { %v429_v16 = vmul.f32 %v3898_v39, %v426_v4 }
0x1919   :  { %3194 = vset.pattern.permute.xlu1 %v3426_v11  ;;  %v431_v21 = vadd.f32 %v3905_v15, %v429_v16 }
0x1983   :  { %v1856_v13 = vpop.permute.xlu1 %1855 }
0x1984   :  { %3094 = vmatmul.mubr.msk.f32.vlgmr.msra.gmra.mxu1 %vm648_vm2, %v1856_v13  ;;  %v438_v13 = vmul.f32 %v432_v7, %v3526_v9 }
0x1985   :  { %3108 = vmatpush3.msra.mxu1 %v3866_v54  ;;  %3115 = vmatprep.mubr.msk.f32.mxu1 %vm3425_vm0, %v3424_v0 }
0x1986   :  { %3109 = vmatprep.subr.mxu1 %v3424_v0 }
0x1987   :  { %3110 = vmatpush3.msra.mxu1 %v3875_v2 }
0x1988   :  { %3111 = vmatprep.subr.mxu1 %v3424_v0 }
0x1989   :  { %3112 = vmatpush3.msra.mxu1 %v3882_v57 }
0x198a   :  { %3113 = vmatprep.subr.mxu1 %v3424_v0 }
0x198b   :  { %3114 = vmatpush3.msra.mxu1 %v3889_v58 }
0x198c   :  { %3129 = vmatprep.subr.mxu1 %v3424_v0 }
0x1990   :  { %v422_v61 = vpop.permute.xlu1 %421 }
0x1991   :  { %v428_v41 = vmul.f32 %v3898_v39, %v422_v61 }
0x1993   :  { %v430_v18 = vadd.f32 %v3905_v15, %v428_v41  ;;  %v450_v41 = vmul.f32 %v432_v7, %v3518_v6 }
0x1a44   :  { %v1925_v20 = vpop.f32.mrf.mxu1 }
0x1a45   :  { %v1930_v23 = vrot.slane %v1925_v20, 1  ;;  %v1933_v24 = vadd.f32 %v1925_v20, %v430_v18 }
0x1a46   :  { %v3095_v26 = vpop.f32.mrf.mxu1 }
0x1a47   :  { %v1934_v27 = vadd.f32 %v1930_v23, %v431_v21  ;;  %v2871_v30 = vmul.f32 -1.442695, %v1933_v24  ;;  %v462_v21 = vmul.f32 %v432_v7, %v3539_v14  ;;  %v434_v26 = vmul.f32 %v432_v7, %v3564_v17 }
0x1a49   :  { %3313 = vpow2.f32 %v2871_v30  ;;  %v2872_v31 = vmul.f32 -1.442695, %v1934_v27 }
0x1a4b   :  { %3315 = vpow2.f32 %v2872_v31 }
0x1a56   :  { %v3314_v32 = vpop.eup %3313 }
0x1a57   :  { %v1941_v33 = vadd.f32 1.0, %v3314_v32 }
0x1a58   :  { %v3316_v60 = vpop.eup %3315 }
0x1a59   :  { %v1942_v63 = vadd.f32 1.0, %v3316_v60  ;;  %3317 = vrcp.f32 %v1941_v33 }
0x1a5b   :  { %3319 = vrcp.f32 %v1942_v63 }
0x1a66   :  { %v3318_v35 = vpop.eup %3317 }
0x1a67   :  { %v1947_v37 = vmul.f32 2.0, %v3318_v35  ;;  %v1951_v47 = vmul.f32 %v3318_v35, %v4009_v56  ;;  %v451_v56 = vmul.f32 %v433_v46, %v3518_v6 }
0x1a68   :  { %v3320_v40 = vpop.eup %3319 }
0x1a69   :  { %v2873_v42 = vadd.f32 -1.0, %v1947_v37  ;;  %v1948_v36 = vmul.f32 2.0, %v3320_v40  ;;  %v1952_v51 = vmul.f32 %v3320_v40, %v4013_v3  ;;  %v435_v3 = vmul.f32 %v433_v46, %v3564_v17 }
0x1a6b   :  { %1955 = vrot.lane.b32.xlu0 %v2873_v42, %s3430_s11  ;;  %v2874_v43 = vadd.f32 -1.0, %v1948_v36 }
0x1a6d   :  { %1957 = vrot.lane.b32.xlu1 %v2874_v43, %s3430_s11 }
0x1add   :  { %v1956_v44 = vpop.permute.xlu0 %1955 }
0x1ade   :  { %v1961_v45 = vmul.f32 %v3318_v35, %v1956_v44 }
0x1adf   :  { %v1958_v19 = vpop.permute.xlu1 %1957 }
0x1ae0   :  { %v1962_v22 = vmul.f32 %v3320_v40, %v1958_v19  ;;  %1965 = vrot.lane.b32.xlu0 %v1961_v45, %s3431_s12 }
0x1ae2   :  { %1967 = vrot.lane.b32.xlu1 %v1962_v22, %s3431_s12 }
0x1b52   :  { %v1966_v49 = vpop.permute.xlu0 %1965 }
0x1b53   :  { %v4044_v50 = vadd.f32 %v1966_v49, %v1951_v47 }
0x1b54   :  { %v1968_v25 = vpop.permute.xlu1 %1967 }
0x1b55   :  { %3321 = vtanh.f32 %v4044_v50  ;;  %v4048_v28 = vadd.f32 %v1968_v25, %v1952_v51 }
0x1b57   :  { %3323 = vtanh.f32 %v4048_v28 }
0x1b62   :  { %v3322_v1 = vpop.eup %3321 }
0x1b63   :  { %1977 = vrot.lane.b32.xlu0 %v3322_v1, %s3430_s11 }
0x1b64   :  { %v3324_v55 = vpop.eup %3323 }
0x1b65   :  { %1979 = vrot.lane.b32.xlu1 %v3324_v55, %s3430_s11 }
0x1b67   :  { %444 = vrot.lane.b32.xlu0 %v439_v53, %s3428_s25 }
0x1b6b   :  { %456 = vrot.lane.b32.xlu0 %v451_v56, %s3427_s24 }
0x1b6f   :  { %468 = vrot.lane.b32.xlu0 %v463_v52, %s3429_s26 }
0x1bd5   :  { %v1978_v48 = vpop.permute.xlu0 %1977 }
0x1bd6   :  { %v1983_v34 = vmul.f32 %v3318_v35, %v1978_v48 }
0x1bd7   :  { %v1980_v59 = vpop.permute.xlu1 %1979 }
0x1bd8   :  { %v1984_v5 = vmul.f32 %v3320_v40, %v1980_v59 }
0x1bd9   :  { %v445_v38 = vpop.permute.xlu0 %444 }
0x1bda   :  { %v1987_v62 = vrot.slane %v1984_v5, 7  ;;  %v449_v10 = vadd.f32 %v445_v38, %v435_v3 }
0x1bdc   :  { %v1988_v12 = vsel %vm781_vm1, %v1987_v62, %v1983_v34 }
0x1bdd   :  { %1989 = vrot.lane.b32.xlu1 %v1988_v12, %s3431_s12  ;;  %v457_v61 = vpop.permute.xlu0 %456 }
0x1bde   :  { %v461_v4 = vadd.f32 %v457_v61, %v449_v10 }
0x1be1   :  { %442 = vrot.lane.b32.xlu1 %v438_v13, %s3428_s25  ;;  %v469_v16 = vpop.permute.xlu0 %468 }
0x1be2   :  { %v473_v18 = vadd.f32 %v469_v16, %v461_v4 }
0x1be4   :  { %v4072_v20 = vadd.f32 %v473_v18, %v3571_v29 }
0x1be5   :  { %454 = vrot.lane.b32.xlu1 %v450_v41, %s3427_s24 }
0x1be6   :  { %v477_v23 = vmax.f32 %v4072_v20, 0.0 }
0x1be8   :  { %485 = vperm.xlu0 %3193, %v477_v23  }
0x1be9   :  { %466 = vrot.lane.b32.xlu1 %v462_v21, %s3429_s26 }
0x1bec   :  { %3195 = vset.pattern.permute.xlu0 %v3432_v8 }
0x1c4f   :  { %v1990_v24 = vpop.permute.xlu1 %1989 }
0x1c50   :  { %3105 = vmatmul.mubr.msk.f32.vlgmr.msra.gmra.mxu0 %vm648_vm2, %v1990_v24 }
0x1c51   :  { %3119 = vmatpush3.msra.mxu0 %v3866_v54  ;;  %3126 = vmatprep.mubr.msk.f32.mxu0 %vm3425_vm0, %v3424_v0 }
0x1c52   :  { %3120 = vmatprep.subr.mxu0 %v3424_v0 }
0x1c53   :  { %v443_v27 = vpop.permute.xlu1 %442  ;;  %3121 = vmatpush3.msra.mxu0 %v3875_v2 }
0x1c54   :  { %v448_v30 = vadd.f32 %v443_v27, %v434_v26  ;;  %3122 = vmatprep.subr.mxu0 %v3424_v0 }
0x1c55   :  { %3123 = vmatpush3.msra.mxu0 %v3882_v57 }
0x1c56   :  { %3124 = vmatprep.subr.mxu0 %v3424_v0 }
0x1c57   :  { %v455_v31 = vpop.permute.xlu1 %454  ;;  %3125 = vmatpush3.msra.mxu0 %v3889_v58 }
0x1c58   :  { %v460_v32 = vadd.f32 %v455_v31, %v448_v30  ;;  %3140 = vmatprep.subr.mxu0 %v3424_v0 }
0x1c5b   :  { %v467_v33 = vpop.permute.xlu1 %466 }
0x1c5c   :  { %v472_v60 = vadd.f32 %v467_v33, %v460_v32 }
0x1c5e   :  { %v474_v63 = vadd.f32 %v472_v60, %v3571_v29 }
0x1c60   :  { %v476_v35 = vmax.f32 %v474_v63, 0.0 }
0x1c62   :  { %480 = vperm.xlu1 %3194, %v476_v35  }
0x1c63   :  { %v486_v42 = vpop.permute.xlu0 %485 }
0x1c64   :  { %v489_v36 = vmul.f32 %v3898_v39, %v486_v42 }
0x1c66   :  { %3196 = vset.pattern.permute.xlu1 %v3432_v8  ;;  %v491_v45 = vadd.f32 %v3905_v15, %v489_v36 }
0x1cdd   :  { %v481_v37 = vpop.permute.xlu1 %480 }
0x1cde   :  { %v488_v40 = vmul.f32 %v3898_v39, %v481_v37 }
0x1ce0   :  { %v490_v43 = vadd.f32 %v3905_v15, %v488_v40 }
0x1d10   :  { %v2059_v44 = vpop.f32.mrf.mxu0 }
0x1d11   :  { %v2064_v19 = vrot.slane %v2059_v44, 1  ;;  %v2067_v22 = vadd.f32 %v2059_v44, %v490_v43 }
0x1d12   :  { %v3106_v47 = vpop.f32.mrf.mxu0 }
0x1d13   :  { %v2068_v49 = vadd.f32 %v2064_v19, %v491_v45  ;;  %v2876_v51 = vmul.f32 -1.442695, %v2067_v22 }
0x1d15   :  { %3325 = vpow2.f32 %v2876_v51  ;;  %v2877_v25 = vmul.f32 -1.442695, %v2068_v49 }
0x1d17   :  { %3327 = vpow2.f32 %v2877_v25 }
0x1d22   :  { %v3326_v46 = vpop.eup %3325 }
0x1d23   :  { %v2075_v1 = vadd.f32 1.0, %v3326_v46 }
0x1d24   :  { %v3328_v53 = vpop.eup %3327 }
0x1d25   :  { %v2076_v55 = vadd.f32 1.0, %v3328_v53  ;;  %3329 = vrcp.f32 %v2075_v1 }
0x1d27   :  { %3331 = vrcp.f32 %v2076_v55 }
0x1d32   :  { %v3330_v56 = vpop.eup %3329 }
0x1d33   :  { %v2081_v52 = vmul.f32 2.0, %v3330_v56  ;;  %v2085_v10 = vmul.f32 %v3330_v56, %v4044_v50 }
0x1d34   :  { %v3332_v48 = vpop.eup %3331 }
0x1d35   :  { %v2878_v3 = vadd.f32 -1.0, %v2081_v52  ;;  %v2082_v59 = vmul.f32 2.0, %v3332_v48  ;;  %v2086_v61 = vmul.f32 %v3332_v48, %v4048_v28 }
0x1d37   :  { %2089 = vrot.lane.b32.xlu0 %v2878_v3, %s3430_s11  ;;  %v2879_v5 = vadd.f32 -1.0, %v2082_v59 }
0x1d39   :  { %2091 = vrot.lane.b32.xlu1 %v2879_v5, %s3430_s11 }
0x1da9   :  { %v2090_v38 = vpop.permute.xlu0 %2089 }
0x1daa   :  { %v2095_v34 = vmul.f32 %v3330_v56, %v2090_v38 }
0x1dab   :  { %v2092_v62 = vpop.permute.xlu1 %2091 }
0x1dac   :  { %v2096_v7 = vmul.f32 %v3332_v48, %v2092_v62  ;;  %2099 = vrot.lane.b32.xlu0 %v2095_v34, %s3431_s12  ;;  %v505_v62 = vld [vmem:[%s4329_s0 + $0xe] sm:$0x1] }
0x1dae   :  { %2101 = vrot.lane.b32.xlu1 %v2096_v7, %s3431_s12 }
0x1e1e   :  { %v2100_v12 = vpop.permute.xlu0 %2099 }
0x1e1f   :  { %v4104_v13 = vadd.f32 %v2100_v12, %v2085_v10  ;;  %v511_v10 = vmul.f32 %v505_v62, %v3526_v9 }
0x1e20   :  { %v2102_v4 = vpop.permute.xlu1 %2101 }
0x1e21   :  { %3333 = vtanh.f32 %v4104_v13  ;;  %v4108_v41 = vadd.f32 %v2102_v4, %v2086_v61  ;;  %v535_v61 = vmul.f32 %v505_v62, %v3539_v14 }
0x1e23   :  { %3335 = vtanh.f32 %v4108_v41 }
0x1e2e   :  { %v3334_v16 = vpop.eup %3333 }
0x1e2f   :  { %2111 = vrot.lane.b32.xlu0 %v3334_v16, %s3430_s11 }
0x1e30   :  { %v3336_v18 = vpop.eup %3335 }
0x1e31   :  { %2113 = vrot.lane.b32.xlu1 %v3336_v18, %s3430_s11 }
0x1e33   :  { %497 = vperm.xlu0 %3195, %v477_v23  }
0x1e37   :  { %3197 = vset.pattern.permute.xlu0 %v3426_v11 }
0x1ea1   :  { %v2112_v50 = vpop.permute.xlu0 %2111 }
0x1ea2   :  { %v2117_v24 = vmul.f32 %v3330_v56, %v2112_v50 }
0x1ea3   :  { %v2114_v28 = vpop.permute.xlu1 %2113 }
0x1ea4   :  { %v2118_v21 = vmul.f32 %v3332_v48, %v2114_v28 }
0x1ea6   :  { %v2121_v26 = vrot.slane %v2118_v21, 7 }
0x1ea8   :  { %v2122_v27 = vsel %vm781_vm1, %v2121_v26, %v2117_v24  ;;  %v504_v24 = vld [vmem:[%s4329_s0 + $0x6] sm:$0x1] }
0x1ea9   :  { %2123 = vrot.lane.b32.xlu1 %v2122_v27, %s3431_s12 }
0x1ead   :  { %493 = vperm.xlu1 %3196, %v476_v35  }
0x1eae   :  { %v498_v23 = vpop.permute.xlu0 %497 }
0x1eaf   :  { %v501_v32 = vmul.f32 %v3898_v39, %v498_v23 }
0x1eb1   :  { %3198 = vset.pattern.permute.xlu1 %v3426_v11  ;;  %v503_v63 = vadd.f32 %v3905_v15, %v501_v32 }
0x1f1b   :  { %v2124_v30 = vpop.permute.xlu1 %2123 }
0x1f1c   :  { %3116 = vmatmul.mubr.msk.f32.vlgmr.msra.gmra.mxu1 %vm648_vm2, %v2124_v30  ;;  %v510_v30 = vmul.f32 %v504_v24, %v3526_v9 }
0x1f1d   :  { %3130 = vmatpush3.msra.mxu1 %v3866_v54  ;;  %3137 = vmatprep.mubr.msk.f32.mxu1 %vm3425_vm0, %v3424_v0 }
0x1f1e   :  { %3131 = vmatprep.subr.mxu1 %v3424_v0 }
0x1f1f   :  { %3132 = vmatpush3.msra.mxu1 %v3875_v2 }
0x1f20   :  { %3133 = vmatprep.subr.mxu1 %v3424_v0 }
0x1f21   :  { %3134 = vmatpush3.msra.mxu1 %v3882_v57 }
0x1f22   :  { %3135 = vmatprep.subr.mxu1 %v3424_v0 }
0x1f23   :  { %3136 = vmatpush3.msra.mxu1 %v3889_v58 }
0x1f24   :  { %3151 = vmatprep.subr.mxu1 %v3424_v0 }
0x1f28   :  { %v494_v20 = vpop.permute.xlu1 %493 }
0x1f29   :  { %v500_v31 = vmul.f32 %v3898_v39, %v494_v20 }
0x1f2b   :  { %v502_v33 = vadd.f32 %v3905_v15, %v500_v31  ;;  %v522_v31 = vmul.f32 %v504_v24, %v3518_v6 }
0x1fdc   :  { %v2193_v60 = vpop.f32.mrf.mxu1 }
0x1fdd   :  { %v2198_v35 = vrot.slane %v2193_v60, 1  ;;  %v2201_v37 = vadd.f32 %v2193_v60, %v502_v33 }
0x1fde   :  { %v3117_v40 = vpop.f32.mrf.mxu1 }
0x1fdf   :  { %v2202_v42 = vadd.f32 %v2198_v35, %v503_v63  ;;  %v2881_v36 = vmul.f32 -1.442695, %v2201_v37  ;;  %v534_v63 = vmul.f32 %v504_v24, %v3539_v14  ;;  %v506_v40 = vmul.f32 %v504_v24, %v3564_v17 }
0x1fe1   :  { %3337 = vpow2.f32 %v2881_v36  ;;  %v2882_v43 = vmul.f32 -1.442695, %v2202_v42 }
0x1fe3   :  { %3339 = vpow2.f32 %v2882_v43 }
0x1fee   :  { %v3338_v44 = vpop.eup %3337 }
0x1fef   :  { %v2209_v45 = vadd.f32 1.0, %v3338_v44 }
0x1ff0   :  { %v3340_v19 = vpop.eup %3339 }
0x1ff1   :  { %v2210_v22 = vadd.f32 1.0, %v3340_v19  ;;  %3341 = vrcp.f32 %v2209_v45 }
0x1ff3   :  { %3343 = vrcp.f32 %v2210_v22 }
0x1ffe   :  { %v3342_v47 = vpop.eup %3341 }
0x1fff   :  { %v2215_v49 = vmul.f32 2.0, %v3342_v47  ;;  %v2219_v48 = vmul.f32 %v3342_v47, %v4104_v13  ;;  %v523_v13 = vmul.f32 %v505_v62, %v3518_v6 }
0x2000   :  { %v3344_v51 = vpop.eup %3343 }
0x2001   :  { %v2883_v25 = vadd.f32 -1.0, %v2215_v49  ;;  %v2216_v46 = vmul.f32 2.0, %v3344_v51  ;;  %v2220_v5 = vmul.f32 %v3344_v51, %v4108_v41  ;;  %v507_v41 = vmul.f32 %v505_v62, %v3564_v17 }
0x2003   :  { %2223 = vrot.lane.b32.xlu0 %v2883_v25, %s3430_s11  ;;  %v2884_v1 = vadd.f32 -1.0, %v2216_v46 }
0x2005   :  { %2225 = vrot.lane.b32.xlu1 %v2884_v1, %s3430_s11 }
0x2075   :  { %v2224_v53 = vpop.permute.xlu0 %2223 }
0x2076   :  { %v2229_v55 = vmul.f32 %v3342_v47, %v2224_v53 }
0x2077   :  { %v2226_v56 = vpop.permute.xlu1 %2225 }
0x2078   :  { %v2230_v52 = vmul.f32 %v3344_v51, %v2226_v56  ;;  %2233 = vrot.lane.b32.xlu0 %v2229_v55, %s3431_s12 }
0x207a   :  { %2235 = vrot.lane.b32.xlu1 %v2230_v52, %s3431_s12 }
0x20ea   :  { %v2234_v3 = vpop.permute.xlu0 %2233 }
0x20eb   :  { %v4139_v59 = vadd.f32 %v2234_v3, %v2219_v48 }
0x20ec   :  { %v2236_v38 = vpop.permute.xlu1 %2235 }
0x20ed   :  { %3345 = vtanh.f32 %v4139_v59  ;;  %v4143_v34 = vadd.f32 %v2236_v38, %v2220_v5 }
0x20ef   :  { %3347 = vtanh.f32 %v4143_v34 }
0x20fa   :  { %v3346_v7 = vpop.eup %3345 }
0x20fb   :  { %2245 = vrot.lane.b32.xlu0 %v3346_v7, %s3430_s11 }
0x20fc   :  { %v3348_v12 = vpop.eup %3347 }
0x20fd   :  { %2247 = vrot.lane.b32.xlu1 %v3348_v12, %s3430_s11 }
0x20ff   :  { %516 = vrot.lane.b32.xlu0 %v511_v10, %s3428_s25 }
0x2103   :  { %528 = vrot.lane.b32.xlu0 %v523_v13, %s3427_s24 }
0x2107   :  { %540 = vrot.lane.b32.xlu0 %v535_v61, %s3429_s26 }
0x216d   :  { %v2246_v4 = vpop.permute.xlu0 %2245 }
0x216e   :  { %v2251_v28 = vmul.f32 %v3342_v47, %v2246_v4 }
0x216f   :  { %v2248_v16 = vpop.permute.xlu1 %2247 }
0x2170   :  { %v2252_v18 = vmul.f32 %v3344_v51, %v2248_v16 }
0x2171   :  { %v517_v50 = vpop.permute.xlu0 %516 }
0x2172   :  { %v2255_v21 = vrot.slane %v2252_v18, 7  ;;  %v521_v26 = vadd.f32 %v517_v50, %v507_v41 }
0x2174   :  { %v2256_v27 = vsel %vm781_vm1, %v2255_v21, %v2251_v28 }
0x2175   :  { %2257 = vrot.lane.b32.xlu1 %v2256_v27, %s3431_s12  ;;  %v529_v20 = vpop.permute.xlu0 %528 }
0x2176   :  { %v533_v23 = vadd.f32 %v529_v20, %v521_v26 }
0x2179   :  { %514 = vrot.lane.b32.xlu1 %v510_v30, %s3428_s25  ;;  %v541_v32 = vpop.permute.xlu0 %540 }
0x217a   :  { %v545_v33 = vadd.f32 %v541_v32, %v533_v23 }
0x217c   :  { %v4167_v60 = vadd.f32 %v545_v33, %v3571_v29  ;;  %v3403_v33 = vld [vmem:[%s4333_s4 + $0x18] sm:$0xff] }
0x217d   :  { %526 = vrot.lane.b32.xlu1 %v522_v31, %s3427_s24 }
0x217e   :  { %v549_v35 = vmax.f32 %v4167_v60, 0.0  ;;  %v3404_v60 = vld [vmem:[%s4333_s4 + $0x10] sm:$0xff] }
0x2180   :  { %557 = vperm.xlu0 %3197, %v549_v35  }
0x2181   :  { %538 = vrot.lane.b32.xlu1 %v534_v63, %s3429_s26  ;;  %v3406_v63 = vld [vmem:[%s4333_s4] sm:$0xff] }
0x2184   :  { %3199 = vset.pattern.permute.xlu0 %v3432_v8 }
0x21e7   :  { %v2258_v37 = vpop.permute.xlu1 %2257 }
0x21e8   :  { %3127 = vmatmul.mubr.msk.f32.vlgmr.msra.gmra.mxu0 %vm648_vm2, %v2258_v37 }
0x21e9   :  { %3141 = vmatpush3.msra.mxu0 %v3866_v54  ;;  %3148 = vmatprep.mubr.msk.f32.mxu0 %vm3425_vm0, %v3424_v0 }
0x21ea   :  { %3142 = vmatprep.subr.mxu0 %v3424_v0 }
0x21eb   :  { %v515_v42 = vpop.permute.xlu1 %514  ;;  %3143 = vmatpush3.msra.mxu0 %v3875_v2 }
0x21ec   :  { %v520_v36 = vadd.f32 %v515_v42, %v506_v40  ;;  %3144 = vmatprep.subr.mxu0 %v3424_v0  ;;  %v4234_v40 = vld [vmem:[%s4332_s3] ss:$0 sm:$0xff] }
0x21ed   :  { %3145 = vmatpush3.msra.mxu0 %v3882_v57 }
0x21ee   :  { %3146 = vmatprep.subr.mxu0 %v3424_v0 }
0x21ef   :  { %v527_v43 = vpop.permute.xlu1 %526  ;;  %3147 = vmatpush3.msra.mxu0 %v3889_v58 }
0x21f0   :  { %v532_v44 = vadd.f32 %v527_v43, %v520_v36 }
0x21f3   :  { %v539_v54 = vpop.permute.xlu1 %538 }
0x21f4   :  { %v544_v45 = vadd.f32 %v539_v54, %v532_v44 }
0x21f6   :  { %v546_v19 = vadd.f32 %v544_v45, %v3571_v29 }
0x21f8   :  { %v548_v22 = vmax.f32 %v546_v19, 0.0 }
0x21fa   :  { %552 = vperm.xlu1 %3198, %v548_v22  }
0x21fb   :  { %v558_v49 = vpop.permute.xlu0 %557 }
0x21fc   :  { %v561_v57 = vmul.f32 %v3898_v39, %v558_v49 }
0x21fe   :  { %3200 = vset.pattern.permute.xlu1 %v3432_v8  ;;  %v563_v58 = vadd.f32 %v3905_v15, %v561_v57 }
0x2275   :  { %v553_v2 = vpop.permute.xlu1 %552 }
0x2276   :  { %v560_v47 = vmul.f32 %v3898_v39, %v553_v2 }
0x2278   :  { %v562_v51 = vadd.f32 %v3905_v15, %v560_v47 }
0x22a8   :  { %v2327_v25 = vpop.f32.mrf.mxu0 }
0x22a9   :  { %v2332_v46 = vrot.slane %v2327_v25, 1  ;;  %v2335_v1 = vadd.f32 %v2327_v25, %v562_v51 }
0x22aa   :  { %v3128_v53 = vpop.f32.mrf.mxu0 }
0x22ab   :  { %v2336_v55 = vadd.f32 %v2332_v46, %v563_v58  ;;  %v2886_v56 = vmul.f32 -1.442695, %v2335_v1 }
0x22ad   :  { %3349 = vpow2.f32 %v2886_v56  ;;  %v2887_v52 = vmul.f32 -1.442695, %v2336_v55 }
0x22af   :  { %3351 = vpow2.f32 %v2887_v52 }
0x22ba   :  { %v3350_v48 = vpop.eup %3349 }
0x22bb   :  { %v2343_v3 = vadd.f32 1.0, %v3350_v48 }
0x22bc   :  { %v3352_v5 = vpop.eup %3351 }
0x22bd   :  { %v2344_v38 = vadd.f32 1.0, %v3352_v5  ;;  %3353 = vrcp.f32 %v2343_v3 }
0x22bf   :  { %3355 = vrcp.f32 %v2344_v38 }
0x22ca   :  { %v3354_v39 = vpop.eup %3353 }
0x22cb   :  { %v2349_v62 = vmul.f32 2.0, %v3354_v39  ;;  %v2353_v16 = vmul.f32 %v3354_v39, %v4139_v59 }
0x22cc   :  { %v3356_v7 = vpop.eup %3355 }
0x22cd   :  { %v2888_v10 = vadd.f32 -1.0, %v2349_v62  ;;  %v2350_v12 = vmul.f32 2.0, %v3356_v7  ;;  %v2354_v28 = vmul.f32 %v3356_v7, %v4143_v34 }
0x22cf   :  { %2357 = vrot.lane.b32.xlu0 %v2888_v10, %s3430_s11  ;;  %v2889_v15 = vadd.f32 -1.0, %v2350_v12 }
0x22d1   :  { %2359 = vrot.lane.b32.xlu1 %v2889_v15, %s3430_s11 }
0x2341   :  { %v2358_v13 = vpop.permute.xlu0 %2357 }
0x2342   :  { %v2363_v61 = vmul.f32 %v3354_v39, %v2358_v13  ;;  %v577_v13 = vld [vmem:[%s4329_s0 + $0xf] sm:$0x1] }
0x2343   :  { %v2360_v4 = vpop.permute.xlu1 %2359 }
0x2344   :  { %v2364_v41 = vmul.f32 %v3356_v7, %v2360_v4  ;;  %2367 = vrot.lane.b32.xlu0 %v2363_v61, %s3431_s12  ;;  %v583_v4 = vmul.f32 %v577_v13, %v3526_v9 }
0x2346   :  { %2369 = vrot.lane.b32.xlu1 %v2364_v41, %s3431_s12 }
0x23b6   :  { %v2368_v18 = vpop.permute.xlu0 %2367 }
0x23b7   :  { %v4198_v50 = vadd.f32 %v2368_v18, %v2353_v16  ;;  %v595_v16 = vmul.f32 %v577_v13, %v3518_v6  ;;  %v607_v18 = vmul.f32 %v577_v13, %v3539_v14 }
0x23b8   :  { %v2370_v21 = vpop.permute.xlu1 %2369 }
0x23b9   :  { %3357 = vtanh.f32 %v4198_v50  ;;  %v4202_v24 = vadd.f32 %v2370_v21, %v2354_v28  ;;  %v579_v28 = vmul.f32 %v577_v13, %v3564_v17 }
0x23bb   :  { %3359 = vtanh.f32 %v4202_v24 }
0x23c6   :  { %v3358_v26 = vpop.eup %3357 }
0x23c7   :  { %2379 = vrot.lane.b32.xlu0 %v3358_v26, %s3430_s11 }
0x23c8   :  { %v3360_v27 = vpop.eup %3359 }
0x23c9   :  { %2381 = vrot.lane.b32.xlu1 %v3360_v27, %s3430_s11 }
0x23cb   :  { %569 = vperm.xlu0 %3199, %v549_v35  }
0x23cf   :  { %3201 = vset.pattern.permute.xlu0 %v3426_v11 }
0x2439   :  { %v2380_v59 = vpop.permute.xlu0 %2379 }
0x243a   :  { %v2385_v20 = vmul.f32 %v3354_v39, %v2380_v59 }
0x243b   :  { %v2382_v34 = vpop.permute.xlu1 %2381 }
0x243c   :  { %v2386_v30 = vmul.f32 %v3356_v7, %v2382_v34  ;;  %v576_v34 = vld [vmem:[%s4329_s0 + $0x7] sm:$0x1] }
0x243e   :  { %v2389_v23 = vrot.slane %v2386_v30, 7 }
0x2440   :  { %v2390_v31 = vsel %vm781_vm1, %v2389_v23, %v2385_v20  ;;  %v582_v23 = vmul.f32 %v576_v34, %v3526_v9 }
0x2441   :  { %2391 = vrot.lane.b32.xlu1 %v2390_v31, %s3431_s12 }
0x2445   :  { %565 = vperm.xlu1 %3200, %v548_v22  }
0x2446   :  { %v570_v37 = vpop.permute.xlu0 %569 }
0x2447   :  { %v573_v36 = vmul.f32 %v4234_v40, %v570_v37 }
0x2449   :  { %3202 = vset.pattern.permute.xlu1 %v3426_v11  ;;  %v3405_v11 = vld [vmem:[%s4333_s4 + $0x8] sm:$0xff] }
0x24b3   :  { %v2392_v32 = vpop.permute.xlu1 %2391 }
0x24b4   :  { %3138 = vmatmul.mubr.msk.f32.vlgmr.msra.gmra.mxu1 %vm648_vm2, %v2392_v32 }
0x24b5   :  { %3152 = vmatpush3.msra.mxu1 %v3403_v33  ;;  %3159 = vmatprep.mubr.msk.f32.mxu1 %vm3425_vm0, %v3424_v0  ;;  %v594_v33 = vmul.f32 %v576_v34, %v3518_v6  ;;  %v578_v6 = vmul.f32 %v576_v34, %v3564_v17 }
0x24b6   :  { %3153 = vmatprep.subr.mxu1 %v3424_v0 }
0x24b7   :  { %3154 = vmatpush3.msra.mxu1 %v3404_v60 }
0x24b8   :  { %3155 = vmatprep.subr.mxu1 %v3424_v0 }
0x24b9   :  { %3156 = vmatpush3.msra.mxu1 %v3405_v11 }
0x24ba   :  { %3157 = vmatprep.subr.mxu1 %v3424_v0  ;;  %v4241_v0 = vld [vmem:[%s4334_s5] ss:$0 sm:$0xff] }
0x24bb   :  { %3158 = vmatpush3.msra.mxu1 %v3406_v63  ;;  %v575_v54 = vadd.f32 %v4241_v0, %v573_v36 }
0x24c0   :  { %v566_v35 = vpop.permute.xlu1 %565 }
0x24c1   :  { %v572_v42 = vmul.f32 %v4234_v40, %v566_v35  ;;  %v606_v35 = vmul.f32 %v576_v34, %v3539_v14 }
0x24c3   :  { %v574_v43 = vadd.f32 %v4241_v0, %v572_v42 }
0x2574   :  { %v2461_v44 = vpop.f32.mrf.mxu1 }
0x2575   :  { %v2466_v45 = vrot.slane %v2461_v44, 1  ;;  %v2469_v19 = vadd.f32 %v2461_v44, %v574_v43 }
0x2576   :  { %v3139_v22 = vpop.f32.mrf.mxu1 }
0x2577   :  { %v2470_v2 = vadd.f32 %v2466_v45, %v575_v54  ;;  %v2891_v47 = vmul.f32 -1.442695, %v2469_v19 }
0x2579   :  { %3361 = vpow2.f32 %v2891_v47  ;;  %v2892_v49 = vmul.f32 -1.442695, %v2470_v2 }
0x257b   :  { %3363 = vpow2.f32 %v2892_v49 }
0x2586   :  { %v3362_v57 = vpop.eup %3361 }
0x2587   :  { %v2477_v51 = vadd.f32 1.0, %v3362_v57 }
0x2588   :  { %v3364_v25 = vpop.eup %3363 }
0x2589   :  { %v2478_v58 = vadd.f32 1.0, %v3364_v25  ;;  %3365 = vrcp.f32 %v2477_v51 }
0x258b   :  { %3367 = vrcp.f32 %v2478_v58 }
0x2596   :  { %v3366_v46 = vpop.eup %3365 }
0x2597   :  { %v2483_v1 = vmul.f32 2.0, %v3366_v46  ;;  %v2487_v39 = vmul.f32 %v3366_v46, %v4198_v50 }
0x2598   :  { %v3368_v53 = vpop.eup %3367 }
0x2599   :  { %v2893_v55 = vadd.f32 -1.0, %v2483_v1  ;;  %v2484_v56 = vmul.f32 2.0, %v3368_v53  ;;  %v2488_v10 = vmul.f32 %v3368_v53, %v4202_v24 }
0x259b   :  { %2491 = vrot.lane.b32.xlu0 %v2893_v55, %s3430_s11  ;;  %v2894_v52 = vadd.f32 -1.0, %v2484_v56 }
0x259d   :  { %2493 = vrot.lane.b32.xlu1 %v2894_v52, %s3430_s11 }
0x260d   :  { %v2492_v48 = vpop.permute.xlu0 %2491 }
0x260e   :  { %v2497_v3 = vmul.f32 %v3366_v46, %v2492_v48 }
0x260f   :  { %v2494_v5 = vpop.permute.xlu1 %2493 }
0x2610   :  { %v2498_v38 = vmul.f32 %v3368_v53, %v2494_v5  ;;  %2501 = vrot.lane.b32.xlu0 %v2497_v3, %s3431_s12 }
0x2612   :  { %2503 = vrot.lane.b32.xlu1 %v2498_v38, %s3431_s12 }
0x2682   :  { %v2502_v62 = vpop.permute.xlu0 %2501 }
0x2683   :  { %v4250_v7 = vadd.f32 %v2502_v62, %v2487_v39 }
0x2684   :  { %v2504_v12 = vpop.permute.xlu1 %2503 }
0x2685   :  { %3369 = vtanh.f32 %v4250_v7  ;;  %v4254_v15 = vadd.f32 %v2504_v12, %v2488_v10 }
0x2687   :  { %3371 = vtanh.f32 %v4254_v15 }
0x2692   :  { %v3370_v61 = vpop.eup %3369 }
0x2693   :  { %2513 = vrot.lane.b32.xlu0 %v3370_v61, %s3430_s11 }
0x2694   :  { %v3372_v41 = vpop.eup %3371 }
0x2695   :  { %2515 = vrot.lane.b32.xlu1 %v3372_v41, %s3430_s11 }
0x2697   :  { %588 = vrot.lane.b32.xlu0 %v583_v4, %s3428_s25 }
0x269b   :  { %600 = vrot.lane.b32.xlu0 %v595_v16, %s3427_s24 }
0x269f   :  { %612 = vrot.lane.b32.xlu0 %v607_v18, %s3429_s26 }
0x2705   :  { %v2514_v50 = vpop.permute.xlu0 %2513 }
0x2706   :  { %v2519_v27 = vmul.f32 %v3366_v46, %v2514_v50 }
0x2707   :  { %v2516_v21 = vpop.permute.xlu1 %2515 }
0x2708   :  { %v2520_v24 = vmul.f32 %v3368_v53, %v2516_v21 }
0x2709   :  { %v589_v26 = vpop.permute.xlu0 %588 }
0x270a   :  { %v2523_v59 = vrot.slane %v2520_v24, 7  ;;  %v593_v30 = vadd.f32 %v589_v26, %v579_v28 }
0x270c   :  { %v2524_v20 = vsel %vm781_vm1, %v2523_v59, %v2519_v27 }
0x270d   :  { %2525 = vrot.lane.b32.xlu1 %v2524_v20, %s3431_s12  ;;  %v601_v31 = vpop.permute.xlu0 %600 }
0x270e   :  { %v605_v32 = vadd.f32 %v601_v31, %v593_v30 }
0x2711   :  { %586 = vrot.lane.b32.xlu1 %v582_v23, %s3428_s25  ;;  %v613_v60 = vpop.permute.xlu0 %612  ;;  %s3433_s25 = smov 96  }
0x2712   :  { %v617_v11 = vadd.f32 %v613_v60, %v605_v32 }
0x2714   :  { %v4278_v63 = vadd.f32 %v617_v11, %v3571_v29 }
0x2715   :  { %598 = vrot.lane.b32.xlu1 %v594_v33, %s3427_s24 }
0x2716   :  { %v621_v37 = vmax.f32 %v4278_v63, 0.0 }
0x2718   :  { %629 = vperm.xlu0 %3201, %v621_v37  }
0x2719   :  { %610 = vrot.lane.b32.xlu1 %v606_v35, %s3429_s26 }
0x271c   :  { %3203 = vset.pattern.permute.xlu0 %v3432_v8 }
0x277f   :  { %v2526_v9 = vpop.permute.xlu1 %2525 }
0x2780   :  { %3149 = vmatmul.mubr.msk.f32.vlgmr.msra.gmra.mxu0 %vm648_vm2, %v2526_v9 }
0x2783   :  { %v587_v42 = vpop.permute.xlu1 %586 }
0x2784   :  { %v592_v36 = vadd.f32 %v587_v42, %v578_v6 }
0x2787   :  { %v599_v43 = vpop.permute.xlu1 %598 }
0x2788   :  { %v604_v44 = vadd.f32 %v599_v43, %v592_v36 }
0x278b   :  { %v611_v54 = vpop.permute.xlu1 %610 }
0x278c   :  { %v616_v14 = vadd.f32 %v611_v54, %v604_v44 }
0x278e   :  { %v618_v45 = vadd.f32 %v616_v14, %v3571_v29 }
0x2790   :  { %v620_v19 = vmax.f32 %v618_v45, 0.0 }
0x2792   :  { %624 = vperm.xlu1 %3202, %v620_v19  }
0x2793   :  { %v630_v47 = vpop.permute.xlu0 %629 }
0x2794   :  { %v633_v49 = vmul.f32 %v4234_v40, %v630_v47 }
0x2796   :  { %3204 = vset.pattern.permute.xlu1 %v3432_v8  ;;  %v635_v51 = vadd.f32 %v4241_v0, %v633_v49 }
0x280d   :  { %v625_v22 = vpop.permute.xlu1 %624 }
0x280e   :  { %v632_v2 = vmul.f32 %v4234_v40, %v625_v22 }
0x2810   :  { %v634_v17 = vadd.f32 %v4241_v0, %v632_v2 }
0x2840   :  { %v2595_v57 = vpop.f32.mrf.mxu0 }
0x2841   :  { %v2600_v25 = vrot.slane %v2595_v57, 1  ;;  %v2603_v58 = vadd.f32 %v2595_v57, %v634_v17 }
0x2842   :  { %v3150_v46 = vpop.f32.mrf.mxu0 }
0x2843   :  { %v2604_v1 = vadd.f32 %v2600_v25, %v635_v51  ;;  %v2896_v29 = vmul.f32 -1.442695, %v2603_v58 }
0x2845   :  { %3373 = vpow2.f32 %v2896_v29  ;;  %v2897_v53 = vmul.f32 -1.442695, %v2604_v1 }
0x2847   :  { %3375 = vpow2.f32 %v2897_v53 }
0x2852   :  { %v3374_v8 = vpop.eup %3373 }
0x2853   :  { %v2611_v55 = vadd.f32 1.0, %v3374_v8  ;;  %v2905_v8 = vld [vmem:[%s4335_s6] ss:$0 sm:$0xff] }
0x2854   :  { %v3376_v56 = vpop.eup %3375 }
0x2855   :  { %v2612_v52 = vadd.f32 1.0, %v3376_v56  ;;  %3377 = vrcp.f32 %v2611_v55 }
0x2857   :  { %3379 = vrcp.f32 %v2612_v52 }
0x2862   :  { %v3378_v48 = vpop.eup %3377 }
0x2863   :  { %v2617_v3 = vmul.f32 2.0, %v3378_v48  ;;  %v2621_v4 = vmul.f32 %v3378_v48, %v4250_v7 }
0x2864   :  { %v3380_v5 = vpop.eup %3379 }
0x2865   :  { %v2898_v38 = vadd.f32 -1.0, %v2617_v3  ;;  %v2618_v39 = vmul.f32 2.0, %v3380_v5  ;;  %v2622_v18 = vmul.f32 %v3380_v5, %v4254_v15 }
0x2867   :  { %2625 = vrot.lane.b32.xlu0 %v2898_v38, %s3430_s11  ;;  %v2899_v62 = vadd.f32 -1.0, %v2618_v39 }
0x2869   :  { %2627 = vrot.lane.b32.xlu1 %v2899_v62, %s3430_s11 }
0x28d9   :  { %v2626_v10 = vpop.permute.xlu0 %2625 }
0x28da   :  { %v2631_v12 = vmul.f32 %v3378_v48, %v2626_v10 }
0x28db   :  { %v2628_v13 = vpop.permute.xlu1 %2627 }
0x28dc   :  { %v2632_v61 = vmul.f32 %v3380_v5, %v2628_v13  ;;  %2635 = vrot.lane.b32.xlu0 %v2631_v12, %s3431_s12  ;;  %v2812_v13 = vstv %s4336_s7 }
0x28de   :  { %2637 = vrot.lane.b32.xlu1 %v2632_v61, %s3431_s12 }
0x294e   :  { %v2636_v41 = vpop.permute.xlu0 %2635 }
0x294f   :  { %v2641_v16 = vadd.f32 %v2636_v41, %v2621_v4 }
0x2950   :  { %v2638_v50 = vpop.permute.xlu1 %2637 }
0x2951   :  { %3381 = vtanh.f32 %v2641_v16  ;;  %v2642_v28 = vadd.f32 %v2638_v50, %v2622_v18 }
0x2953   :  { %3383 = vtanh.f32 %v2642_v28 }
0x295e   :  { %v3382_v21 = vpop.eup %3381 }
0x295f   :  { %2647 = vrot.lane.b32.xlu0 %v3382_v21, %s3430_s11 }
0x2960   :  { %v3384_v24 = vpop.eup %3383 }
0x2961   :  { %2649 = vrot.lane.b32.xlu1 %v3384_v24, %s3430_s11 }
0x2963   :  { %641 = vperm.xlu0 %3203, %v621_v37  }
0x29d1   :  { %v2648_v26 = vpop.permute.xlu0 %2647 }
0x29d2   :  { %v2653_v59 = vmul.f32 %v3378_v48, %v2648_v26 }
0x29d3   :  { %v2650_v27 = vpop.permute.xlu1 %2649 }
0x29d4   :  { %v2654_v7 = vmul.f32 %v3380_v5, %v2650_v27 }
0x29d6   :  { %v2657_v34 = vrot.slane %v2654_v7, 7 }
0x29d8   :  { %v2658_v15 = vsel %vm781_vm1, %v2657_v34, %v2653_v59 }
0x29d9   :  { %2659 = vrot.lane.b32.xlu1 %v2658_v15, %s3431_s12 }
0x29dd   :  { %637 = vperm.xlu1 %3204, %v620_v19  }
0x29de   :  { %v642_v23 = vpop.permute.xlu0 %641 }
0x29df   :  { %v645_v32 = vmul.f32 %v4234_v40, %v642_v23 }
0x29e1   :  { %v647_v11 = vadd.f32 %v4241_v0, %v645_v32 }
0x2a4b   :  { %v2660_v30 = vpop.permute.xlu1 %2659 }
0x2a4c   :  { %3160 = vmatmul.mubr.msk.f32.vlgmr.msra.gmra.mxu1 %vm648_vm2, %v2660_v30 }
0x2a58   :  { %v638_v20 = vpop.permute.xlu1 %637 }
0x2a59   :  { %v644_v31 = vmul.f32 %v4234_v40, %v638_v20 }
0x2a5b   :  { %v646_v33 = vadd.f32 %v4241_v0, %v644_v31 }
0x2b0c   :  { %v2729_v60 = vpop.f32.mrf.mxu1 }
0x2b0d   :  { %v2734_v63 = vrot.slane %v2729_v60, 1  ;;  %v2737_v35 = vadd.f32 %v2729_v60, %v646_v33 }
0x2b0e   :  { %v3161_v37 = vpop.f32.mrf.mxu1 }
0x2b0f   :  { %v2738_v9 = vadd.f32 %v2734_v63, %v647_v11  ;;  %v2901_v6 = vmul.f32 -1.442695, %v2737_v35 }
0x2b11   :  { %3385 = vpow2.f32 %v2901_v6  ;;  %v2902_v42 = vmul.f32 -1.442695, %v2738_v9 }
0x2b13   :  { %3387 = vpow2.f32 %v2902_v42 }
0x2b1e   :  { %v3386_v36 = vpop.eup %3385 }
0x2b1f   :  { %v2745_v43 = vadd.f32 1.0, %v3386_v36 }
0x2b20   :  { %v3388_v44 = vpop.eup %3387 }
0x2b21   :  { %v2746_v54 = vadd.f32 1.0, %v3388_v44  ;;  %3389 = vrcp.f32 %v2745_v43 }
0x2b23   :  { %3391 = vrcp.f32 %v2746_v54 }
0x2b2e   :  { %v3390_v40 = vpop.eup %3389 }
0x2b2f   :  { %v2751_v14 = vmul.f32 2.0, %v3390_v40  ;;  %v2755_v57 = vmul.f32 %v3390_v40, %v2641_v16 }
0x2b30   :  { %v3392_v45 = vpop.eup %3391 }
0x2b31   :  { %v2903_v19 = vadd.f32 -1.0, %v2751_v14  ;;  %v2752_v22 = vmul.f32 2.0, %v3392_v45  ;;  %v2756_v58 = vmul.f32 %v3392_v45, %v2642_v28 }
0x2b33   :  { %2759 = vrot.lane.b32.xlu0 %v2903_v19, %s3430_s11  ;;  %v2904_v0 = vadd.f32 -1.0, %v2752_v22 }
0x2b35   :  { %2761 = vrot.lane.b32.xlu1 %v2904_v0, %s3430_s11 }
0x2ba5   :  { %v2760_v2 = vpop.permute.xlu0 %2759 }
0x2ba6   :  { %v2765_v47 = vmul.f32 %v3390_v40, %v2760_v2 }
0x2ba7   :  { %v2762_v49 = vpop.permute.xlu1 %2761 }
0x2ba8   :  { %v2766_v17 = vmul.f32 %v3392_v45, %v2762_v49  ;;  %2769 = vrot.lane.b32.xlu0 %v2765_v47, %s3431_s12 }
0x2baa   :  { %2771 = vrot.lane.b32.xlu1 %v2766_v17, %s3431_s12 }
0x2c1a   :  { %v2770_v51 = vpop.permute.xlu0 %2769 }
0x2c1b   :  { %v2775_v25 = vadd.f32 %v2770_v51, %v2755_v57 }
0x2c1c   :  { %v2772_v46 = vpop.permute.xlu1 %2771 }
0x2c1d   :  { %3393 = vtanh.f32 %v2775_v25  ;;  %v2776_v1 = vadd.f32 %v2772_v46, %v2756_v58 }
0x2c1f   :  { %3395 = vtanh.f32 %v2776_v1 }
0x2c2a   :  { %v3394_v29 = vpop.eup %3393 }
0x2c2b   :  { %2781 = vrot.lane.b32.xlu0 %v3394_v29, %s3430_s11 }
0x2c2c   :  { %v3396_v53 = vpop.eup %3395 }
0x2c2d   :  { %2783 = vrot.lane.b32.xlu1 %v3396_v53, %s3430_s11 }
0x2c31   :  { %2795 = vrot.lane.b32.xlu1 %v2905_v8, %s3433_s25 }
0x2c9d   :  { %v2782_v56 = vpop.permute.xlu0 %2781 }
0x2c9e   :  { %v2787_v3 = vmul.f32 %v3390_v40, %v2782_v56 }
0x2c9f   :  { %v2784_v55 = vpop.permute.xlu1 %2783 }
0x2ca0   :  { %v2788_v52 = vmul.f32 %v3392_v45, %v2784_v55 }
0x2ca3   :  { %v2796_v48 = vpop.permute.xlu1 %2795 }
0x2ca4   :  { %v2799_v5 = vmul.f32 %v2796_v48, %v2788_v52  ;;  %v2798_v38 = vmul.f32 %v2796_v48, %v2787_v3 }
0x2ca6   :  { %v2802_v39 = vrot.slane %v2799_v5, 7 }
0x2ca8   :  { %v2803_v62 = vsel %vm781_vm1, %v2802_v39, %v2798_v38 }
0x2ca9   :  { %2804 = vrot.lane.b32.xlu0 %v2803_v62, %s3431_s12 }
0x2d1b   :  { %v2805_v10 = vpop.permute.xlu0 %2804 }
0x2d1c   :  { %v2808_v12 = vsel %vm2807_vm3, %v2805_v10, 0.0 }
0x2d1d   :  { %2809 = vadd.xlane.f32.xlu1 %v2808_v12 }
0x2da6   :  { %v2810_v61 = vpop.xlane.xlu1 %2809 }
0x2da7   :  { %v2813_v4 = vadd.f32 %v2812_v13, %v2810_v61 }
0x2da9   :  { %2815 = vst.msk [vmem:[%s4337_s8] sm:$0x3] %vm2814_vm4, %v2813_v4 }
0x2daa   :  { %2820 = vsyncpa [#allocation5], 1 }

</bundles_post_ra>
